<compile_context>
chip_gen: v6e
topology: v6e:2x2x1
jax: 0.10.0
libtpu: 0.0.40
codegen_flags: <defaults>
</compile_context>

<pallas_src>
import jax
import jax.numpy as jnp
from jax.experimental import pallas as pl
from jax.experimental.pallas import tpu as pltpu

# Small shapes consistent with the module's forward.
T = 8          # seq_len
H = 16         # hidden_size
B = 2 * H      # batch  (classifier Linear(2H, 1) is applied over batch)
E = 16         # embedding_dim
V = 64         # vocab_size


# ----------------------------------------------------------------------------
# Single fused kernel.
# ----------------------------------------------------------------------------
def fused_lstm_kernel(tok_ref, tproj_ref, whh0_ref, b0_ref,
                      wih1_ref, whh1_ref, b1_ref, whead_ref, bhead_ref,
                      out_ref, g0_scr):
    TB = T * B

    # --- Embedding lookup fused with layer-0 input projection -------------
    # one-hot (TB, V) @ table_proj (V, 4H) where table_proj = E @ W_ih0 was
    # precomputed in the wrapper.  One-hot built directly in bf16 (exact 0/1)
    # so the MXU push is single-pass.  Result (incl. b0) goes straight to a
    # VMEM scratch so it never sits in vregs across the recurrence.
    tok = tok_ref[...]                                            # (TB,1) i32
    vocab_iota = jax.lax.broadcasted_iota(jnp.int32, (TB, V), 1)
    onehot = (tok == vocab_iota).astype(jnp.bfloat16)             # (TB, V)
    g0_scr[...] = (jnp.dot(onehot, tproj_ref[...],
                           preferred_element_type=jnp.float32)
                   + b0_ref[...])                                 # (TB, 4H) f32

    whh0 = whh0_ref[...]                                          # (H, 4H) bf16
    wih1 = wih1_ref[...]                                          # (H, 4H) bf16
    whh1 = whh1_ref[...]                                          # (H, 4H) bf16
    b1 = b1_ref[...]                                              # (1, 4H) f32
    w_head = whead_ref[...]                                       # (B, H)  f32

    bf16 = jnp.bfloat16

    def act(g):
        # One wide sigmoid over (B, 4H) + one tanh over the g-chunk.
        s = jax.nn.sigmoid(g)
        i = s[:, 0:H]
        f = s[:, H:2 * H]
        gg = jnp.tanh(g[:, 2 * H:3 * H])
        o = s[:, 3 * H:4 * H]
        return i, f, gg, o

    # --- Unrolled recurrence; per-iteration live set stays small -----------
    h1 = jnp.zeros((B, H), jnp.float32)
    c1 = jnp.zeros((B, H), jnp.float32)
    h2 = jnp.zeros((B, H), jnp.float32)
    c2 = jnp.zeros((B, H), jnp.float32)
    row_ids = jax.lax.broadcasted_iota(jnp.int32, (T, 1), 0)
    cls_acc = jnp.zeros((T, 1), jnp.float32)

    for t in range(T):                                            # static unroll
        # layer 0: input projection already hoisted; only the recurrent matmul.
        g0 = (jnp.dot(h1.astype(bf16), whh0,
                      preferred_element_type=jnp.float32)
              + g0_scr[pl.ds(t * B, B), :])
        i0, f0, gg0, o0 = act(g0)
        c1 = f0 * c1 + i0 * gg0
        h1 = o0 * jnp.tanh(c1)

        # layer 1: split dots (no concat); h2 @ W_hh1 depends only on h2(t-1).
        g1 = (jnp.dot(h1.astype(bf16), wih1, preferred_element_type=jnp.float32)
              + jnp.dot(h2.astype(bf16), whh1, preferred_element_type=jnp.float32)
              + b1)
        i1, f1, gg1, o1 = act(g1)
        c2 = f1 * c2 + i1 * gg1
        h2 = o1 * jnp.tanh(c2)

        # Head folded into the loop: rank-1 reduction against w_head (f32 VPU/XLU).
        # TODO(synk): nn.Dropout(p=0.5) on the LSTM output is eval-mode identity.
        cls_t = jnp.sum(h2 * w_head, keepdims=True)               # (1, 1)
        cls_acc = cls_acc + jnp.where(row_ids == t, cls_t, 0.0)   # (T, 1)

    out_ref[...] = jax.nn.sigmoid(cls_acc + bhead_ref[...])       # (T, 1)


# ----------------------------------------------------------------------------
# Wrapper: one pallas_call, everything resident in VMEM, no grid.
# TODO(synk): on v7x this single invocation uses 1 of 2 TensorCores; for a
# workload with multiple independent sequences, add a leading grid axis with
# dimension_semantics=("parallel",) to use both cores.
# ----------------------------------------------------------------------------
def naive_lstm_forward(tokens, kparams):
    assert B == 2 * H, "classifier Linear(2H,1) is applied over the batch axis"
    assert tokens.shape == (T, B), tokens.shape
    tok2d = tokens.reshape(T * B, 1).astype(jnp.int32)
    vmem = pl.BlockSpec(memory_space=pltpu.MemorySpace.VMEM)

    probs = pl.pallas_call(
        fused_lstm_kernel,
        out_shape=jax.ShapeDtypeStruct((T, 1), jnp.float32),
        in_specs=[vmem] * 9,
        out_specs=vmem,
        scratch_shapes=[pltpu.VMEM((T * B, 4 * H), jnp.float32)],
    )(tok2d,
      kparams["table_proj"], kparams["whh0"], kparams["b0"],
      kparams["wih1"], kparams["whh1"], kparams["b1"],
      kparams["w_head"], kparams["bias_head"])

    return probs[:, 0]                                            # (T,)


# ----------------------------------------------------------------------------
# One-time, weight-only param prep (outside the per-call forward).
# ----------------------------------------------------------------------------
def prepare_kernel_params(p):
    table_proj = jnp.dot(p["embedding"], p["wih0"])               # (V, 4H) f32
    w_head = p["w_cls"][0][:, None] * p["w_fc2"][0][None, :]      # (B, H)
    bias_head = (p["b_fc2"][0, 0] * jnp.sum(p["w_cls"])
                 + p["b_cls"][0, 0]).reshape(1, 1)                # (1, 1)
    return {
        "table_proj": table_proj.astype(jnp.bfloat16),
        "whh0": p["whh0"].astype(jnp.bfloat16),
        "b0": p["b0"].astype(jnp.float32),
        "wih1": p["wih1"].astype(jnp.bfloat16),
        "whh1": p["whh1"].astype(jnp.bfloat16),
        "b1": p["b1"].astype(jnp.float32),
        "w_head": w_head.astype(jnp.float32),
        "bias_head": bias_head.astype(jnp.float32),
    }


# ----------------------------------------------------------------------------
# Pure-JAX f32 reference (same math as the PyTorch forward, eval mode).
# ----------------------------------------------------------------------------
def reference(tokens, p):
    emb = jnp.take(p["embedding"], tokens, axis=0)                # (T, B, E)

    def cell(x, h, c, wih, whh, b):
        g = x @ wih + h @ whh + b
        i = jax.nn.sigmoid(g[:, :H]); f = jax.nn.sigmoid(g[:, H:2 * H])
        gg = jnp.tanh(g[:, 2 * H:3 * H]); o = jax.nn.sigmoid(g[:, 3 * H:])
        c = f * c + i * gg
        return o * jnp.tanh(c), c

    def step(carry, x):
        h1, c1, h2, c2 = carry
        h1, c1 = cell(x, h1, c1, p["wih0"], p["whh0"], p["b0"])
        h2, c2 = cell(h1, h2, c2, p["wih1"], p["whh1"], p["b1"])
        return (h1, c1, h2, c2), h2

    init = tuple(jnp.zeros((B, H), jnp.float32) for _ in range(4))
    _, ys = jax.lax.scan(step, init, emb)                         # (T, B, H)
    fc2 = jnp.sum(ys * p["w_fc2"][None], axis=-1) + p["b_fc2"][0, 0]   # (T, B)
    cls = jnp.sum(fc2 * p["w_cls"], axis=-1) + p["b_cls"][0, 0]        # (T,)
    return jax.nn.sigmoid(cls)


def init_params(key):
    ks = jax.random.split(key, 14)
    s = 1.0 / jnp.sqrt(H)
    u = lambda k, shape: jax.random.uniform(k, shape, jnp.float32, -s, s)
    return {
        "embedding": jax.random.normal(ks[0], (V, E), jnp.float32) * 0.1,
        # LSTM weights stored pre-transposed: (in, 4H) so the math is x @ W.
        "wih0": u(ks[1], (E, 4 * H)),
        "whh0": u(ks[2], (H, 4 * H)),
        "b0":   u(ks[3], (1, 4 * H)) + u(ks[4], (1, 4 * H)),      # b_ih + b_hh
        "wih1": u(ks[5], (H, 4 * H)),
        "whh1": u(ks[6], (H, 4 * H)),
        "b1":   u(ks[7], (1, 4 * H)) + u(ks[8], (1, 4 * H)),
        "w_fc2": u(ks[9], (1, H)),                    # Linear(H, 1) weight row
        "b_fc2": u(ks[10], (1, 1)),
        "w_cls": u(ks[11], (1, B)),                   # Linear(2H, 1) weight row
        "b_cls": u(ks[12], (1, 1)),
    }


if __name__ == "__main__":
    key = jax.random.PRNGKey(0)
    kp, kt = jax.random.split(key)
    raw = init_params(kp)
    kparams = prepare_kernel_params(raw)       # weight-only work, done once
    tokens = jax.random.randint(kt, (T, B), 0, V, dtype=jnp.int32)

    out = jax.block_until_ready(naive_lstm_forward(tokens, kparams))
    ref = jax.block_until_ready(reference(tokens, raw))

    assert out.shape == (T,), out.shape
    # bf16 MXU operands (f32 accumulation) vs. pure-f32 reference: observed
    # error ~1e-3 on the sigmoid output; bound set at 1e-2.
    assert jnp.allclose(out, ref, atol=1e-2, rtol=1e-2), (out, ref)
    print("KERNEL_OK")
</pallas_src>

<mosaic_0001>
module attributes {stable_mosaic.version = 11 : i64} {
  func.func @fused_lstm_kernel(%arg0: memref<256x1xi32, #tpu.memory_space<vmem>>, %arg1: memref<64x64xbf16, #tpu.memory_space<vmem>>, %arg2: memref<16x64xbf16, #tpu.memory_space<vmem>>, %arg3: memref<1x64xf32, #tpu.memory_space<vmem>>, %arg4: memref<16x64xbf16, #tpu.memory_space<vmem>>, %arg5: memref<16x64xbf16, #tpu.memory_space<vmem>>, %arg6: memref<1x64xf32, #tpu.memory_space<vmem>>, %arg7: memref<32x16xf32, #tpu.memory_space<vmem>>, %arg8: memref<1x1xf32, #tpu.memory_space<vmem>>, %arg9: memref<8x1xf32, #tpu.memory_space<vmem>>, %arg10: memref<256x64xf32, #tpu.memory_space<vmem>>) attributes {dimension_semantics = [], scalar_prefetch = 0 : i64, scratch_operands = 1 : i64, tpu.core_type = #tpu.core_type<tc>} {
    %c0 = arith.constant 0 : index
    %c0_0 = arith.constant 0 : index
    %0 = vector.load %arg0[%c0, %c0_0] : memref<256x1xi32, #tpu.memory_space<vmem>>, vector<256x1xi32>
    %1 = tpu.iota {dimensions = array<i32: 1>} : vector<256x64xi32>
    %2 = vector.broadcast %0 : vector<256x1xi32> to vector<256x64xi32>
    %3 = arith.cmpi eq, %2, %1 : vector<256x64xi32>
    %4 = arith.extui %3 : vector<256x64xi1> to vector<256x64xi32>
    %5 = arith.sitofp %4 : vector<256x64xi32> to vector<256x64xf32>
    %6 = arith.truncf %5 : vector<256x64xf32> to vector<256x64xbf16>
    %c0_1 = arith.constant 0 : index
    %c0_2 = arith.constant 0 : index
    %7 = vector.load %arg1[%c0_1, %c0_2] : memref<64x64xbf16, #tpu.memory_space<vmem>>, vector<64x64xbf16>
    %cst = arith.constant dense<0.000000e+00> : vector<256x64xf32>
    %8 = tpu.matmul %6, %7, %cst {dimension_numbers = #tpu.dot_dimension_numbers<[1], [0], [0], [1], [0, 0, 1, 1], [], []>} : vector<256x64xbf16>, vector<64x64xbf16>, vector<256x64xf32> -> vector<256x64xf32>
    %c0_3 = arith.constant 0 : index
    %c0_4 = arith.constant 0 : index
    %9 = vector.load %arg3[%c0_3, %c0_4] : memref<1x64xf32, #tpu.memory_space<vmem>>, vector<1x64xf32>
    %10 = vector.broadcast %9 : vector<1x64xf32> to vector<256x64xf32>
    %11 = arith.addf %8, %10 : vector<256x64xf32>
    %c0_5 = arith.constant 0 : index
    %c0_6 = arith.constant 0 : index
    %12 = vector.load %arg10[%c0_5, %c0_6] : memref<256x64xf32, #tpu.memory_space<vmem>>, vector<256x64xf32>
    tpu.vector_store %arg10[%c0_5, %c0_6], %11 {strides = array<i32>} : memref<256x64xf32, #tpu.memory_space<vmem>>, vector<256x64xf32>,
    %c0_7 = arith.constant 0 : index
    %c0_8 = arith.constant 0 : index
    %13 = vector.load %arg2[%c0_7, %c0_8] : memref<16x64xbf16, #tpu.memory_space<vmem>>, vector<16x64xbf16>
    %c0_9 = arith.constant 0 : index
    %c0_10 = arith.constant 0 : index
    %14 = vector.load %arg4[%c0_9, %c0_10] : memref<16x64xbf16, #tpu.memory_space<vmem>>, vector<16x64xbf16>
    %c0_11 = arith.constant 0 : index
    %c0_12 = arith.constant 0 : index
    %15 = vector.load %arg5[%c0_11, %c0_12] : memref<16x64xbf16, #tpu.memory_space<vmem>>, vector<16x64xbf16>
    %c0_13 = arith.constant 0 : index
    %c0_14 = arith.constant 0 : index
    %16 = vector.load %arg6[%c0_13, %c0_14] : memref<1x64xf32, #tpu.memory_space<vmem>>, vector<1x64xf32>
    %c0_15 = arith.constant 0 : index
    %c0_16 = arith.constant 0 : index
    %17 = vector.load %arg7[%c0_15, %c0_16] : memref<32x16xf32, #tpu.memory_space<vmem>>, vector<32x16xf32>
    %cst_17 = arith.constant 0.000000e+00 : f32
    %18 = vector.broadcast %cst_17 : f32 to vector<32x16xf32>
    %cst_18 = arith.constant 0.000000e+00 : f32
    %19 = vector.broadcast %cst_18 : f32 to vector<32x16xf32>
    %cst_19 = arith.constant 0.000000e+00 : f32
    %20 = vector.broadcast %cst_19 : f32 to vector<32x16xf32>
    %cst_20 = arith.constant 0.000000e+00 : f32
    %21 = vector.broadcast %cst_20 : f32 to vector<32x16xf32>
    %22 = tpu.iota {dimensions = array<i32: 0>} : vector<8x1xi32>
    %cst_21 = arith.constant 0.000000e+00 : f32
    %23 = vector.broadcast %cst_21 : f32 to vector<8x1xf32>
    %24 = arith.truncf %18 : vector<32x16xf32> to vector<32x16xbf16>
    %cst_22 = arith.constant dense<0.000000e+00> : vector<32x64xf32>
    %25 = tpu.matmul %24, %13, %cst_22 {dimension_numbers = #tpu.dot_dimension_numbers<[1], [0], [0], [1], [0, 0, 1, 1], [], []>} : vector<32x16xbf16>, vector<16x64xbf16>, vector<32x64xf32> -> vector<32x64xf32>
    %c0_23 = arith.constant 0 : index
    %c0_24 = arith.constant 0 : index
    %26 = vector.load %arg10[%c0_23, %c0_24] : memref<256x64xf32, #tpu.memory_space<vmem>>, vector<32x64xf32>
    %27 = arith.addf %25, %26 : vector<32x64xf32>
    %28 = arith.negf %27 : vector<32x64xf32>
    %29 = math.exp %28 : vector<32x64xf32>
    %cst_25 = arith.constant 1.000000e+00 : f32
    %30 = vector.broadcast %cst_25 : f32 to vector<32x64xf32>
    %31 = arith.addf %30, %29 : vector<32x64xf32>
    %32 = arith.divf %30, %31 : vector<32x64xf32>
    %33 = vector.extract_strided_slice %32 {offsets = [0, 0], sizes = [32, 16], strides = [1, 1]} : vector<32x64xf32> to vector<32x16xf32>
    %34 = vector.extract_strided_slice %32 {offsets = [0, 16], sizes = [32, 16], strides = [1, 1]} : vector<32x64xf32> to vector<32x16xf32>
    %35 = vector.extract_strided_slice %27 {offsets = [0, 32], sizes = [32, 16], strides = [1, 1]} : vector<32x64xf32> to vector<32x16xf32>
    %36 = math.tanh %35 : vector<32x16xf32>
    %37 = vector.extract_strided_slice %32 {offsets = [0, 48], sizes = [32, 16], strides = [1, 1]} : vector<32x64xf32> to vector<32x16xf32>
    %38 = arith.mulf %34, %19 : vector<32x16xf32>
    %39 = arith.mulf %33, %36 : vector<32x16xf32>
    %40 = arith.addf %38, %39 : vector<32x16xf32>
    %41 = math.tanh %40 : vector<32x16xf32>
    %42 = arith.mulf %37, %41 : vector<32x16xf32>
    %43 = arith.truncf %42 : vector<32x16xf32> to vector<32x16xbf16>
    %cst_26 = arith.constant dense<0.000000e+00> : vector<32x64xf32>
    %44 = tpu.matmul %43, %14, %cst_26 {dimension_numbers = #tpu.dot_dimension_numbers<[1], [0], [0], [1], [0, 0, 1, 1], [], []>} : vector<32x16xbf16>, vector<16x64xbf16>, vector<32x64xf32> -> vector<32x64xf32>
    %45 = arith.truncf %20 : vector<32x16xf32> to vector<32x16xbf16>
    %cst_27 = arith.constant dense<0.000000e+00> : vector<32x64xf32>
    %46 = tpu.matmul %45, %15, %cst_27 {dimension_numbers = #tpu.dot_dimension_numbers<[1], [0], [0], [1], [0, 0, 1, 1], [], []>} : vector<32x16xbf16>, vector<16x64xbf16>, vector<32x64xf32> -> vector<32x64xf32>
    %47 = arith.addf %44, %46 : vector<32x64xf32>
    %48 = vector.broadcast %16 : vector<1x64xf32> to vector<32x64xf32>
    %49 = arith.addf %47, %48 : vector<32x64xf32>
    %50 = arith.negf %49 : vector<32x64xf32>
    %51 = math.exp %50 : vector<32x64xf32>
    %cst_28 = arith.constant 1.000000e+00 : f32
    %52 = vector.broadcast %cst_28 : f32 to vector<32x64xf32>
    %53 = arith.addf %52, %51 : vector<32x64xf32>
    %54 = arith.divf %52, %53 : vector<32x64xf32>
    %55 = vector.extract_strided_slice %54 {offsets = [0, 0], sizes = [32, 16], strides = [1, 1]} : vector<32x64xf32> to vector<32x16xf32>
    %56 = vector.extract_strided_slice %54 {offsets = [0, 16], sizes = [32, 16], strides = [1, 1]} : vector<32x64xf32> to vector<32x16xf32>
    %57 = vector.extract_strided_slice %49 {offsets = [0, 32], sizes = [32, 16], strides = [1, 1]} : vector<32x64xf32> to vector<32x16xf32>
    %58 = math.tanh %57 : vector<32x16xf32>
    %59 = vector.extract_strided_slice %54 {offsets = [0, 48], sizes = [32, 16], strides = [1, 1]} : vector<32x64xf32> to vector<32x16xf32>
    %60 = arith.mulf %56, %21 : vector<32x16xf32>
    %61 = arith.mulf %55, %58 : vector<32x16xf32>
    %62 = arith.addf %60, %61 : vector<32x16xf32>
    %63 = math.tanh %62 : vector<32x16xf32>
    %64 = arith.mulf %59, %63 : vector<32x16xf32>
    %65 = arith.mulf %64, %17 : vector<32x16xf32>
    %66 = vector.shape_cast %65 : vector<32x16xf32> to vector<1x32x16xf32>
    %cst_29 = arith.constant dense<0.000000e+00> : vector<1xf32>
    %67 = vector.multi_reduction <add>, %66, %cst_29 [1, 2] : vector<1x32x16xf32> to vector<1xf32>
    %68 = vector.shape_cast %67 : vector<1xf32> to vector<1x1x1xf32>
    %69 = vector.extract %68[0, 0, 0] : f32 from vector<1x1x1xf32>
    %70 = vector.broadcast %69 : f32 to vector<1x1xf32>
    %c0_i32 = arith.constant 0 : i32
    %71 = vector.broadcast %c0_i32 : i32 to vector<8x1xi32>
    %72 = arith.cmpi eq, %22, %71 : vector<8x1xi32>
    %cst_30 = arith.constant 0.000000e+00 : f32
    %73 = vector.shape_cast %70 : vector<1x1xf32> to vector<1x1xf32>
    %74 = vector.broadcast %73 : vector<1x1xf32> to vector<8x1xf32>
    %75 = vector.broadcast %cst_30 : f32 to vector<8x1xf32>
    %76 = arith.select %72, %74, %75 : vector<8x1xi1>, vector<8x1xf32>
    %77 = arith.addf %23, %76 : vector<8x1xf32>
    %78 = arith.truncf %42 : vector<32x16xf32> to vector<32x16xbf16>
    %cst_31 = arith.constant dense<0.000000e+00> : vector<32x64xf32>
    %79 = tpu.matmul %78, %13, %cst_31 {dimension_numbers = #tpu.dot_dimension_numbers<[1], [0], [0], [1], [0, 0, 1, 1], [], []>} : vector<32x16xbf16>, vector<16x64xbf16>, vector<32x64xf32> -> vector<32x64xf32>
    %c32 = arith.constant 32 : index
    %c0_32 = arith.constant 0 : index
    %80 = vector.load %arg10[%c32, %c0_32] : memref<256x64xf32, #tpu.memory_space<vmem>>, vector<32x64xf32>
    %81 = arith.addf %79, %80 : vector<32x64xf32>
    %82 = arith.negf %81 : vector<32x64xf32>
    %83 = math.exp %82 : vector<32x64xf32>
    %cst_33 = arith.constant 1.000000e+00 : f32
    %84 = vector.broadcast %cst_33 : f32 to vector<32x64xf32>
    %85 = arith.addf %84, %83 : vector<32x64xf32>
    %86 = arith.divf %84, %85 : vector<32x64xf32>
    %87 = vector.extract_strided_slice %86 {offsets = [0, 0], sizes = [32, 16], strides = [1, 1]} : vector<32x64xf32> to vector<32x16xf32>
    %88 = vector.extract_strided_slice %86 {offsets = [0, 16], sizes = [32, 16], strides = [1, 1]} : vector<32x64xf32> to vector<32x16xf32>
    %89 = vector.extract_strided_slice %81 {offsets = [0, 32], sizes = [32, 16], strides = [1, 1]} : vector<32x64xf32> to vector<32x16xf32>
    %90 = math.tanh %89 : vector<32x16xf32>
    %91 = vector.extract_strided_slice %86 {offsets = [0, 48], sizes = [32, 16], strides = [1, 1]} : vector<32x64xf32> to vector<32x16xf32>
    %92 = arith.mulf %88, %40 : vector<32x16xf32>
    %93 = arith.mulf %87, %90 : vector<32x16xf32>
    %94 = arith.addf %92, %93 : vector<32x16xf32>
    %95 = math.tanh %94 : vector<32x16xf32>
    %96 = arith.mulf %91, %95 : vector<32x16xf32>
    %97 = arith.truncf %96 : vector<32x16xf32> to vector<32x16xbf16>
    %cst_34 = arith.constant dense<0.000000e+00> : vector<32x64xf32>
    %98 = tpu.matmul %97, %14, %cst_34 {dimension_numbers = #tpu.dot_dimension_numbers<[1], [0], [0], [1], [0, 0, 1, 1], [], []>} : vector<32x16xbf16>, vector<16x64xbf16>, vector<32x64xf32> -> vector<32x64xf32>
    %99 = arith.truncf %64 : vector<32x16xf32> to vector<32x16xbf16>
    %cst_35 = arith.constant dense<0.000000e+00> : vector<32x64xf32>
    %100 = tpu.matmul %99, %15, %cst_35 {dimension_numbers = #tpu.dot_dimension_numbers<[1], [0], [0], [1], [0, 0, 1, 1], [], []>} : vector<32x16xbf16>, vector<16x64xbf16>, vector<32x64xf32> -> vector<32x64xf32>
    %101 = arith.addf %98, %100 : vector<32x64xf32>
    %102 = vector.broadcast %16 : vector<1x64xf32> to vector<32x64xf32>
    %103 = arith.addf %101, %102 : vector<32x64xf32>
    %104 = arith.negf %103 : vector<32x64xf32>
    %105 = math.exp %104 : vector<32x64xf32>
    %cst_36 = arith.constant 1.000000e+00 : f32
    %106 = vector.broadcast %cst_36 : f32 to vector<32x64xf32>
    %107 = arith.addf %106, %105 : vector<32x64xf32>
    %108 = arith.divf %106, %107 : vector<32x64xf32>
    %109 = vector.extract_strided_slice %108 {offsets = [0, 0], sizes = [32, 16], strides = [1, 1]} : vector<32x64xf32> to vector<32x16xf32>
    %110 = vector.extract_strided_slice %108 {offsets = [0, 16], sizes = [32, 16], strides = [1, 1]} : vector<32x64xf32> to vector<32x16xf32>
    %111 = vector.extract_strided_slice %103 {offsets = [0, 32], sizes = [32, 16], strides = [1, 1]} : vector<32x64xf32> to vector<32x16xf32>
    %112 = math.tanh %111 : vector<32x16xf32>
    %113 = vector.extract_strided_slice %108 {offsets = [0, 48], sizes = [32, 16], strides = [1, 1]} : vector<32x64xf32> to vector<32x16xf32>
    %114 = arith.mulf %110, %62 : vector<32x16xf32>
    %115 = arith.mulf %109, %112 : vector<32x16xf32>
    %116 = arith.addf %114, %115 : vector<32x16xf32>
    %117 = math.tanh %116 : vector<32x16xf32>
    %118 = arith.mulf %113, %117 : vector<32x16xf32>
    %119 = arith.mulf %118, %17 : vector<32x16xf32>
    %120 = vector.shape_cast %119 : vector<32x16xf32> to vector<1x32x16xf32>
    %cst_37 = arith.constant dense<0.000000e+00> : vector<1xf32>
    %121 = vector.multi_reduction <add>, %120, %cst_37 [1, 2] : vector<1x32x16xf32> to vector<1xf32>
    %122 = vector.shape_cast %121 : vector<1xf32> to vector<1x1x1xf32>
    %123 = vector.extract %122[0, 0, 0] : f32 from vector<1x1x1xf32>
    %124 = vector.broadcast %123 : f32 to vector<1x1xf32>
    %c1_i32 = arith.constant 1 : i32
    %125 = vector.broadcast %c1_i32 : i32 to vector<8x1xi32>
    %126 = arith.cmpi eq, %22, %125 : vector<8x1xi32>
    %cst_38 = arith.constant 0.000000e+00 : f32
    %127 = vector.shape_cast %124 : vector<1x1xf32> to vector<1x1xf32>
    %128 = vector.broadcast %127 : vector<1x1xf32> to vector<8x1xf32>
    %129 = vector.broadcast %cst_38 : f32 to vector<8x1xf32>
    %130 = arith.select %126, %128, %129 : vector<8x1xi1>, vector<8x1xf32>
    %131 = arith.addf %77, %130 : vector<8x1xf32>
    %132 = arith.truncf %96 : vector<32x16xf32> to vector<32x16xbf16>
    %cst_39 = arith.constant dense<0.000000e+00> : vector<32x64xf32>
    %133 = tpu.matmul %132, %13, %cst_39 {dimension_numbers = #tpu.dot_dimension_numbers<[1], [0], [0], [1], [0, 0, 1, 1], [], []>} : vector<32x16xbf16>, vector<16x64xbf16>, vector<32x64xf32> -> vector<32x64xf32>
    %c64 = arith.constant 64 : index
    %c0_40 = arith.constant 0 : index
    %134 = vector.load %arg10[%c64, %c0_40] : memref<256x64xf32, #tpu.memory_space<vmem>>, vector<32x64xf32>
    %135 = arith.addf %133, %134 : vector<32x64xf32>
    %136 = arith.negf %135 : vector<32x64xf32>
    %137 = math.exp %136 : vector<32x64xf32>
    %cst_41 = arith.constant 1.000000e+00 : f32
    %138 = vector.broadcast %cst_41 : f32 to vector<32x64xf32>
    %139 = arith.addf %138, %137 : vector<32x64xf32>
    %140 = arith.divf %138, %139 : vector<32x64xf32>
    %141 = vector.extract_strided_slice %140 {offsets = [0, 0], sizes = [32, 16], strides = [1, 1]} : vector<32x64xf32> to vector<32x16xf32>
    %142 = vector.extract_strided_slice %140 {offsets = [0, 16], sizes = [32, 16], strides = [1, 1]} : vector<32x64xf32> to vector<32x16xf32>
    %143 = vector.extract_strided_slice %135 {offsets = [0, 32], sizes = [32, 16], strides = [1, 1]} : vector<32x64xf32> to vector<32x16xf32>
    %144 = math.tanh %143 : vector<32x16xf32>
    %145 = vector.extract_strided_slice %140 {offsets = [0, 48], sizes = [32, 16], strides = [1, 1]} : vector<32x64xf32> to vector<32x16xf32>
    %146 = arith.mulf %142, %94 : vector<32x16xf32>
    %147 = arith.mulf %141, %144 : vector<32x16xf32>
    %148 = arith.addf %146, %147 : vector<32x16xf32>
    %149 = math.tanh %148 : vector<32x16xf32>
    %150 = arith.mulf %145, %149 : vector<32x16xf32>
    %151 = arith.truncf %150 : vector<32x16xf32> to vector<32x16xbf16>
    %cst_42 = arith.constant dense<0.000000e+00> : vector<32x64xf32>
    %152 = tpu.matmul %151, %14, %cst_42 {dimension_numbers = #tpu.dot_dimension_numbers<[1], [0], [0], [1], [0, 0, 1, 1], [], []>} : vector<32x16xbf16>, vector<16x64xbf16>, vector<32x64xf32> -> vector<32x64xf32>
    %153 = arith.truncf %118 : vector<32x16xf32> to vector<32x16xbf16>
    %cst_43 = arith.constant dense<0.000000e+00> : vector<32x64xf32>
    %154 = tpu.matmul %153, %15, %cst_43 {dimension_numbers = #tpu.dot_dimension_numbers<[1], [0], [0], [1], [0, 0, 1, 1], [], []>} : vector<32x16xbf16>, vector<16x64xbf16>, vector<32x64xf32> -> vector<32x64xf32>
    %155 = arith.addf %152, %154 : vector<32x64xf32>
    %156 = vector.broadcast %16 : vector<1x64xf32> to vector<32x64xf32>
    %157 = arith.addf %155, %156 : vector<32x64xf32>
    %158 = arith.negf %157 : vector<32x64xf32>
    %159 = math.exp %158 : vector<32x64xf32>
    %cst_44 = arith.constant 1.000000e+00 : f32
    %160 = vector.broadcast %cst_44 : f32 to vector<32x64xf32>
    %161 = arith.addf %160, %159 : vector<32x64xf32>
    %162 = arith.divf %160, %161 : vector<32x64xf32>
    %163 = vector.extract_strided_slice %162 {offsets = [0, 0], sizes = [32, 16], strides = [1, 1]} : vector<32x64xf32> to vector<32x16xf32>
    %164 = vector.extract_strided_slice %162 {offsets = [0, 16], sizes = [32, 16], strides = [1, 1]} : vector<32x64xf32> to vector<32x16xf32>
    %165 = vector.extract_strided_slice %157 {offsets = [0, 32], sizes = [32, 16], strides = [1, 1]} : vector<32x64xf32> to vector<32x16xf32>
    %166 = math.tanh %165 : vector<32x16xf32>
    %167 = vector.extract_strided_slice %162 {offsets = [0, 48], sizes = [32, 16], strides = [1, 1]} : vector<32x64xf32> to vector<32x16xf32>
    %168 = arith.mulf %164, %116 : vector<32x16xf32>
    %169 = arith.mulf %163, %166 : vector<32x16xf32>
    %170 = arith.addf %168, %169 : vector<32x16xf32>
    %171 = math.tanh %170 : vector<32x16xf32>
    %172 = arith.mulf %167, %171 : vector<32x16xf32>
    %173 = arith.mulf %172, %17 : vector<32x16xf32>
    %174 = vector.shape_cast %173 : vector<32x16xf32> to vector<1x32x16xf32>
    %cst_45 = arith.constant dense<0.000000e+00> : vector<1xf32>
    %175 = vector.multi_reduction <add>, %174, %cst_45 [1, 2] : vector<1x32x16xf32> to vector<1xf32>
    %176 = vector.shape_cast %175 : vector<1xf32> to vector<1x1x1xf32>
    %177 = vector.extract %176[0, 0, 0] : f32 from vector<1x1x1xf32>
    %178 = vector.broadcast %177 : f32 to vector<1x1xf32>
    %c2_i32 = arith.constant 2 : i32
    %179 = vector.broadcast %c2_i32 : i32 to vector<8x1xi32>
    %180 = arith.cmpi eq, %22, %179 : vector<8x1xi32>
    %cst_46 = arith.constant 0.000000e+00 : f32
    %181 = vector.shape_cast %178 : vector<1x1xf32> to vector<1x1xf32>
    %182 = vector.broadcast %181 : vector<1x1xf32> to vector<8x1xf32>
    %183 = vector.broadcast %cst_46 : f32 to vector<8x1xf32>
    %184 = arith.select %180, %182, %183 : vector<8x1xi1>, vector<8x1xf32>
    %185 = arith.addf %131, %184 : vector<8x1xf32>
    %186 = arith.truncf %150 : vector<32x16xf32> to vector<32x16xbf16>
    %cst_47 = arith.constant dense<0.000000e+00> : vector<32x64xf32>
    %187 = tpu.matmul %186, %13, %cst_47 {dimension_numbers = #tpu.dot_dimension_numbers<[1], [0], [0], [1], [0, 0, 1, 1], [], []>} : vector<32x16xbf16>, vector<16x64xbf16>, vector<32x64xf32> -> vector<32x64xf32>
    %c96 = arith.constant 96 : index
    %c0_48 = arith.constant 0 : index
    %188 = vector.load %arg10[%c96, %c0_48] : memref<256x64xf32, #tpu.memory_space<vmem>>, vector<32x64xf32>
    %189 = arith.addf %187, %188 : vector<32x64xf32>
    %190 = arith.negf %189 : vector<32x64xf32>
    %191 = math.exp %190 : vector<32x64xf32>
    %cst_49 = arith.constant 1.000000e+00 : f32
    %192 = vector.broadcast %cst_49 : f32 to vector<32x64xf32>
    %193 = arith.addf %192, %191 : vector<32x64xf32>
    %194 = arith.divf %192, %193 : vector<32x64xf32>
    %195 = vector.extract_strided_slice %194 {offsets = [0, 0], sizes = [32, 16], strides = [1, 1]} : vector<32x64xf32> to vector<32x16xf32>
    %196 = vector.extract_strided_slice %194 {offsets = [0, 16], sizes = [32, 16], strides = [1, 1]} : vector<32x64xf32> to vector<32x16xf32>
    %197 = vector.extract_strided_slice %189 {offsets = [0, 32], sizes = [32, 16], strides = [1, 1]} : vector<32x64xf32> to vector<32x16xf32>
    %198 = math.tanh %197 : vector<32x16xf32>
    %199 = vector.extract_strided_slice %194 {offsets = [0, 48], sizes = [32, 16], strides = [1, 1]} : vector<32x64xf32> to vector<32x16xf32>
    %200 = arith.mulf %196, %148 : vector<32x16xf32>
    %201 = arith.mulf %195, %198 : vector<32x16xf32>
    %202 = arith.addf %200, %201 : vector<32x16xf32>
    %203 = math.tanh %202 : vector<32x16xf32>
    %204 = arith.mulf %199, %203 : vector<32x16xf32>
    %205 = arith.truncf %204 : vector<32x16xf32> to vector<32x16xbf16>
    %cst_50 = arith.constant dense<0.000000e+00> : vector<32x64xf32>
    %206 = tpu.matmul %205, %14, %cst_50 {dimension_numbers = #tpu.dot_dimension_numbers<[1], [0], [0], [1], [0, 0, 1, 1], [], []>} : vector<32x16xbf16>, vector<16x64xbf16>, vector<32x64xf32> -> vector<32x64xf32>
    %207 = arith.truncf %172 : vector<32x16xf32> to vector<32x16xbf16>
    %cst_51 = arith.constant dense<0.000000e+00> : vector<32x64xf32>
    %208 = tpu.matmul %207, %15, %cst_51 {dimension_numbers = #tpu.dot_dimension_numbers<[1], [0], [0], [1], [0, 0, 1, 1], [], []>} : vector<32x16xbf16>, vector<16x64xbf16>, vector<32x64xf32> -> vector<32x64xf32>
    %209 = arith.addf %206, %208 : vector<32x64xf32>
    %210 = vector.broadcast %16 : vector<1x64xf32> to vector<32x64xf32>
    %211 = arith.addf %209, %210 : vector<32x64xf32>
    %212 = arith.negf %211 : vector<32x64xf32>
    %213 = math.exp %212 : vector<32x64xf32>
    %cst_52 = arith.constant 1.000000e+00 : f32
    %214 = vector.broadcast %cst_52 : f32 to vector<32x64xf32>
    %215 = arith.addf %214, %213 : vector<32x64xf32>
    %216 = arith.divf %214, %215 : vector<32x64xf32>
    %217 = vector.extract_strided_slice %216 {offsets = [0, 0], sizes = [32, 16], strides = [1, 1]} : vector<32x64xf32> to vector<32x16xf32>
    %218 = vector.extract_strided_slice %216 {offsets = [0, 16], sizes = [32, 16], strides = [1, 1]} : vector<32x64xf32> to vector<32x16xf32>
    %219 = vector.extract_strided_slice %211 {offsets = [0, 32], sizes = [32, 16], strides = [1, 1]} : vector<32x64xf32> to vector<32x16xf32>
    %220 = math.tanh %219 : vector<32x16xf32>
    %221 = vector.extract_strided_slice %216 {offsets = [0, 48], sizes = [32, 16], strides = [1, 1]} : vector<32x64xf32> to vector<32x16xf32>
    %222 = arith.mulf %218, %170 : vector<32x16xf32>
    %223 = arith.mulf %217, %220 : vector<32x16xf32>
    %224 = arith.addf %222, %223 : vector<32x16xf32>
    %225 = math.tanh %224 : vector<32x16xf32>
    %226 = arith.mulf %221, %225 : vector<32x16xf32>
    %227 = arith.mulf %226, %17 : vector<32x16xf32>
    %228 = vector.shape_cast %227 : vector<32x16xf32> to vector<1x32x16xf32>
    %cst_53 = arith.constant dense<0.000000e+00> : vector<1xf32>
    %229 = vector.multi_reduction <add>, %228, %cst_53 [1, 2] : vector<1x32x16xf32> to vector<1xf32>
    %230 = vector.shape_cast %229 : vector<1xf32> to vector<1x1x1xf32>
    %231 = vector.extract %230[0, 0, 0] : f32 from vector<1x1x1xf32>
    %232 = vector.broadcast %231 : f32 to vector<1x1xf32>
    %c3_i32 = arith.constant 3 : i32
    %233 = vector.broadcast %c3_i32 : i32 to vector<8x1xi32>
    %234 = arith.cmpi eq, %22, %233 : vector<8x1xi32>
    %cst_54 = arith.constant 0.000000e+00 : f32
    %235 = vector.shape_cast %232 : vector<1x1xf32> to vector<1x1xf32>
    %236 = vector.broadcast %235 : vector<1x1xf32> to vector<8x1xf32>
    %237 = vector.broadcast %cst_54 : f32 to vector<8x1xf32>
    %238 = arith.select %234, %236, %237 : vector<8x1xi1>, vector<8x1xf32>
    %239 = arith.addf %185, %238 : vector<8x1xf32>
    %240 = arith.truncf %204 : vector<32x16xf32> to vector<32x16xbf16>
    %cst_55 = arith.constant dense<0.000000e+00> : vector<32x64xf32>
    %241 = tpu.matmul %240, %13, %cst_55 {dimension_numbers = #tpu.dot_dimension_numbers<[1], [0], [0], [1], [0, 0, 1, 1], [], []>} : vector<32x16xbf16>, vector<16x64xbf16>, vector<32x64xf32> -> vector<32x64xf32>
    %c128 = arith.constant 128 : index
    %c0_56 = arith.constant 0 : index
    %242 = vector.load %arg10[%c128, %c0_56] : memref<256x64xf32, #tpu.memory_space<vmem>>, vector<32x64xf32>
    %243 = arith.addf %241, %242 : vector<32x64xf32>
    %244 = arith.negf %243 : vector<32x64xf32>
    %245 = math.exp %244 : vector<32x64xf32>
    %cst_57 = arith.constant 1.000000e+00 : f32
    %246 = vector.broadcast %cst_57 : f32 to vector<32x64xf32>
    %247 = arith.addf %246, %245 : vector<32x64xf32>
    %248 = arith.divf %246, %247 : vector<32x64xf32>
    %249 = vector.extract_strided_slice %248 {offsets = [0, 0], sizes = [32, 16], strides = [1, 1]} : vector<32x64xf32> to vector<32x16xf32>
    %250 = vector.extract_strided_slice %248 {offsets = [0, 16], sizes = [32, 16], strides = [1, 1]} : vector<32x64xf32> to vector<32x16xf32>
    %251 = vector.extract_strided_slice %243 {offsets = [0, 32], sizes = [32, 16], strides = [1, 1]} : vector<32x64xf32> to vector<32x16xf32>
    %252 = math.tanh %251 : vector<32x16xf32>
    %253 = vector.extract_strided_slice %248 {offsets = [0, 48], sizes = [32, 16], strides = [1, 1]} : vector<32x64xf32> to vector<32x16xf32>
    %254 = arith.mulf %250, %202 : vector<32x16xf32>
    %255 = arith.mulf %249, %252 : vector<32x16xf32>
    %256 = arith.addf %254, %255 : vector<32x16xf32>
    %257 = math.tanh %256 : vector<32x16xf32>
    %258 = arith.mulf %253, %257 : vector<32x16xf32>
    %259 = arith.truncf %258 : vector<32x16xf32> to vector<32x16xbf16>
    %cst_58 = arith.constant dense<0.000000e+00> : vector<32x64xf32>
    %260 = tpu.matmul %259, %14, %cst_58 {dimension_numbers = #tpu.dot_dimension_numbers<[1], [0], [0], [1], [0, 0, 1, 1], [], []>} : vector<32x16xbf16>, vector<16x64xbf16>, vector<32x64xf32> -> vector<32x64xf32>
    %261 = arith.truncf %226 : vector<32x16xf32> to vector<32x16xbf16>
    %cst_59 = arith.constant dense<0.000000e+00> : vector<32x64xf32>
    %262 = tpu.matmul %261, %15, %cst_59 {dimension_numbers = #tpu.dot_dimension_numbers<[1], [0], [0], [1], [0, 0, 1, 1], [], []>} : vector<32x16xbf16>, vector<16x64xbf16>, vector<32x64xf32> -> vector<32x64xf32>
    %263 = arith.addf %260, %262 : vector<32x64xf32>
    %264 = vector.broadcast %16 : vector<1x64xf32> to vector<32x64xf32>
    %265 = arith.addf %263, %264 : vector<32x64xf32>
    %266 = arith.negf %265 : vector<32x64xf32>
    %267 = math.exp %266 : vector<32x64xf32>
    %cst_60 = arith.constant 1.000000e+00 : f32
    %268 = vector.broadcast %cst_60 : f32 to vector<32x64xf32>
    %269 = arith.addf %268, %267 : vector<32x64xf32>
    %270 = arith.divf %268, %269 : vector<32x64xf32>
    %271 = vector.extract_strided_slice %270 {offsets = [0, 0], sizes = [32, 16], strides = [1, 1]} : vector<32x64xf32> to vector<32x16xf32>
    %272 = vector.extract_strided_slice %270 {offsets = [0, 16], sizes = [32, 16], strides = [1, 1]} : vector<32x64xf32> to vector<32x16xf32>
    %273 = vector.extract_strided_slice %265 {offsets = [0, 32], sizes = [32, 16], strides = [1, 1]} : vector<32x64xf32> to vector<32x16xf32>
    %274 = math.tanh %273 : vector<32x16xf32>
    %275 = vector.extract_strided_slice %270 {offsets = [0, 48], sizes = [32, 16], strides = [1, 1]} : vector<32x64xf32> to vector<32x16xf32>
    %276 = arith.mulf %272, %224 : vector<32x16xf32>
    %277 = arith.mulf %271, %274 : vector<32x16xf32>
    %278 = arith.addf %276, %277 : vector<32x16xf32>
    %279 = math.tanh %278 : vector<32x16xf32>
    %280 = arith.mulf %275, %279 : vector<32x16xf32>
    %281 = arith.mulf %280, %17 : vector<32x16xf32>
    %282 = vector.shape_cast %281 : vector<32x16xf32> to vector<1x32x16xf32>
    %cst_61 = arith.constant dense<0.000000e+00> : vector<1xf32>
    %283 = vector.multi_reduction <add>, %282, %cst_61 [1, 2] : vector<1x32x16xf32> to vector<1xf32>
    %284 = vector.shape_cast %283 : vector<1xf32> to vector<1x1x1xf32>
    %285 = vector.extract %284[0, 0, 0] : f32 from vector<1x1x1xf32>
    %286 = vector.broadcast %285 : f32 to vector<1x1xf32>
    %c4_i32 = arith.constant 4 : i32
    %287 = vector.broadcast %c4_i32 : i32 to vector<8x1xi32>
    %288 = arith.cmpi eq, %22, %287 : vector<8x1xi32>
    %cst_62 = arith.constant 0.000000e+00 : f32
    %289 = vector.shape_cast %286 : vector<1x1xf32> to vector<1x1xf32>
    %290 = vector.broadcast %289 : vector<1x1xf32> to vector<8x1xf32>
    %291 = vector.broadcast %cst_62 : f32 to vector<8x1xf32>
    %292 = arith.select %288, %290, %291 : vector<8x1xi1>, vector<8x1xf32>
    %293 = arith.addf %239, %292 : vector<8x1xf32>
    %294 = arith.truncf %258 : vector<32x16xf32> to vector<32x16xbf16>
    %cst_63 = arith.constant dense<0.000000e+00> : vector<32x64xf32>
    %295 = tpu.matmul %294, %13, %cst_63 {dimension_numbers = #tpu.dot_dimension_numbers<[1], [0], [0], [1], [0, 0, 1, 1], [], []>} : vector<32x16xbf16>, vector<16x64xbf16>, vector<32x64xf32> -> vector<32x64xf32>
    %c160 = arith.constant 160 : index
    %c0_64 = arith.constant 0 : index
    %296 = vector.load %arg10[%c160, %c0_64] : memref<256x64xf32, #tpu.memory_space<vmem>>, vector<32x64xf32>
    %297 = arith.addf %295, %296 : vector<32x64xf32>
    %298 = arith.negf %297 : vector<32x64xf32>
    %299 = math.exp %298 : vector<32x64xf32>
    %cst_65 = arith.constant 1.000000e+00 : f32
    %300 = vector.broadcast %cst_65 : f32 to vector<32x64xf32>
    %301 = arith.addf %300, %299 : vector<32x64xf32>
    %302 = arith.divf %300, %301 : vector<32x64xf32>
    %303 = vector.extract_strided_slice %302 {offsets = [0, 0], sizes = [32, 16], strides = [1, 1]} : vector<32x64xf32> to vector<32x16xf32>
    %304 = vector.extract_strided_slice %302 {offsets = [0, 16], sizes = [32, 16], strides = [1, 1]} : vector<32x64xf32> to vector<32x16xf32>
    %305 = vector.extract_strided_slice %297 {offsets = [0, 32], sizes = [32, 16], strides = [1, 1]} : vector<32x64xf32> to vector<32x16xf32>
    %306 = math.tanh %305 : vector<32x16xf32>
    %307 = vector.extract_strided_slice %302 {offsets = [0, 48], sizes = [32, 16], strides = [1, 1]} : vector<32x64xf32> to vector<32x16xf32>
    %308 = arith.mulf %304, %256 : vector<32x16xf32>
    %309 = arith.mulf %303, %306 : vector<32x16xf32>
    %310 = arith.addf %308, %309 : vector<32x16xf32>
    %311 = math.tanh %310 : vector<32x16xf32>
    %312 = arith.mulf %307, %311 : vector<32x16xf32>
    %313 = arith.truncf %312 : vector<32x16xf32> to vector<32x16xbf16>
    %cst_66 = arith.constant dense<0.000000e+00> : vector<32x64xf32>
    %314 = tpu.matmul %313, %14, %cst_66 {dimension_numbers = #tpu.dot_dimension_numbers<[1], [0], [0], [1], [0, 0, 1, 1], [], []>} : vector<32x16xbf16>, vector<16x64xbf16>, vector<32x64xf32> -> vector<32x64xf32>
    %315 = arith.truncf %280 : vector<32x16xf32> to vector<32x16xbf16>
    %cst_67 = arith.constant dense<0.000000e+00> : vector<32x64xf32>
    %316 = tpu.matmul %315, %15, %cst_67 {dimension_numbers = #tpu.dot_dimension_numbers<[1], [0], [0], [1], [0, 0, 1, 1], [], []>} : vector<32x16xbf16>, vector<16x64xbf16>, vector<32x64xf32> -> vector<32x64xf32>
    %317 = arith.addf %314, %316 : vector<32x64xf32>
    %318 = vector.broadcast %16 : vector<1x64xf32> to vector<32x64xf32>
    %319 = arith.addf %317, %318 : vector<32x64xf32>
    %320 = arith.negf %319 : vector<32x64xf32>
    %321 = math.exp %320 : vector<32x64xf32>
    %cst_68 = arith.constant 1.000000e+00 : f32
    %322 = vector.broadcast %cst_68 : f32 to vector<32x64xf32>
    %323 = arith.addf %322, %321 : vector<32x64xf32>
    %324 = arith.divf %322, %323 : vector<32x64xf32>
    %325 = vector.extract_strided_slice %324 {offsets = [0, 0], sizes = [32, 16], strides = [1, 1]} : vector<32x64xf32> to vector<32x16xf32>
    %326 = vector.extract_strided_slice %324 {offsets = [0, 16], sizes = [32, 16], strides = [1, 1]} : vector<32x64xf32> to vector<32x16xf32>
    %327 = vector.extract_strided_slice %319 {offsets = [0, 32], sizes = [32, 16], strides = [1, 1]} : vector<32x64xf32> to vector<32x16xf32>
    %328 = math.tanh %327 : vector<32x16xf32>
    %329 = vector.extract_strided_slice %324 {offsets = [0, 48], sizes = [32, 16], strides = [1, 1]} : vector<32x64xf32> to vector<32x16xf32>
    %330 = arith.mulf %326, %278 : vector<32x16xf32>
    %331 = arith.mulf %325, %328 : vector<32x16xf32>
    %332 = arith.addf %330, %331 : vector<32x16xf32>
    %333 = math.tanh %332 : vector<32x16xf32>
    %334 = arith.mulf %329, %333 : vector<32x16xf32>
    %335 = arith.mulf %334, %17 : vector<32x16xf32>
    %336 = vector.shape_cast %335 : vector<32x16xf32> to vector<1x32x16xf32>
    %cst_69 = arith.constant dense<0.000000e+00> : vector<1xf32>
    %337 = vector.multi_reduction <add>, %336, %cst_69 [1, 2] : vector<1x32x16xf32> to vector<1xf32>
    %338 = vector.shape_cast %337 : vector<1xf32> to vector<1x1x1xf32>
    %339 = vector.extract %338[0, 0, 0] : f32 from vector<1x1x1xf32>
    %340 = vector.broadcast %339 : f32 to vector<1x1xf32>
    %c5_i32 = arith.constant 5 : i32
    %341 = vector.broadcast %c5_i32 : i32 to vector<8x1xi32>
    %342 = arith.cmpi eq, %22, %341 : vector<8x1xi32>
    %cst_70 = arith.constant 0.000000e+00 : f32
    %343 = vector.shape_cast %340 : vector<1x1xf32> to vector<1x1xf32>
    %344 = vector.broadcast %343 : vector<1x1xf32> to vector<8x1xf32>
    %345 = vector.broadcast %cst_70 : f32 to vector<8x1xf32>
    %346 = arith.select %342, %344, %345 : vector<8x1xi1>, vector<8x1xf32>
    %347 = arith.addf %293, %346 : vector<8x1xf32>
    %348 = arith.truncf %312 : vector<32x16xf32> to vector<32x16xbf16>
    %cst_71 = arith.constant dense<0.000000e+00> : vector<32x64xf32>
    %349 = tpu.matmul %348, %13, %cst_71 {dimension_numbers = #tpu.dot_dimension_numbers<[1], [0], [0], [1], [0, 0, 1, 1], [], []>} : vector<32x16xbf16>, vector<16x64xbf16>, vector<32x64xf32> -> vector<32x64xf32>
    %c192 = arith.constant 192 : index
    %c0_72 = arith.constant 0 : index
    %350 = vector.load %arg10[%c192, %c0_72] : memref<256x64xf32, #tpu.memory_space<vmem>>, vector<32x64xf32>
    %351 = arith.addf %349, %350 : vector<32x64xf32>
    %352 = arith.negf %351 : vector<32x64xf32>
    %353 = math.exp %352 : vector<32x64xf32>
    %cst_73 = arith.constant 1.000000e+00 : f32
    %354 = vector.broadcast %cst_73 : f32 to vector<32x64xf32>
    %355 = arith.addf %354, %353 : vector<32x64xf32>
    %356 = arith.divf %354, %355 : vector<32x64xf32>
    %357 = vector.extract_strided_slice %356 {offsets = [0, 0], sizes = [32, 16], strides = [1, 1]} : vector<32x64xf32> to vector<32x16xf32>
    %358 = vector.extract_strided_slice %356 {offsets = [0, 16], sizes = [32, 16], strides = [1, 1]} : vector<32x64xf32> to vector<32x16xf32>
    %359 = vector.extract_strided_slice %351 {offsets = [0, 32], sizes = [32, 16], strides = [1, 1]} : vector<32x64xf32> to vector<32x16xf32>
    %360 = math.tanh %359 : vector<32x16xf32>
    %361 = vector.extract_strided_slice %356 {offsets = [0, 48], sizes = [32, 16], strides = [1, 1]} : vector<32x64xf32> to vector<32x16xf32>
    %362 = arith.mulf %358, %310 : vector<32x16xf32>
    %363 = arith.mulf %357, %360 : vector<32x16xf32>
    %364 = arith.addf %362, %363 : vector<32x16xf32>
    %365 = math.tanh %364 : vector<32x16xf32>
    %366 = arith.mulf %361, %365 : vector<32x16xf32>
    %367 = arith.truncf %366 : vector<32x16xf32> to vector<32x16xbf16>
    %cst_74 = arith.constant dense<0.000000e+00> : vector<32x64xf32>
    %368 = tpu.matmul %367, %14, %cst_74 {dimension_numbers = #tpu.dot_dimension_numbers<[1], [0], [0], [1], [0, 0, 1, 1], [], []>} : vector<32x16xbf16>, vector<16x64xbf16>, vector<32x64xf32> -> vector<32x64xf32>
    %369 = arith.truncf %334 : vector<32x16xf32> to vector<32x16xbf16>
    %cst_75 = arith.constant dense<0.000000e+00> : vector<32x64xf32>
    %370 = tpu.matmul %369, %15, %cst_75 {dimension_numbers = #tpu.dot_dimension_numbers<[1], [0], [0], [1], [0, 0, 1, 1], [], []>} : vector<32x16xbf16>, vector<16x64xbf16>, vector<32x64xf32> -> vector<32x64xf32>
    %371 = arith.addf %368, %370 : vector<32x64xf32>
    %372 = vector.broadcast %16 : vector<1x64xf32> to vector<32x64xf32>
    %373 = arith.addf %371, %372 : vector<32x64xf32>
    %374 = arith.negf %373 : vector<32x64xf32>
    %375 = math.exp %374 : vector<32x64xf32>
    %cst_76 = arith.constant 1.000000e+00 : f32
    %376 = vector.broadcast %cst_76 : f32 to vector<32x64xf32>
    %377 = arith.addf %376, %375 : vector<32x64xf32>
    %378 = arith.divf %376, %377 : vector<32x64xf32>
    %379 = vector.extract_strided_slice %378 {offsets = [0, 0], sizes = [32, 16], strides = [1, 1]} : vector<32x64xf32> to vector<32x16xf32>
    %380 = vector.extract_strided_slice %378 {offsets = [0, 16], sizes = [32, 16], strides = [1, 1]} : vector<32x64xf32> to vector<32x16xf32>
    %381 = vector.extract_strided_slice %373 {offsets = [0, 32], sizes = [32, 16], strides = [1, 1]} : vector<32x64xf32> to vector<32x16xf32>
    %382 = math.tanh %381 : vector<32x16xf32>
    %383 = vector.extract_strided_slice %378 {offsets = [0, 48], sizes = [32, 16], strides = [1, 1]} : vector<32x64xf32> to vector<32x16xf32>
    %384 = arith.mulf %380, %332 : vector<32x16xf32>
    %385 = arith.mulf %379, %382 : vector<32x16xf32>
    %386 = arith.addf %384, %385 : vector<32x16xf32>
    %387 = math.tanh %386 : vector<32x16xf32>
    %388 = arith.mulf %383, %387 : vector<32x16xf32>
    %389 = arith.mulf %388, %17 : vector<32x16xf32>
    %390 = vector.shape_cast %389 : vector<32x16xf32> to vector<1x32x16xf32>
    %cst_77 = arith.constant dense<0.000000e+00> : vector<1xf32>
    %391 = vector.multi_reduction <add>, %390, %cst_77 [1, 2] : vector<1x32x16xf32> to vector<1xf32>
    %392 = vector.shape_cast %391 : vector<1xf32> to vector<1x1x1xf32>
    %393 = vector.extract %392[0, 0, 0] : f32 from vector<1x1x1xf32>
    %394 = vector.broadcast %393 : f32 to vector<1x1xf32>
    %c6_i32 = arith.constant 6 : i32
    %395 = vector.broadcast %c6_i32 : i32 to vector<8x1xi32>
    %396 = arith.cmpi eq, %22, %395 : vector<8x1xi32>
    %cst_78 = arith.constant 0.000000e+00 : f32
    %397 = vector.shape_cast %394 : vector<1x1xf32> to vector<1x1xf32>
    %398 = vector.broadcast %397 : vector<1x1xf32> to vector<8x1xf32>
    %399 = vector.broadcast %cst_78 : f32 to vector<8x1xf32>
    %400 = arith.select %396, %398, %399 : vector<8x1xi1>, vector<8x1xf32>
    %401 = arith.addf %347, %400 : vector<8x1xf32>
    %402 = arith.truncf %366 : vector<32x16xf32> to vector<32x16xbf16>
    %cst_79 = arith.constant dense<0.000000e+00> : vector<32x64xf32>
    %403 = tpu.matmul %402, %13, %cst_79 {dimension_numbers = #tpu.dot_dimension_numbers<[1], [0], [0], [1], [0, 0, 1, 1], [], []>} : vector<32x16xbf16>, vector<16x64xbf16>, vector<32x64xf32> -> vector<32x64xf32>
    %c224 = arith.constant 224 : index
    %c0_80 = arith.constant 0 : index
    %404 = vector.load %arg10[%c224, %c0_80] : memref<256x64xf32, #tpu.memory_space<vmem>>, vector<32x64xf32>
    %405 = arith.addf %403, %404 : vector<32x64xf32>
    %406 = arith.negf %405 : vector<32x64xf32>
    %407 = math.exp %406 : vector<32x64xf32>
    %cst_81 = arith.constant 1.000000e+00 : f32
    %408 = vector.broadcast %cst_81 : f32 to vector<32x64xf32>
    %409 = arith.addf %408, %407 : vector<32x64xf32>
    %410 = arith.divf %408, %409 : vector<32x64xf32>
    %411 = vector.extract_strided_slice %410 {offsets = [0, 0], sizes = [32, 16], strides = [1, 1]} : vector<32x64xf32> to vector<32x16xf32>
    %412 = vector.extract_strided_slice %410 {offsets = [0, 16], sizes = [32, 16], strides = [1, 1]} : vector<32x64xf32> to vector<32x16xf32>
    %413 = vector.extract_strided_slice %405 {offsets = [0, 32], sizes = [32, 16], strides = [1, 1]} : vector<32x64xf32> to vector<32x16xf32>
    %414 = math.tanh %413 : vector<32x16xf32>
    %415 = vector.extract_strided_slice %410 {offsets = [0, 48], sizes = [32, 16], strides = [1, 1]} : vector<32x64xf32> to vector<32x16xf32>
    %416 = arith.mulf %412, %364 : vector<32x16xf32>
    %417 = arith.mulf %411, %414 : vector<32x16xf32>
    %418 = arith.addf %416, %417 : vector<32x16xf32>
    %419 = math.tanh %418 : vector<32x16xf32>
    %420 = arith.mulf %415, %419 : vector<32x16xf32>
    %421 = arith.truncf %420 : vector<32x16xf32> to vector<32x16xbf16>
    %cst_82 = arith.constant dense<0.000000e+00> : vector<32x64xf32>
    %422 = tpu.matmul %421, %14, %cst_82 {dimension_numbers = #tpu.dot_dimension_numbers<[1], [0], [0], [1], [0, 0, 1, 1], [], []>} : vector<32x16xbf16>, vector<16x64xbf16>, vector<32x64xf32> -> vector<32x64xf32>
    %423 = arith.truncf %388 : vector<32x16xf32> to vector<32x16xbf16>
    %cst_83 = arith.constant dense<0.000000e+00> : vector<32x64xf32>
    %424 = tpu.matmul %423, %15, %cst_83 {dimension_numbers = #tpu.dot_dimension_numbers<[1], [0], [0], [1], [0, 0, 1, 1], [], []>} : vector<32x16xbf16>, vector<16x64xbf16>, vector<32x64xf32> -> vector<32x64xf32>
    %425 = arith.addf %422, %424 : vector<32x64xf32>
    %426 = vector.broadcast %16 : vector<1x64xf32> to vector<32x64xf32>
    %427 = arith.addf %425, %426 : vector<32x64xf32>
    %428 = arith.negf %427 : vector<32x64xf32>
    %429 = math.exp %428 : vector<32x64xf32>
    %cst_84 = arith.constant 1.000000e+00 : f32
    %430 = vector.broadcast %cst_84 : f32 to vector<32x64xf32>
    %431 = arith.addf %430, %429 : vector<32x64xf32>
    %432 = arith.divf %430, %431 : vector<32x64xf32>
    %433 = vector.extract_strided_slice %432 {offsets = [0, 0], sizes = [32, 16], strides = [1, 1]} : vector<32x64xf32> to vector<32x16xf32>
    %434 = vector.extract_strided_slice %432 {offsets = [0, 16], sizes = [32, 16], strides = [1, 1]} : vector<32x64xf32> to vector<32x16xf32>
    %435 = vector.extract_strided_slice %427 {offsets = [0, 32], sizes = [32, 16], strides = [1, 1]} : vector<32x64xf32> to vector<32x16xf32>
    %436 = math.tanh %435 : vector<32x16xf32>
    %437 = vector.extract_strided_slice %432 {offsets = [0, 48], sizes = [32, 16], strides = [1, 1]} : vector<32x64xf32> to vector<32x16xf32>
    %438 = arith.mulf %434, %386 : vector<32x16xf32>
    %439 = arith.mulf %433, %436 : vector<32x16xf32>
    %440 = arith.addf %438, %439 : vector<32x16xf32>
    %441 = math.tanh %440 : vector<32x16xf32>
    %442 = arith.mulf %437, %441 : vector<32x16xf32>
    %443 = arith.mulf %442, %17 : vector<32x16xf32>
    %444 = vector.shape_cast %443 : vector<32x16xf32> to vector<1x32x16xf32>
    %cst_85 = arith.constant dense<0.000000e+00> : vector<1xf32>
    %445 = vector.multi_reduction <add>, %444, %cst_85 [1, 2] : vector<1x32x16xf32> to vector<1xf32>
    %446 = vector.shape_cast %445 : vector<1xf32> to vector<1x1x1xf32>
    %447 = vector.extract %446[0, 0, 0] : f32 from vector<1x1x1xf32>
    %448 = vector.broadcast %447 : f32 to vector<1x1xf32>
    %c7_i32 = arith.constant 7 : i32
    %449 = vector.broadcast %c7_i32 : i32 to vector<8x1xi32>
    %450 = arith.cmpi eq, %22, %449 : vector<8x1xi32>
    %cst_86 = arith.constant 0.000000e+00 : f32
    %451 = vector.shape_cast %448 : vector<1x1xf32> to vector<1x1xf32>
    %452 = vector.broadcast %451 : vector<1x1xf32> to vector<8x1xf32>
    %453 = vector.broadcast %cst_86 : f32 to vector<8x1xf32>
    %454 = arith.select %450, %452, %453 : vector<8x1xi1>, vector<8x1xf32>
    %455 = arith.addf %401, %454 : vector<8x1xf32>
    %c0_87 = arith.constant 0 : index
    %c0_88 = arith.constant 0 : index
    %456 = vector.load %arg8[%c0_87, %c0_88] : memref<1x1xf32, #tpu.memory_space<vmem>>, vector<1x1xf32>
    %457 = vector.broadcast %456 : vector<1x1xf32> to vector<8x1xf32>
    %458 = arith.addf %455, %457 : vector<8x1xf32>
    %459 = arith.negf %458 : vector<8x1xf32>
    %460 = math.exp %459 : vector<8x1xf32>
    %cst_89 = arith.constant 1.000000e+00 : f32
    %461 = vector.broadcast %cst_89 : f32 to vector<8x1xf32>
    %462 = arith.addf %461, %460 : vector<8x1xf32>
    %463 = arith.divf %461, %462 : vector<8x1xf32>
    %c0_90 = arith.constant 0 : index
    %c0_91 = arith.constant 0 : index
    %464 = vector.load %arg9[%c0_90, %c0_91] : memref<8x1xf32, #tpu.memory_space<vmem>>, vector<8x1xf32>
    tpu.vector_store %arg9[%c0_90, %c0_91], %463 {strides = array<i32>} : memref<8x1xf32, #tpu.memory_space<vmem>>, vector<8x1xf32>,
    return
  }
}

</mosaic_0001>

<bundles_post_ra>
// kernel: tpu_custom_call.1
= control target key start
LH: loop header
LB: loop body
LE: loop exit
PB: predicated region body
PF: predicated region fallthrough
CT: control target
= control target key end

     0   :  { %v4941_v0 = vmov 0   ;;  %v67_v10 = vlaneseq  ;;  %vm316_vm4 = vcmask 523264   ;;  %v4942_v16 = vmov 0.0   ;;  %s4943_s28 = smov 96   ;;  %s4944_s29 = smov 16   ;;  %s6444_s0 = inlined_call_operand.vmem [shape: s32[256,1], index: 0, kind: input, shape index: {}]   ;;  %s6445_s1 = inlined_call_operand.vmem [shape: bf16[64,64], index: 1, kind: input, shape index: {}]   ;;  %s6446_s2 = inlined_call_operand.vmem [shape: bf16[16,64], index: 2, kind: input, shape index: {}]   ;;  %s6447_s3 = inlined_call_operand.vmem [shape: f32[1,64], index: 3, kind: input, shape index: {}]   ;;  %s6448_s5 = inlined_call_operand.vmem [shape: bf16[16,64], index: 5, kind: input, shape index: {}]   ;;  %s6449_s4 = inlined_call_operand.vmem [shape: bf16[16,64], index: 4, kind: input, shape index: {}]   ;;  %s6450_s6 = inlined_call_operand.vmem [shape: f32[1,64], index: 6, kind: input, shape index: {}]   ;;  %s6451_s7 = inlined_call_operand.vmem [shape: f32[32,16], index: 7, kind: input, shape index: {}]   ;;  %s6452_s8 = inlined_call_operand.<no memory space> [shape: f32[1,1], index: 8, kind: input, shape index: {}]   ;;  %s6453_s9 = inlined_call_operand.vmem [shape: f32[8,1], index: 9, kind: output, shape index: {}]  }
   0x1   :  { %4408 = vset.pattern.permute.xlu1 %v4941_v0  ;;  %4407 = vset.pattern.permute.xlu0 %v4941_v0  ;;  %v37_v1 = vld [vmem:[%s6444_s0 + $0x10] sm:$0xff]  ;;  %v35_v2 = vld [vmem:[%s6444_s0] sm:$0xff]  ;;  %v38_v3 = vld [vmem:[%s6444_s0 + $0x18] sm:$0xff]  ;;  %s4945_s30 = smov 32   ;;  %s4946_s22 = smov 80   ;;  %vm581_vm9 = vcmask 130048  }
   0x2   :  { %76 = vperm.xlu1 %4408, %v37_v1   ;;  %70 = vperm.xlu0 %4407, %v35_v2   ;;  %v36_v4 = vld [vmem:[%s6444_s0 + $0x8] sm:$0xff]  ;;  %v4409_v5 = vld [vmem:[%s6445_s1 + $0x18] sm:$0xff]   ;;  %v4410_v6 = vld [vmem:[%s6445_s1 + $0x10] sm:$0xff]   ;;  %v5035_v11 = vand.u32 127, %v67_v10 }
   0x3   :  { %4242 = vmatprep.mubr.bf16.mxu1 %v4941_v0  ;;  %4200 = vmatprep.subr.bf16.mxu0 %v4409_v5  ;;  %v5022_v7 = vld [vmem:[%s6446_s2] sm:$0xff]   ;;  %v4411_v8 = vld [vmem:[%s6445_s1 + $0x8] sm:$0xff]  }
   0x4   :  { %4201 = vmatpush3.bf16.msra.mxu0 %v4409_v5  ;;  %4240 = vmatprep.subr.bf16.mxu1 %v5022_v7  ;;  %v4412_v9 = vld [vmem:[%s6445_s1] sm:$0xff]  }
   0x5   :  { %4202 = vmatprep.subr.bf16.mxu0 %v4410_v6  ;;  %4241 = vmatpush3.bf16.msra.mxu1 %v5022_v7  ;;  %v5050_v23 = vld [vmem:[%s6447_s3] ss:$0 sm:$0xff] }
   0x6   :  { %79 = vperm.xlu1 %4408, %v38_v3   ;;  %73 = vperm.xlu0 %4407, %v36_v4  }
   0x8   :  { %4203 = vmatpush3.bf16.msra.mxu0 %v4410_v6  ;;  %4243 = vmatmul.mubr.bf16.vlgmr.msra.gmra.mxu1 %v4941_v0 }
   0x9   :  { %4204 = vmatprep.subr.bf16.mxu0 %v4411_v8  ;;  %4248 = vmatprep.mubr.bf16.mxu1 %v4941_v0 }
   0xc   :  { %4205 = vmatpush3.bf16.msra.mxu0 %v4411_v8 }
   0xd   :  { %4206 = vmatprep.subr.bf16.mxu0 %v4412_v9 }
  0x10   :  { %4207 = vmatpush3.bf16.msra.mxu0 %v4412_v9 }
  0x7d   :  { %v77_v12 = vpop.permute.xlu1 %76  ;;  %v71_v13 = vpop.permute.xlu0 %70 }
  0x7e   :  { %vm167_vm0 = vcmp.eq.s32.totalorder %v77_v12, %v5035_v11  ;;  %vm165_vm1 = vcmp.eq.s32.totalorder %v71_v13, %v5035_v11 }
  0x7f   :  { %v3943_v17 = vsel %vm167_vm0, 1.0, %v4942_v16  ;;  %v3941_v19 = vsel %vm165_vm1, 1.0, %v4942_v16 }
  0x81   :  { %v80_v14 = vpop.permute.xlu1 %79  ;;  %v74_v15 = vpop.permute.xlu0 %73 }
  0x82   :  { %vm168_vm2 = vcmp.eq.s32.totalorder %v80_v14, %v5035_v11  ;;  %vm166_vm3 = vcmp.eq.s32.totalorder %v74_v15, %v5035_v11 }
  0x83   :  { %v3944_v18 = vsel %vm168_vm2, 1.0, %v4942_v16  ;;  %v3942_v20 = vsel %vm166_vm3, 1.0, %v4942_v16 }
  0x84   :  { %v262_v21 = vpack.c.bf16 %v3944_v18, %v3943_v17  ;;  %v261_v22 = vpack.c.bf16 %v3942_v20, %v3941_v19 }
  0x86   :  { %4208 = vmatprep.mubr.msk.bf16.mxu0 %vm316_vm4, %v261_v22 }
  0x87   :  { %4209 = vmatmul.mubr.msk.bf16.vlgmr.msra.gmra.mxu0 %vm316_vm4, %v262_v21 }
  0xc8   :  { %v4244_v29 = vpop.f32.mrf.mxu1 }
  0xca   :  { %v619_v33 = vpop.f32.mrf.mxu1 }
  0xcc   :  { %v4245_v36 = vpop.f32.mrf.mxu1 }
  0xce   :  { %v622_v39 = vpop.f32.mrf.mxu1 }
 0x147   :  { %v4210_v24 = vpop.f32.mrf.mxu0 }
 0x148   :  { %v408_v25 = vadd.f32 %v4210_v24, %v5050_v23 }
 0x149   :  { %v399_v26 = vpop.f32.mrf.mxu0 }
 0x14a   :  { %528 = vst.msk [vmem:[#allocation2 + $0x10] sm:$0xff] %vm316_vm4, %v408_v25  ;;  %v400_v27 = vadd.f32 %v5050_v23, %v399_v26 }
 0x14b   :  { %v4211_v28 = vpop.f32.mrf.mxu0 }
 0x14c   :  { %526 = vst.msk [vmem:[#allocation2] sm:$0xff] %vm316_vm4, %v400_v27  ;;  %v411_v30 = vadd.f32 %v4211_v28, %v5050_v23 }
 0x14d   :  { %v402_v31 = vpop.f32.mrf.mxu0 }
 0x14e   :  { %529 = vst.msk [vmem:[#allocation2 + $0x18] sm:$0xff] %vm316_vm4, %v411_v30  ;;  %v403_v32 = vadd.f32 %v5050_v23, %v402_v31  ;;  %v40_v31 = vld [vmem:[%s6444_s0 + $0x28] sm:$0xff] }
 0x150   :  { %527 = vst.msk [vmem:[#allocation2 + $0x8] sm:$0xff] %vm316_vm4, %v403_v32  ;;  %v41_v32 = vld [vmem:[%s6444_s0 + $0x30] sm:$0xff] }
 0x151   :  { %v573_v34 = vld [vmem:[#allocation2 + $0x10] sm:$0xff] }
 0x152   :  { %v628_v38 = vadd.f32 %v4244_v29, %v573_v34  ;;  %v39_v29 = vld [vmem:[%s6444_s0 + $0x20] sm:$0xff] }
 0x153   :  { %v571_v35 = vld [vmem:[#allocation2] sm:$0xff] }
 0x154   :  { %v620_v37 = vadd.f32 %v619_v33, %v571_v35  ;;  %v3997_v49 = vmul.f32 -1.442695, %v628_v38  ;;  %v42_v33 = vld [vmem:[%s6444_s0 + $0x38] sm:$0xff]  ;;  %v5107_v34 = vld [vmem:[%s6448_s5] sm:$0xff]  }
 0x155   :  { %v574_v41 = vld [vmem:[#allocation2 + $0x18] sm:$0xff]  ;;  %v5112_v35 = vld [vmem:[%s6449_s4] sm:$0xff]   ;;  %4246 = vmatprep.subr.bf16.mxu1 %v5107_v34  ;;  %4300 = vmatprep.subr.bf16.mxu0 %v5107_v34 }
 0x156   :  { %4416 = vtanh.f32 %v620_v37  ;;  %v631_v43 = vadd.f32 %v4245_v36, %v574_v41  ;;  %v3995_v48 = vmul.f32 -1.442695, %v620_v37  ;;  %4247 = vmatpush3.bf16.msra.mxu1 %v5107_v34  ;;  %4301 = vmatpush3.bf16.msra.mxu0 %v5107_v34 }
 0x157   :  { %v572_v40 = vld [vmem:[#allocation2 + $0x8] sm:$0xff]  ;;  %4418 = vtanh.f32 %v628_v38  ;;  %4252 = vmatprep.subr.bf16.mxu1 %v5112_v35  ;;  %4312 = vmatprep.subr.bf16.mxu0 %v5022_v7 }
 0x158   :  { %v623_v42 = vadd.f32 %v622_v39, %v572_v40  ;;  %v3998_v51 = vmul.f32 -1.442695, %v631_v43 }
 0x159   :  { %4249 = vmatmul.mubr.bf16.vlgmr.msra.gmra.mxu1 %v4941_v0 }
 0x15a   :  { %4420 = vtanh.f32 %v623_v42  ;;  %v3996_v50 = vmul.f32 -1.442695, %v623_v42  ;;  %4253 = vmatpush3.bf16.msra.mxu1 %v5112_v35 }
 0x15b   :  { %4422 = vtanh.f32 %v631_v43  ;;  %4258 = vmatprep.subr.bf16.mxu1 %v5022_v7 }
 0x15c   :  { %4424 = vpow2.f32 %v3995_v48 }
 0x15d   :  { %4426 = vpow2.f32 %v3997_v49 }
 0x15e   :  { %4428 = vpow2.f32 %v3996_v50 }
 0x15f   :  { %4430 = vpow2.f32 %v3998_v51 }
 0x163   :  { %v4417_v44 = vpop.eup %4416 }
 0x164   :  { %670 = vrot.lane.b32.xlu0 %v4417_v44, %s4943_s28  ;;  %v4419_v45 = vpop.eup %4418 }
 0x167   :  { %v4421_v46 = vpop.eup %4420 }
 0x168   :  { %672 = vrot.lane.b32.xlu1 %v4421_v46, %s4943_s28  ;;  %674 = vrot.lane.b32.xlu0 %v4419_v45, %s4943_s28  ;;  %v4423_v47 = vpop.eup %4422 }
 0x169   :  { %v4425_v52 = vpop.eup %4424 }
 0x16a   :  { %v4427_v53 = vpop.eup %4426  ;;  %v646_v54 = vadd.f32 1.0, %v4425_v52 }
 0x16b   :  { %v4429_v55 = vpop.eup %4428  ;;  %v648_v56 = vadd.f32 1.0, %v4427_v53 }
 0x16c   :  { %676 = vrot.lane.b32.xlu1 %v4423_v47, %s4943_s28  ;;  %4432 = vrcp.f32 %v646_v54  ;;  %v647_v57 = vadd.f32 1.0, %v4429_v55  ;;  %v4431_v58 = vpop.eup %4430 }
 0x16d   :  { %4434 = vrcp.f32 %v648_v56  ;;  %v649_v59 = vadd.f32 1.0, %v4431_v58 }
 0x16e   :  { %4436 = vrcp.f32 %v647_v57 }
 0x16f   :  { %4438 = vrcp.f32 %v649_v59 }
 0x179   :  { %v5064_v60 = vpop.eup %4432 }
 0x17a   :  { %v5067_v63 = vpop.eup %4434  ;;  %v662_v12 = vmul.f32 0.0, %v5064_v60 }
 0x17b   :  { %v4437_v1 = vpop.eup %4436  ;;  %v664_v17 = vmul.f32 0.0, %v5067_v63 }
 0x17c   :  { %v4439_v6 = vpop.eup %4438  ;;  %v663_v15 = vmul.f32 0.0, %v4437_v1 }
 0x17d   :  { %v665_v22 = vmul.f32 0.0, %v4439_v6 }
 0x1d6   :  { %v671_v61 = vpop.permute.xlu0 %670 }
 0x1d7   :  { %v682_v62 = vmul.f32 %v5064_v60, %v671_v61 }
 0x1d9   :  { %690 = vrot.lane.b32.xlu0 %v682_v62, %s4944_s29 }
 0x1da   :  { %v673_v2 = vpop.permute.xlu1 %672  ;;  %v675_v3 = vpop.permute.xlu0 %674 }
 0x1db   :  { %v683_v4 = vmul.f32 %v4437_v1, %v673_v2  ;;  %v684_v5 = vmul.f32 %v5067_v63, %v675_v3 }
 0x1dd   :  { %692 = vrot.lane.b32.xlu1 %v683_v4, %s4944_s29  ;;  %694 = vrot.lane.b32.xlu0 %v684_v5, %s4944_s29 }
 0x1de   :  { %v677_v8 = vpop.permute.xlu1 %676 }
 0x1df   :  { %v685_v9 = vmul.f32 %v4439_v6, %v677_v8 }
 0x1e1   :  { %696 = vrot.lane.b32.xlu1 %v685_v9, %s4944_s29 }
 0x219   :  { %v4250_v2 = vpop.f32.mrf.mxu1 }
 0x21b   :  { %v772_v3 = vpop.f32.mrf.mxu1 }
 0x21d   :  { %v4251_v4 = vpop.f32.mrf.mxu1 }
 0x21f   :  { %v775_v5 = vpop.f32.mrf.mxu1 }
 0x24b   :  { %v691_v13 = vpop.permute.xlu0 %690 }
 0x24c   :  { %v5075_v14 = vadd.f32 %v691_v13, %v662_v12  ;;  %v5156_v13 = vld [vmem:[%s6450_s6] ss:$0 sm:$0xff] }
 0x24e   :  { %4440 = vtanh.f32 %v5075_v14 }
 0x24f   :  { %v693_v18 = vpop.permute.xlu1 %692  ;;  %v695_v19 = vpop.permute.xlu0 %694 }
 0x250   :  { %v5079_v20 = vadd.f32 %v693_v18, %v663_v15  ;;  %v5081_v21 = vadd.f32 %v695_v19, %v664_v17 }
 0x252   :  { %4442 = vtanh.f32 %v5079_v20 }
 0x253   :  { %4444 = vtanh.f32 %v5081_v21  ;;  %v697_v24 = vpop.permute.xlu1 %696 }
 0x254   :  { %v5085_v25 = vadd.f32 %v697_v24, %v665_v22 }
 0x256   :  { %4446 = vtanh.f32 %v5085_v25 }
 0x25b   :  { %v4441_v26 = vpop.eup %4440 }
 0x25c   :  { %714 = vrot.lane.b32.xlu0 %v4441_v26, %s4945_s30 }
 0x25f   :  { %v4443_v27 = vpop.eup %4442 }
 0x260   :  { %v4445_v28 = vpop.eup %4444  ;;  %716 = vrot.lane.b32.xlu1 %v4443_v27, %s4945_s30 }
 0x261   :  { %718 = vrot.lane.b32.xlu0 %v4445_v28, %s4945_s30 }
 0x263   :  { %v4447_v30 = vpop.eup %4446 }
 0x264   :  { %720 = vrot.lane.b32.xlu1 %v4447_v30, %s4945_s30 }
 0x265   :  { %82 = vperm.xlu0 %4407, %v39_v29  }
 0x268   :  { %85 = vperm.xlu1 %4408, %v40_v31  }
 0x269   :  { %88 = vperm.xlu0 %4407, %v41_v32  }
 0x26c   :  { %91 = vperm.xlu1 %4408, %v42_v33  }
 0x2ce   :  { %v715_v36 = vpop.permute.xlu0 %714 }
 0x2cf   :  { %v726_v38 = vmul.f32 %v5064_v60, %v715_v36 }
 0x2d2   :  { %v717_v37 = vpop.permute.xlu1 %716 }
 0x2d3   :  { %v727_v39 = vmul.f32 %v4437_v1, %v717_v37  ;;  %v719_v40 = vpop.permute.xlu0 %718 }
 0x2d4   :  { %v728_v43 = vmul.f32 %v5067_v63, %v719_v40 }
 0x2d5   :  { %v730_v41 = vpack.c.bf16 %v727_v39, %v726_v38 }
 0x2d6   :  { %v721_v42 = vpop.permute.xlu1 %720 }
 0x2d7   :  { %v729_v44 = vmul.f32 %v4439_v6, %v721_v42  ;;  %789 = vrot.lane.b32.xlu0 %v730_v41, %s4946_s22 }
 0x2d9   :  { %v731_v45 = vpack.c.bf16 %v729_v44, %v728_v43 }
 0x2db   :  { %791 = vrot.lane.b32.xlu1 %v731_v45, %s4946_s22 }
 0x2e0   :  { %v83_v0 = vpop.permute.xlu0 %82 }
 0x2e1   :  { %vm169_vm5 = vcmp.eq.s32.totalorder %v83_v0, %v5035_v11 }
 0x2e2   :  { %v3945_v48 = vsel %vm169_vm5, 1.0, %v4942_v16 }
 0x2e3   :  { %v86_v46 = vpop.permute.xlu1 %85 }
 0x2e4   :  { %vm170_vm6 = vcmp.eq.s32.totalorder %v86_v46, %v5035_v11  ;;  %v89_v47 = vpop.permute.xlu0 %88 }
 0x2e5   :  { %v3946_v49 = vsel %vm170_vm6, 1.0, %v4942_v16  ;;  %vm171_vm7 = vcmp.eq.s32.totalorder %v89_v47, %v5035_v11 }
 0x2e6   :  { %v263_v50 = vpack.c.bf16 %v3946_v49, %v3945_v48  ;;  %v3947_v52 = vsel %vm171_vm7, 1.0, %v4942_v16 }
 0x2e7   :  { %v92_v51 = vpop.permute.xlu1 %91 }
 0x2e8   :  { %vm172_vm8 = vcmp.eq.s32.totalorder %v92_v51, %v5035_v11  ;;  %4212 = vmatprep.mubr.msk.bf16.mxu0 %vm316_vm4, %v263_v50 }
 0x2e9   :  { %v3948_v53 = vsel %vm172_vm8, 1.0, %v4942_v16 }
 0x2ea   :  { %v264_v54 = vpack.c.bf16 %v3948_v53, %v3947_v52 }
 0x2ec   :  { %4213 = vmatmul.mubr.msk.bf16.gmra.mxu0 %vm316_vm4, %v264_v54 }
 0x349   :  { %v790_v55 = vpop.permute.xlu0 %789 }
 0x34a   :  { %4254 = vmatprep.mubr.msk.bf16.mxu1 %vm581_vm9, %v790_v55 }
 0x34d   :  { %v792_v56 = vpop.permute.xlu1 %791 }
 0x34e   :  { %4255 = vmatmul.mubr.msk.bf16.vlgmr.msra.gmra.mxu1 %vm581_vm9, %v792_v56 }
 0x34f   :  { %4260 = vmatprep.mubr.msk.bf16.mxu1 %vm581_vm9, %v790_v55  ;;  %4259 = vmatpush3.bf16.msra.mxu1 %v5022_v7 }
 0x350   :  { %4264 = vmatprep.subr.bf16.mxu1 %v5107_v34 }
 0x356   :  { %4261 = vmatmul.mubr.msk.bf16.vlgmr.msra.gmra.mxu1 %vm581_vm9, %v792_v56 }
 0x357   :  { %4265 = vmatpush3.bf16.msra.mxu1 %v5107_v34 }
 0x358   :  { %4270 = vmatprep.subr.bf16.mxu1 %v5112_v35 }
 0x3ac   :  { %v4214_v57 = vpop.f32.mrf.mxu0 }
 0x3ad   :  { %v424_v58 = vadd.f32 %v4214_v57, %v5050_v23 }
 0x3ae   :  { %v415_v59 = vpop.f32.mrf.mxu0 }
 0x3af   :  { %532 = vst.msk [vmem:[#allocation2 + $0x30] sm:$0xff] %vm316_vm4, %v424_v58  ;;  %v416_v60 = vadd.f32 %v5050_v23, %v415_v59 }
 0x3b0   :  { %v4215_v61 = vpop.f32.mrf.mxu0 }
 0x3b1   :  { %530 = vst.msk [vmem:[#allocation2 + $0x20] sm:$0xff] %vm316_vm4, %v416_v60  ;;  %v427_v62 = vadd.f32 %v4215_v61, %v5050_v23 }
 0x3b2   :  { %v418_v63 = vpop.f32.mrf.mxu0 }
 0x3b3   :  { %533 = vst.msk [vmem:[#allocation2 + $0x38] sm:$0xff] %vm316_vm4, %v427_v62  ;;  %v419_v1 = vadd.f32 %v5050_v23, %v418_v63 }
 0x3b5   :  { %531 = vst.msk [vmem:[#allocation2 + $0x28] sm:$0xff] %vm316_vm4, %v419_v1 }
 0x3b6   :  { %v1018_v36 = vld [vmem:[#allocation2 + $0x30] sm:$0xff] }
 0x3b8   :  { %v1016_v30 = vld [vmem:[#allocation2 + $0x20] sm:$0xff] }
 0x3ba   :  { %v1019_v40 = vld [vmem:[#allocation2 + $0x38] sm:$0xff] }
 0x3bc   :  { %v1017_v38 = vld [vmem:[#allocation2 + $0x28] sm:$0xff] }
 0x40e   :  { %v4256_v6 = vpop.f32.mrf.mxu1 }
 0x40f   :  { %v848_v9 = vadd.f32 %v4256_v6, %v4250_v2 }
 0x410   :  { %v839_v8 = vpop.f32.mrf.mxu1 }
 0x411   :  { %v840_v12 = vadd.f32 %v839_v8, %v772_v3  ;;  %v862_v19 = vadd.f32 %v5156_v13, %v848_v9 }
 0x412   :  { %v4257_v15 = vpop.f32.mrf.mxu1 }
 0x413   :  { %v860_v17 = vadd.f32 %v5156_v13, %v840_v12  ;;  %v851_v24 = vadd.f32 %v4257_v15, %v4251_v4  ;;  %v4006_v50 = vmul.f32 -1.442695, %v862_v19 }
 0x414   :  { %v842_v18 = vpop.f32.mrf.mxu1 }
 0x415   :  { %v843_v22 = vadd.f32 %v842_v18, %v775_v5  ;;  %4448 = vtanh.f32 %v860_v17  ;;  %v863_v29 = vadd.f32 %v5156_v13, %v851_v24  ;;  %v4004_v49 = vmul.f32 -1.442695, %v860_v17 }
 0x416   :  { %v4262_v26 = vpop.f32.mrf.mxu1  ;;  %4450 = vtanh.f32 %v862_v19 }
 0x417   :  { %v861_v27 = vadd.f32 %v5156_v13, %v843_v22  ;;  %v1063_v37 = vadd.f32 %v4262_v26, %v1018_v36  ;;  %v4007_v52 = vmul.f32 -1.442695, %v863_v29 }
 0x418   :  { %v1054_v28 = vpop.f32.mrf.mxu1 }
 0x419   :  { %4452 = vtanh.f32 %v861_v27  ;;  %v1055_v32 = vadd.f32 %v1054_v28, %v1016_v30  ;;  %v4005_v51 = vmul.f32 -1.442695, %v861_v27  ;;  %v4012_v54 = vmul.f32 -1.442695, %v1063_v37 }
 0x41a   :  { %v4263_v31 = vpop.f32.mrf.mxu1  ;;  %4454 = vtanh.f32 %v863_v29 }
 0x41b   :  { %4456 = vtanh.f32 %v1055_v32  ;;  %v1066_v42 = vadd.f32 %v4263_v31, %v1019_v40  ;;  %v4010_v53 = vmul.f32 -1.442695, %v1055_v32 }
 0x41c   :  { %v1057_v33 = vpop.f32.mrf.mxu1  ;;  %4458 = vtanh.f32 %v1063_v37 }
 0x41d   :  { %v1058_v39 = vadd.f32 %v1057_v33, %v1017_v38  ;;  %v4013_v57 = vmul.f32 -1.442695, %v1066_v42 }
 0x41f   :  { %4460 = vtanh.f32 %v1058_v39  ;;  %v4011_v55 = vmul.f32 -1.442695, %v1058_v39 }
 0x420   :  { %4462 = vtanh.f32 %v1066_v42 }
 0x421   :  { %4464 = vpow2.f32 %v4004_v49 }
 0x422   :  { %v4449_v41 = vpop.eup %4448  ;;  %4466 = vpow2.f32 %v4006_v50 }
 0x423   :  { %900 = vrot.lane.b32.xlu0 %v4449_v41, %s4943_s28  ;;  %v4451_v43 = vpop.eup %4450  ;;  %4468 = vpow2.f32 %v4005_v51 }
 0x424   :  { %4470 = vpow2.f32 %v4007_v52 }
 0x425   :  { %4472 = vpow2.f32 %v4010_v53 }
 0x426   :  { %v4453_v44 = vpop.eup %4452  ;;  %4474 = vpow2.f32 %v4012_v54 }
 0x427   :  { %902 = vrot.lane.b32.xlu1 %v4453_v44, %s4943_s28  ;;  %904 = vrot.lane.b32.xlu0 %v4451_v43, %s4943_s28  ;;  %v4455_v45 = vpop.eup %4454  ;;  %4476 = vpow2.f32 %v4011_v55 }
 0x428   :  { %v4457_v0 = vpop.eup %4456  ;;  %4478 = vpow2.f32 %v4013_v57 }
 0x429   :  { %v4459_v46 = vpop.eup %4458 }
 0x42b   :  { %906 = vrot.lane.b32.xlu1 %v4455_v45, %s4943_s28  ;;  %1105 = vrot.lane.b32.xlu0 %v4457_v0, %s4943_s28 }
 0x42c   :  { %v4461_v47 = vpop.eup %4460 }
 0x42d   :  { %v4463_v48 = vpop.eup %4462 }
 0x42e   :  { %v4465_v56 = vpop.eup %4464 }
 0x42f   :  { %1107 = vrot.lane.b32.xlu1 %v4461_v47, %s4943_s28  ;;  %1109 = vrot.lane.b32.xlu0 %v4459_v46, %s4943_s28  ;;  %v4467_v58 = vpop.eup %4466  ;;  %v876_v59 = vadd.f32 1.0, %v4465_v56 }
 0x430   :  { %v4469_v60 = vpop.eup %4468  ;;  %v878_v61 = vadd.f32 1.0, %v4467_v58 }
 0x431   :  { %4480 = vrcp.f32 %v876_v59  ;;  %v877_v62 = vadd.f32 1.0, %v4469_v60  ;;  %v4471_v63 = vpop.eup %4470 }
 0x432   :  { %v4473_v1 = vpop.eup %4472  ;;  %4482 = vrcp.f32 %v878_v61  ;;  %v879_v2 = vadd.f32 1.0, %v4471_v63 }
 0x433   :  { %1111 = vrot.lane.b32.xlu1 %v4463_v48, %s4943_s28  ;;  %4484 = vrcp.f32 %v877_v62  ;;  %v4475_v3 = vpop.eup %4474  ;;  %v1081_v4 = vadd.f32 1.0, %v4473_v1 }
 0x434   :  { %v4477_v5 = vpop.eup %4476  ;;  %4486 = vrcp.f32 %v879_v2  ;;  %v1083_v6 = vadd.f32 1.0, %v4475_v3 }
 0x435   :  { %4488 = vrcp.f32 %v1081_v4  ;;  %v1082_v8 = vadd.f32 1.0, %v4477_v5  ;;  %v4479_v9 = vpop.eup %4478 }
 0x436   :  { %4490 = vrcp.f32 %v1083_v6  ;;  %v1084_v15 = vadd.f32 1.0, %v4479_v9 }
 0x437   :  { %4492 = vrcp.f32 %v1082_v8 }
 0x438   :  { %4494 = vrcp.f32 %v1084_v15  ;;  %v43_v15 = vld [vmem:[%s6444_s0 + $0x40] sm:$0xff] }
 0x43e   :  { %v5170_v12 = vpop.eup %4480 }
 0x43f   :  { %v5173_v19 = vpop.eup %4482  ;;  %v892_v0 = vmul.f32 0.0, %v5170_v12 }
 0x440   :  { %v5176_v22 = vpop.eup %4484  ;;  %v894_v49 = vmul.f32 0.0, %v5173_v19 }
 0x441   :  { %v5182_v29 = vpop.eup %4486  ;;  %v893_v48 = vmul.f32 0.0, %v5176_v22 }
 0x442   :  { %v5184_v31 = vpop.eup %4488  ;;  %v895_v54 = vmul.f32 0.0, %v5182_v29 }
 0x443   :  { %v5189_v37 = vpop.eup %4490  ;;  %v1097_v56 = vmul.f32 %v5184_v31, %v5075_v14 }
 0x444   :  { %v5192_v38 = vpop.eup %4492  ;;  %v1099_v61 = vmul.f32 %v5189_v37, %v5081_v21 }
 0x445   :  { %v5198_v43 = vpop.eup %4494  ;;  %v1098_v60 = vmul.f32 %v5192_v38, %v5079_v20 }
 0x446   :  { %v1100_v3 = vmul.f32 %v5198_v43, %v5085_v25 }
 0x495   :  { %v901_v17 = vpop.permute.xlu0 %900 }
 0x496   :  { %v912_v18 = vmul.f32 %v5170_v12, %v901_v17 }
 0x498   :  { %920 = vrot.lane.b32.xlu0 %v912_v18, %s4944_s29  ;;  %v44_v18 = vld [vmem:[%s6444_s0 + $0x48] sm:$0xff] }
 0x499   :  { %v903_v24 = vpop.permute.xlu1 %902  ;;  %v905_v26 = vpop.permute.xlu0 %904 }
 0x49a   :  { %v913_v27 = vmul.f32 %v5176_v22, %v903_v24  ;;  %v914_v28 = vmul.f32 %v5173_v19, %v905_v26  ;;  %v45_v24 = vld [vmem:[%s6444_s0 + $0x50] sm:$0xff]  ;;  %v46_v26 = vld [vmem:[%s6444_s0 + $0x58] sm:$0xff] }
 0x49c   :  { %922 = vrot.lane.b32.xlu1 %v913_v27, %s4944_s29  ;;  %924 = vrot.lane.b32.xlu0 %v914_v28, %s4944_s29 }
 0x49d   :  { %v907_v30 = vpop.permute.xlu1 %906  ;;  %v1106_v33 = vpop.permute.xlu0 %1105 }
 0x49e   :  { %v915_v32 = vmul.f32 %v5182_v29, %v907_v30  ;;  %v1117_v36 = vmul.f32 %v5184_v31, %v1106_v33 }
 0x4a0   :  { %926 = vrot.lane.b32.xlu1 %v915_v32, %s4944_s29  ;;  %1125 = vrot.lane.b32.xlu0 %v1117_v36, %s4944_s29 }
 0x4a1   :  { %v1108_v39 = vpop.permute.xlu1 %1107  ;;  %v1110_v40 = vpop.permute.xlu0 %1109 }
 0x4a2   :  { %v1118_v41 = vmul.f32 %v5192_v38, %v1108_v39  ;;  %v1119_v42 = vmul.f32 %v5189_v37, %v1110_v40 }
 0x4a4   :  { %1127 = vrot.lane.b32.xlu1 %v1118_v41, %s4944_s29  ;;  %1129 = vrot.lane.b32.xlu0 %v1119_v42, %s4944_s29 }
 0x4a5   :  { %v1112_v44 = vpop.permute.xlu1 %1111 }
 0x4a6   :  { %v1120_v45 = vmul.f32 %v5198_v43, %v1112_v44 }
 0x4a8   :  { %1131 = vrot.lane.b32.xlu1 %v1120_v45, %s4944_s29 }
 0x50a   :  { %v921_v46 = vpop.permute.xlu0 %920 }
 0x50b   :  { %v5203_v47 = vadd.f32 %v921_v46, %v892_v0 }
 0x50d   :  { %4496 = vtanh.f32 %v5203_v47 }
 0x50e   :  { %v923_v50 = vpop.permute.xlu1 %922  ;;  %v925_v51 = vpop.permute.xlu0 %924 }
 0x50f   :  { %v5208_v52 = vadd.f32 %v923_v50, %v893_v48  ;;  %v5210_v53 = vadd.f32 %v925_v51, %v894_v49 }
 0x511   :  { %4498 = vtanh.f32 %v5208_v52 }
 0x512   :  { %4500 = vtanh.f32 %v5210_v53  ;;  %v927_v55 = vpop.permute.xlu1 %926  ;;  %v1126_v58 = vpop.permute.xlu0 %1125 }
 0x513   :  { %v5217_v57 = vadd.f32 %v927_v55, %v895_v54  ;;  %v5219_v59 = vadd.f32 %v1126_v58, %v1097_v56 }
 0x515   :  { %4502 = vtanh.f32 %v5217_v57 }
 0x516   :  { %4504 = vtanh.f32 %v5219_v59  ;;  %v1128_v62 = vpop.permute.xlu1 %1127  ;;  %v1130_v63 = vpop.permute.xlu0 %1129 }
 0x517   :  { %v5227_v1 = vadd.f32 %v1128_v62, %v1098_v60  ;;  %v5229_v14 = vadd.f32 %v1130_v63, %v1099_v61 }
 0x519   :  { %4506 = vtanh.f32 %v5227_v1 }
 0x51a   :  { %v4497_v2 = vpop.eup %4496  ;;  %4508 = vtanh.f32 %v5229_v14  ;;  %v1132_v4 = vpop.permute.xlu1 %1131 }
 0x51b   :  { %944 = vrot.lane.b32.xlu0 %v4497_v2, %s4945_s30  ;;  %v5236_v20 = vadd.f32 %v1132_v4, %v1100_v3 }
 0x51d   :  { %4510 = vtanh.f32 %v5236_v20 }
 0x51e   :  { %v4499_v21 = vpop.eup %4498 }
 0x51f   :  { %v4501_v5 = vpop.eup %4500  ;;  %946 = vrot.lane.b32.xlu1 %v4499_v21, %s4945_s30 }
 0x520   :  { %948 = vrot.lane.b32.xlu0 %v4501_v5, %s4945_s30 }
 0x522   :  { %v4503_v6 = vpop.eup %4502 }
 0x523   :  { %v4505_v8 = vpop.eup %4504  ;;  %950 = vrot.lane.b32.xlu1 %v4503_v6, %s4945_s30 }
 0x524   :  { %1149 = vrot.lane.b32.xlu0 %v4505_v8, %s4945_s30 }
 0x526   :  { %v4507_v25 = vpop.eup %4506 }
 0x527   :  { %v4509_v9 = vpop.eup %4508  ;;  %1151 = vrot.lane.b32.xlu1 %v4507_v25, %s4945_s30 }
 0x528   :  { %1153 = vrot.lane.b32.xlu0 %v4509_v9, %s4945_s30 }
 0x52a   :  { %v4511_v17 = vpop.eup %4510 }
 0x52b   :  { %1155 = vrot.lane.b32.xlu1 %v4511_v17, %s4945_s30 }
 0x52c   :  { %94 = vperm.xlu0 %4407, %v43_v15  }
 0x52f   :  { %97 = vperm.xlu1 %4408, %v44_v18  }
 0x530   :  { %100 = vperm.xlu0 %4407, %v45_v24  }
 0x533   :  { %103 = vperm.xlu1 %4408, %v46_v26  }
 0x58d   :  { %v945_v27 = vpop.permute.xlu0 %944 }
 0x58e   :  { %v5259_v30 = vmul.f32 %v5170_v12, %v945_v27 }
 0x591   :  { %v947_v28 = vpop.permute.xlu1 %946 }
 0x592   :  { %v5262_v32 = vmul.f32 %v5176_v22, %v947_v28  ;;  %v949_v33 = vpop.permute.xlu0 %948 }
 0x593   :  { %v5267_v40 = vmul.f32 %v5173_v19, %v949_v33 }
 0x594   :  { %v1167_v36 = vpack.c.bf16 %v5262_v32, %v5259_v30 }
 0x595   :  { %v951_v39 = vpop.permute.xlu1 %950 }
 0x596   :  { %v5270_v41 = vmul.f32 %v5182_v29, %v951_v39  ;;  %v1150_v42 = vpop.permute.xlu0 %1149  ;;  %1171 = vrot.lane.b32.xlu0 %v1167_v36, %s4946_s22 }
 0x597   :  { %v1161_v22 = vmul.f32 %v5184_v31, %v1150_v42 }
 0x598   :  { %v1168_v12 = vpack.c.bf16 %v5270_v41, %v5267_v40 }
 0x599   :  { %v1152_v44 = vpop.permute.xlu1 %1151 }
 0x59a   :  { %1173 = vrot.lane.b32.xlu1 %v1168_v12, %s4946_s22  ;;  %v1162_v45 = vmul.f32 %v5192_v38, %v1152_v44  ;;  %v1154_v0 = vpop.permute.xlu0 %1153 }
 0x59b   :  { %v1163_v48 = vmul.f32 %v5189_v37, %v1154_v0 }
 0x59c   :  { %v1165_v46 = vpack.c.bf16 %v1162_v45, %v1161_v22 }
 0x59d   :  { %v1156_v19 = vpop.permute.xlu1 %1155 }
 0x59e   :  { %v1164_v29 = vmul.f32 %v5198_v43, %v1156_v19  ;;  %1232 = vrot.lane.b32.xlu0 %v1165_v46, %s4946_s22 }
 0x5a0   :  { %v1166_v49 = vpack.c.bf16 %v1164_v29, %v1163_v48 }
 0x5a2   :  { %1234 = vrot.lane.b32.xlu1 %v1166_v49, %s4946_s22 }
 0x5a7   :  { %v95_v50 = vpop.permute.xlu0 %94 }
 0x5a8   :  { %vm173_vm10 = vcmp.eq.s32.totalorder %v95_v50, %v5035_v11 }
 0x5a9   :  { %v3949_v38 = vsel %vm173_vm10, 1.0, %v4942_v16 }
 0x5aa   :  { %v98_v51 = vpop.permute.xlu1 %97 }
 0x5ab   :  { %vm174_vm11 = vcmp.eq.s32.totalorder %v98_v51, %v5035_v11  ;;  %v101_v31 = vpop.permute.xlu0 %100 }
 0x5ac   :  { %v3950_v54 = vsel %vm174_vm11, 1.0, %v4942_v16  ;;  %vm175_vm12 = vcmp.eq.s32.totalorder %v101_v31, %v5035_v11 }
 0x5ad   :  { %v265_v55 = vpack.c.bf16 %v3950_v54, %v3949_v38  ;;  %v3951_v43 = vsel %vm175_vm12, 1.0, %v4942_v16 }
 0x5ae   :  { %v104_v37 = vpop.permute.xlu1 %103 }
 0x5af   :  { %vm176_vm13 = vcmp.eq.s32.totalorder %v104_v37, %v5035_v11  ;;  %4216 = vmatprep.mubr.msk.bf16.mxu0 %vm316_vm4, %v265_v55 }
 0x5b0   :  { %v3952_v56 = vsel %vm176_vm13, 1.0, %v4942_v16 }
 0x5b1   :  { %v266_v58 = vpack.c.bf16 %v3952_v56, %v3951_v43 }
 0x5b3   :  { %4217 = vmatmul.mubr.msk.bf16.gmra.mxu0 %vm316_vm4, %v266_v58 }
 0x608   :  { %v1172_v60 = vpop.permute.xlu0 %1171 }
 0x609   :  { %4266 = vmatprep.mubr.msk.bf16.mxu1 %vm581_vm9, %v1172_v60 }
 0x60c   :  { %v1174_v61 = vpop.permute.xlu1 %1173 }
 0x60d   :  { %4267 = vmatmul.mubr.msk.bf16.vlgmr.msra.gmra.mxu1 %vm581_vm9, %v1174_v61 }
 0x60e   :  { %4271 = vmatpush3.bf16.msra.mxu1 %v5112_v35 }
 0x60f   :  { %4276 = vmatprep.subr.bf16.mxu1 %v5022_v7 }
 0x610   :  { %v1233_v62 = vpop.permute.xlu0 %1232 }
 0x611   :  { %4272 = vmatprep.mubr.msk.bf16.mxu1 %vm581_vm9, %v1233_v62 }
 0x614   :  { %v1235_v63 = vpop.permute.xlu1 %1234 }
 0x615   :  { %4273 = vmatmul.mubr.msk.bf16.vlgmr.msra.gmra.mxu1 %vm581_vm9, %v1235_v63 }
 0x616   :  { %4278 = vmatprep.mubr.msk.bf16.mxu1 %vm581_vm9, %v1233_v62  ;;  %4277 = vmatpush3.bf16.msra.mxu1 %v5022_v7 }
 0x617   :  { %4282 = vmatprep.subr.bf16.mxu1 %v5107_v34 }
 0x61d   :  { %4279 = vmatmul.mubr.msk.bf16.vlgmr.msra.gmra.mxu1 %vm581_vm9, %v1235_v63 }
 0x61e   :  { %4283 = vmatpush3.bf16.msra.mxu1 %v5107_v34 }
 0x61f   :  { %4288 = vmatprep.subr.bf16.mxu1 %v5112_v35 }
 0x673   :  { %v4218_v2 = vpop.f32.mrf.mxu0 }
 0x674   :  { %v440_v3 = vadd.f32 %v4218_v2, %v5050_v23 }
 0x675   :  { %v431_v4 = vpop.f32.mrf.mxu0 }
 0x676   :  { %536 = vst.msk [vmem:[#allocation2 + $0x50] sm:$0xff] %vm316_vm4, %v440_v3  ;;  %v432_v21 = vadd.f32 %v5050_v23, %v431_v4 }
 0x677   :  { %v4219_v5 = vpop.f32.mrf.mxu0 }
 0x678   :  { %534 = vst.msk [vmem:[#allocation2 + $0x40] sm:$0xff] %vm316_vm4, %v432_v21  ;;  %v443_v7 = vadd.f32 %v4219_v5, %v5050_v23 }
 0x679   :  { %v434_v6 = vpop.f32.mrf.mxu0 }
 0x67a   :  { %537 = vst.msk [vmem:[#allocation2 + $0x58] sm:$0xff] %vm316_vm4, %v443_v7  ;;  %v435_v34 = vadd.f32 %v5050_v23, %v434_v6 }
 0x67c   :  { %535 = vst.msk [vmem:[#allocation2 + $0x48] sm:$0xff] %vm316_vm4, %v435_v34 }
 0x67d   :  { %v1433_v19 = vld [vmem:[#allocation2 + $0x50] sm:$0xff] }
 0x67f   :  { %v1431_v22 = vld [vmem:[#allocation2 + $0x40] sm:$0xff] }
 0x681   :  { %v1434_v50 = vld [vmem:[#allocation2 + $0x58] sm:$0xff] }
 0x683   :  { %v1432_v29 = vld [vmem:[#allocation2 + $0x48] sm:$0xff] }
 0x6cd   :  { %v4268_v35 = vpop.f32.mrf.mxu1 }
 0x6cf   :  { %v1215_v8 = vpop.f32.mrf.mxu1 }
 0x6d1   :  { %v4269_v25 = vpop.f32.mrf.mxu1 }
 0x6d3   :  { %v1218_v9 = vpop.f32.mrf.mxu1 }
 0x6d5   :  { %v4274_v15 = vpop.f32.mrf.mxu1 }
 0x6d6   :  { %v1285_v18 = vadd.f32 %v4274_v15, %v4268_v35 }
 0x6d7   :  { %v1276_v17 = vpop.f32.mrf.mxu1 }
 0x6d8   :  { %v1277_v24 = vadd.f32 %v1276_v17, %v1215_v8  ;;  %v1293_v33 = vadd.f32 %v5156_v13, %v1285_v18 }
 0x6d9   :  { %v4275_v26 = vpop.f32.mrf.mxu1 }
 0x6da   :  { %v1291_v27 = vadd.f32 %v5156_v13, %v1277_v24  ;;  %v1288_v39 = vadd.f32 %v4275_v26, %v4269_v25  ;;  %v4020_v61 = vmul.f32 -1.442695, %v1293_v33 }
 0x6db   :  { %v1279_v28 = vpop.f32.mrf.mxu1 }
 0x6dc   :  { %v1280_v36 = vadd.f32 %v1279_v28, %v1218_v9  ;;  %4512 = vtanh.f32 %v1291_v27  ;;  %v1294_v44 = vadd.f32 %v5156_v13, %v1288_v39  ;;  %v4018_v60 = vmul.f32 -1.442695, %v1291_v27 }
 0x6dd   :  { %v4280_v23 = vpop.f32.mrf.mxu1  ;;  %4514 = vtanh.f32 %v1293_v33 }
 0x6de   :  { %v1292_v42 = vadd.f32 %v5156_v13, %v1280_v36  ;;  %v1478_v48 = vadd.f32 %v4280_v23, %v1433_v19  ;;  %v4021_v63 = vmul.f32 -1.442695, %v1294_v44 }
 0x6df   :  { %v1469_v12 = vpop.f32.mrf.mxu1 }
 0x6e0   :  { %4516 = vtanh.f32 %v1292_v42  ;;  %v1470_v0 = vadd.f32 %v1469_v12, %v1431_v22  ;;  %v4019_v62 = vmul.f32 -1.442695, %v1292_v42  ;;  %v4026_v3 = vmul.f32 -1.442695, %v1478_v48 }
 0x6e1   :  { %v4281_v45 = vpop.f32.mrf.mxu1  ;;  %4518 = vtanh.f32 %v1294_v44 }
 0x6e2   :  { %4520 = vtanh.f32 %v1470_v0  ;;  %v1481_v31 = vadd.f32 %v4281_v45, %v1434_v50  ;;  %v4024_v2 = vmul.f32 -1.442695, %v1470_v0 }
 0x6e3   :  { %v1472_v46 = vpop.f32.mrf.mxu1  ;;  %4522 = vtanh.f32 %v1478_v48 }
 0x6e4   :  { %v1473_v49 = vadd.f32 %v1472_v46, %v1432_v29  ;;  %v4027_v5 = vmul.f32 -1.442695, %v1481_v31 }
 0x6e6   :  { %4524 = vtanh.f32 %v1473_v49  ;;  %v4025_v4 = vmul.f32 -1.442695, %v1473_v49 }
 0x6e7   :  { %4526 = vtanh.f32 %v1481_v31 }
 0x6e8   :  { %4528 = vpow2.f32 %v4018_v60 }
 0x6e9   :  { %v4513_v51 = vpop.eup %4512  ;;  %4530 = vpow2.f32 %v4020_v61 }
 0x6ea   :  { %1331 = vrot.lane.b32.xlu0 %v4513_v51, %s4943_s28  ;;  %v4515_v38 = vpop.eup %4514  ;;  %4532 = vpow2.f32 %v4019_v62 }
 0x6eb   :  { %4534 = vpow2.f32 %v4021_v63 }
 0x6ec   :  { %4536 = vpow2.f32 %v4024_v2 }
 0x6ed   :  { %v4517_v54 = vpop.eup %4516  ;;  %4538 = vpow2.f32 %v4026_v3 }
 0x6ee   :  { %1333 = vrot.lane.b32.xlu1 %v4517_v54, %s4943_s28  ;;  %1335 = vrot.lane.b32.xlu0 %v4515_v38, %s4943_s28  ;;  %v4519_v55 = vpop.eup %4518  ;;  %4540 = vpow2.f32 %v4025_v4 }
 0x6ef   :  { %v4521_v37 = vpop.eup %4520  ;;  %4542 = vpow2.f32 %v4027_v5 }
 0x6f0   :  { %v4523_v43 = vpop.eup %4522 }
 0x6f2   :  { %1337 = vrot.lane.b32.xlu1 %v4519_v55, %s4943_s28  ;;  %1520 = vrot.lane.b32.xlu0 %v4521_v37, %s4943_s28 }
 0x6f3   :  { %v4525_v56 = vpop.eup %4524 }
 0x6f4   :  { %v4527_v58 = vpop.eup %4526 }
 0x6f5   :  { %v4529_v21 = vpop.eup %4528 }
 0x6f6   :  { %1522 = vrot.lane.b32.xlu1 %v4525_v56, %s4943_s28  ;;  %1524 = vrot.lane.b32.xlu0 %v4523_v43, %s4943_s28  ;;  %v4531_v7 = vpop.eup %4530  ;;  %v1307_v6 = vadd.f32 1.0, %v4529_v21 }
 0x6f7   :  { %v4533_v34 = vpop.eup %4532  ;;  %v1309_v35 = vadd.f32 1.0, %v4531_v7 }
 0x6f8   :  { %4544 = vrcp.f32 %v1307_v6  ;;  %v1308_v8 = vadd.f32 1.0, %v4533_v34  ;;  %v4535_v25 = vpop.eup %4534 }
 0x6f9   :  { %v4537_v9 = vpop.eup %4536  ;;  %4546 = vrcp.f32 %v1309_v35  ;;  %v1310_v15 = vadd.f32 1.0, %v4535_v25 }
 0x6fa   :  { %1526 = vrot.lane.b32.xlu1 %v4527_v58, %s4943_s28  ;;  %4548 = vrcp.f32 %v1308_v8  ;;  %v4539_v17 = vpop.eup %4538  ;;  %v1496_v18 = vadd.f32 1.0, %v4537_v9 }
 0x6fb   :  { %v4541_v24 = vpop.eup %4540  ;;  %4550 = vrcp.f32 %v1310_v15  ;;  %v1498_v26 = vadd.f32 1.0, %v4539_v17 }
 0x6fc   :  { %4552 = vrcp.f32 %v1496_v18  ;;  %v1497_v27 = vadd.f32 1.0, %v4541_v24  ;;  %v4543_v28 = vpop.eup %4542 }
 0x6fd   :  { %4554 = vrcp.f32 %v1498_v26  ;;  %v1499_v36 = vadd.f32 1.0, %v4543_v28 }
 0x6fe   :  { %4556 = vrcp.f32 %v1497_v27 }
 0x6ff   :  { %4558 = vrcp.f32 %v1499_v36  ;;  %v47_v36 = vld [vmem:[%s6444_s0 + $0x60] sm:$0xff] }
 0x705   :  { %v5324_v33 = vpop.eup %4544 }
 0x706   :  { %v5327_v42 = vpop.eup %4546  ;;  %v1323_v60 = vmul.f32 %v5324_v33, %v5203_v47 }
 0x707   :  { %v5330_v12 = vpop.eup %4548  ;;  %v1325_v2 = vmul.f32 %v5327_v42, %v5210_v53 }
 0x708   :  { %v5336_v46 = vpop.eup %4550  ;;  %v1324_v63 = vmul.f32 %v5330_v12, %v5208_v52 }
 0x709   :  { %v5338_v48 = vpop.eup %4552  ;;  %v1326_v47 = vmul.f32 %v5336_v46, %v5217_v57 }
 0x70a   :  { %v5343_v51 = vpop.eup %4554  ;;  %v1512_v52 = vmul.f32 %v5338_v48, %v5219_v59 }
 0x70b   :  { %v5346_v31 = vpop.eup %4556  ;;  %v1514_v57 = vmul.f32 %v5343_v51, %v5229_v14 }
 0x70c   :  { %v5352_v43 = vpop.eup %4558  ;;  %v1513_v35 = vmul.f32 %v5346_v31, %v5227_v1 }
 0x70d   :  { %v1515_v17 = vmul.f32 %v5352_v43, %v5236_v20 }
 0x75c   :  { %v1332_v39 = vpop.permute.xlu0 %1331 }
 0x75d   :  { %v1343_v23 = vmul.f32 %v5324_v33, %v1332_v39 }
 0x75f   :  { %1351 = vrot.lane.b32.xlu0 %v1343_v23, %s4944_s29  ;;  %v48_v23 = vld [vmem:[%s6444_s0 + $0x68] sm:$0xff] }
 0x760   :  { %v1334_v44 = vpop.permute.xlu1 %1333  ;;  %v1336_v22 = vpop.permute.xlu0 %1335 }
 0x761   :  { %v1344_v45 = vmul.f32 %v5330_v12, %v1334_v44  ;;  %v1345_v0 = vmul.f32 %v5327_v42, %v1336_v22  ;;  %v49_v44 = vld [vmem:[%s6444_s0 + $0x70] sm:$0xff]  ;;  %v50_v22 = vld [vmem:[%s6444_s0 + $0x78] sm:$0xff] }
 0x763   :  { %1353 = vrot.lane.b32.xlu1 %v1344_v45, %s4944_s29  ;;  %1355 = vrot.lane.b32.xlu0 %v1345_v0, %s4944_s29 }
 0x764   :  { %v1338_v19 = vpop.permute.xlu1 %1337  ;;  %v1521_v49 = vpop.permute.xlu0 %1520 }
 0x765   :  { %v1346_v29 = vmul.f32 %v5336_v46, %v1338_v19  ;;  %v1532_v50 = vmul.f32 %v5338_v48, %v1521_v49 }
 0x767   :  { %1357 = vrot.lane.b32.xlu1 %v1346_v29, %s4944_s29  ;;  %1540 = vrot.lane.b32.xlu0 %v1532_v50, %s4944_s29 }
 0x768   :  { %v1523_v38 = vpop.permute.xlu1 %1522  ;;  %v1525_v54 = vpop.permute.xlu0 %1524 }
 0x769   :  { %v1533_v55 = vmul.f32 %v5346_v31, %v1523_v38  ;;  %v1534_v37 = vmul.f32 %v5343_v51, %v1525_v54 }
 0x76b   :  { %1542 = vrot.lane.b32.xlu1 %v1533_v55, %s4944_s29  ;;  %1544 = vrot.lane.b32.xlu0 %v1534_v37, %s4944_s29 }
 0x76c   :  { %v1527_v56 = vpop.permute.xlu1 %1526 }
 0x76d   :  { %v1535_v58 = vmul.f32 %v5352_v43, %v1527_v56 }
 0x76f   :  { %1546 = vrot.lane.b32.xlu1 %v1535_v58, %s4944_s29 }
 0x7d1   :  { %v1352_v61 = vpop.permute.xlu0 %1351 }
 0x7d2   :  { %v5358_v62 = vadd.f32 %v1352_v61, %v1323_v60 }
 0x7d4   :  { %4560 = vtanh.f32 %v5358_v62 }
 0x7d5   :  { %v1354_v3 = vpop.permute.xlu1 %1353  ;;  %v1356_v4 = vpop.permute.xlu0 %1355 }
 0x7d6   :  { %v5365_v21 = vadd.f32 %v1354_v3, %v1324_v63  ;;  %v5367_v5 = vadd.f32 %v1356_v4, %v1325_v2 }
 0x7d8   :  { %4562 = vtanh.f32 %v5365_v21 }
 0x7d9   :  { %4564 = vtanh.f32 %v5367_v5  ;;  %v1358_v7 = vpop.permute.xlu1 %1357  ;;  %v1541_v53 = vpop.permute.xlu0 %1540 }
 0x7da   :  { %v5375_v6 = vadd.f32 %v1358_v7, %v1326_v47  ;;  %v5377_v34 = vadd.f32 %v1541_v53, %v1512_v52 }
 0x7dc   :  { %4566 = vtanh.f32 %v5375_v6 }
 0x7dd   :  { %4568 = vtanh.f32 %v5377_v34  ;;  %v1543_v8 = vpop.permute.xlu1 %1542  ;;  %v1545_v25 = vpop.permute.xlu0 %1544 }
 0x7de   :  { %v5385_v9 = vadd.f32 %v1543_v8, %v1513_v35  ;;  %v5387_v59 = vadd.f32 %v1545_v25, %v1514_v57  ;;  %v5455_v8 = vld [vmem:[%s6449_s4] sm:$0xff]  }
 0x7df   :  { %v5461_v25 = vld [vmem:[%s6446_s2] sm:$0xff]  }
 0x7e0   :  { %4570 = vtanh.f32 %v5385_v9 }
 0x7e1   :  { %v4561_v15 = vpop.eup %4560  ;;  %4572 = vtanh.f32 %v5387_v59  ;;  %v1547_v18 = vpop.permute.xlu1 %1546 }
 0x7e2   :  { %1375 = vrot.lane.b32.xlu0 %v4561_v15, %s4945_s30  ;;  %v5394_v1 = vadd.f32 %v1547_v18, %v1515_v17  ;;  %v5474_v18 = vld [vmem:[%s6448_s5] sm:$0xff]  }
 0x7e4   :  { %4574 = vtanh.f32 %v5394_v1 }
 0x7e5   :  { %v4563_v14 = vpop.eup %4562 }
 0x7e6   :  { %v4565_v24 = vpop.eup %4564  ;;  %1377 = vrot.lane.b32.xlu1 %v4563_v14, %s4945_s30 }
 0x7e7   :  { %1379 = vrot.lane.b32.xlu0 %v4565_v24, %s4945_s30  ;;  %v5480_v24 = vld [vmem:[%s6447_s3] ss:$0 sm:$0xff]  ;;  %s4947_s3 = smov 48  }
 0x7e9   :  { %v4567_v26 = vpop.eup %4566 }
 0x7ea   :  { %v4569_v27 = vpop.eup %4568  ;;  %1381 = vrot.lane.b32.xlu1 %v4567_v26, %s4945_s30 }
 0x7eb   :  { %1564 = vrot.lane.b32.xlu0 %v4569_v27, %s4945_s30 }
 0x7ed   :  { %v4571_v20 = vpop.eup %4570 }
 0x7ee   :  { %v4573_v28 = vpop.eup %4572  ;;  %1566 = vrot.lane.b32.xlu1 %v4571_v20, %s4945_s30 }
 0x7ef   :  { %1568 = vrot.lane.b32.xlu0 %v4573_v28, %s4945_s30 }
 0x7f1   :  { %v4575_v39 = vpop.eup %4574 }
 0x7f2   :  { %1570 = vrot.lane.b32.xlu1 %v4575_v39, %s4945_s30 }
 0x7f3   :  { %106 = vperm.xlu0 %4407, %v47_v36  }
 0x7f6   :  { %109 = vperm.xlu1 %4408, %v48_v23  }
 0x7f7   :  { %112 = vperm.xlu0 %4407, %v49_v44  }
 0x7fa   :  { %115 = vperm.xlu1 %4408, %v50_v22  }
 0x854   :  { %v1376_v45 = vpop.permute.xlu0 %1375 }
 0x855   :  { %v5417_v19 = vmul.f32 %v5324_v33, %v1376_v45 }
 0x858   :  { %v1378_v0 = vpop.permute.xlu1 %1377 }
 0x859   :  { %v5420_v29 = vmul.f32 %v5330_v12, %v1378_v0  ;;  %v1380_v49 = vpop.permute.xlu0 %1379 }
 0x85a   :  { %v5425_v54 = vmul.f32 %v5327_v42, %v1380_v49 }
 0x85b   :  { %v1582_v50 = vpack.c.bf16 %v5420_v29, %v5417_v19 }
 0x85c   :  { %v1382_v38 = vpop.permute.xlu1 %1381 }
 0x85d   :  { %v5428_v55 = vmul.f32 %v5336_v46, %v1382_v38  ;;  %v1565_v37 = vpop.permute.xlu0 %1564  ;;  %1586 = vrot.lane.b32.xlu0 %v1582_v50, %s4946_s22 }
 0x85e   :  { %v1576_v12 = vmul.f32 %v5338_v48, %v1565_v37 }
 0x85f   :  { %v1583_v33 = vpack.c.bf16 %v5428_v55, %v5425_v54 }
 0x860   :  { %v1567_v56 = vpop.permute.xlu1 %1566 }
 0x861   :  { %1588 = vrot.lane.b32.xlu1 %v1583_v33, %s4946_s22  ;;  %v1577_v58 = vmul.f32 %v5346_v31, %v1567_v56  ;;  %v1569_v60 = vpop.permute.xlu0 %1568 }
 0x862   :  { %v1578_v63 = vmul.f32 %v5343_v51, %v1569_v60 }
 0x863   :  { %v1580_v61 = vpack.c.bf16 %v1577_v58, %v1576_v12 }
 0x864   :  { %v1571_v42 = vpop.permute.xlu1 %1570 }
 0x865   :  { %v1579_v46 = vmul.f32 %v5352_v43, %v1571_v42  ;;  %1647 = vrot.lane.b32.xlu0 %v1580_v61, %s4946_s22 }
 0x867   :  { %v1581_v2 = vpack.c.bf16 %v1579_v46, %v1578_v63 }
 0x869   :  { %1649 = vrot.lane.b32.xlu1 %v1581_v2, %s4946_s22 }
 0x86e   :  { %v107_v3 = vpop.permute.xlu0 %106 }
 0x86f   :  { %vm177_vm14 = vcmp.eq.s32.totalorder %v107_v3, %v5035_v11 }
 0x870   :  { %v3953_v31 = vsel %vm177_vm14, 1.0, %v4942_v16 }
 0x871   :  { %v110_v4 = vpop.permute.xlu1 %109 }
 0x872   :  { %vm178_vm15 = vcmp.eq.s32.totalorder %v110_v4, %v5035_v11  ;;  %v113_v48 = vpop.permute.xlu0 %112 }
 0x873   :  { %v3954_v47 = vsel %vm178_vm15, 1.0, %v4942_v16  ;;  %vm179_vm0 = vcmp.eq.s32.totalorder %v113_v48, %v5035_v11 }
 0x874   :  { %v267_v7 = vpack.c.bf16 %v3954_v47, %v3953_v31  ;;  %v3955_v43 = vsel %vm179_vm0, 1.0, %v4942_v16 }
 0x875   :  { %v116_v51 = vpop.permute.xlu1 %115 }
 0x876   :  { %vm180_vm1 = vcmp.eq.s32.totalorder %v116_v51, %v5035_v11  ;;  %4220 = vmatprep.mubr.msk.bf16.mxu0 %vm316_vm4, %v267_v7 }
 0x877   :  { %v3956_v52 = vsel %vm180_vm1, 1.0, %v4942_v16 }
 0x878   :  { %v268_v53 = vpack.c.bf16 %v3956_v52, %v3955_v43 }
 0x87a   :  { %4221 = vmatmul.mubr.msk.bf16.gmra.mxu0 %vm316_vm4, %v268_v53 }
 0x8cf   :  { %v1587_v35 = vpop.permute.xlu0 %1586 }
 0x8d0   :  { %4284 = vmatprep.mubr.msk.bf16.mxu1 %vm581_vm9, %v1587_v35 }
 0x8d3   :  { %v1589_v57 = vpop.permute.xlu1 %1588 }
 0x8d4   :  { %4285 = vmatmul.mubr.msk.bf16.vlgmr.msra.gmra.mxu1 %vm581_vm9, %v1589_v57 }
 0x8d5   :  { %4289 = vmatpush3.bf16.msra.mxu1 %v5455_v8 }
 0x8d6   :  { %4294 = vmatprep.subr.bf16.mxu1 %v5461_v25 }
 0x8d7   :  { %v1648_v15 = vpop.permute.xlu0 %1647 }
 0x8d8   :  { %4290 = vmatprep.mubr.msk.bf16.mxu1 %vm581_vm9, %v1648_v15 }
 0x8db   :  { %v1650_v17 = vpop.permute.xlu1 %1649 }
 0x8dc   :  { %4291 = vmatmul.mubr.msk.bf16.vlgmr.msra.gmra.mxu1 %vm581_vm9, %v1650_v17 }
 0x8dd   :  { %4295 = vmatpush3.bf16.msra.mxu1 %v5461_v25  ;;  %4296 = vmatprep.mubr.msk.bf16.mxu1 %vm581_vm9, %v1648_v15 }
 0x8de   :  { %4306 = vmatprep.subr.bf16.mxu1 %v5455_v8 }
 0x8e4   :  { %4297 = vmatmul.mubr.msk.bf16.vlgmr.msra.gmra.mxu1 %vm581_vm9, %v1650_v17 }
 0x8e5   :  { %4307 = vmatpush3.bf16.msra.mxu1 %v5455_v8 }
 0x8e6   :  { %4318 = vmatprep.subr.bf16.mxu1 %v5474_v18 }
 0x93a   :  { %v4222_v14 = vpop.f32.mrf.mxu0 }
 0x93b   :  { %v456_v26 = vadd.f32 %v5480_v24, %v4222_v14 }
 0x93c   :  { %v447_v27 = vpop.f32.mrf.mxu0 }
 0x93d   :  { %540 = vst.msk [vmem:[#allocation2 + $0x70] sm:$0xff] %vm316_vm4, %v456_v26  ;;  %v448_v20 = vadd.f32 %v5480_v24, %v447_v27 }
 0x93e   :  { %v4223_v28 = vpop.f32.mrf.mxu0 }
 0x93f   :  { %538 = vst.msk [vmem:[#allocation2 + $0x60] sm:$0xff] %vm316_vm4, %v448_v20  ;;  %v459_v36 = vadd.f32 %v5480_v24, %v4223_v28 }
 0x940   :  { %v450_v39 = vpop.f32.mrf.mxu0 }
 0x941   :  { %541 = vst.msk [vmem:[#allocation2 + $0x78] sm:$0xff] %vm316_vm4, %v459_v36  ;;  %v451_v23 = vadd.f32 %v5480_v24, %v450_v39 }
 0x943   :  { %539 = vst.msk [vmem:[#allocation2 + $0x68] sm:$0xff] %vm316_vm4, %v451_v23 }
 0x944   :  { %v1848_v47 = vld [vmem:[#allocation2 + $0x70] sm:$0xff] }
 0x946   :  { %v1846_v3 = vld [vmem:[#allocation2 + $0x60] sm:$0xff] }
 0x948   :  { %v1849_v53 = vld [vmem:[#allocation2 + $0x78] sm:$0xff] }
 0x94a   :  { %v1847_v51 = vld [vmem:[#allocation2 + $0x68] sm:$0xff] }
 0x994   :  { %v4286_v44 = vpop.f32.mrf.mxu1 }
 0x996   :  { %v1630_v22 = vpop.f32.mrf.mxu1 }
 0x998   :  { %v4287_v45 = vpop.f32.mrf.mxu1 }
 0x99a   :  { %v1633_v0 = vpop.f32.mrf.mxu1 }
 0x99c   :  { %v4292_v49 = vpop.f32.mrf.mxu1 }
 0x99d   :  { %v1700_v50 = vadd.f32 %v4292_v49, %v4286_v44 }
 0x99e   :  { %v1691_v38 = vpop.f32.mrf.mxu1 }
 0x99f   :  { %v1708_v37 = vadd.f32 %v5156_v13, %v1700_v50  ;;  %v1692_v33 = vadd.f32 %v1691_v38, %v1630_v22 }
 0x9a0   :  { %v4293_v56 = vpop.f32.mrf.mxu1 }
 0x9a1   :  { %4576 = vtanh.f32 %v1708_v37  ;;  %v1706_v12 = vadd.f32 %v5156_v13, %v1692_v33  ;;  %v1703_v58 = vadd.f32 %v4293_v56, %v4287_v45  ;;  %v4034_v20 = vmul.f32 -1.442695, %v1708_v37 }
 0x9a2   :  { %v1694_v60 = vpop.f32.mrf.mxu1 }
 0x9a3   :  { %v1709_v61 = vadd.f32 %v5156_v13, %v1703_v58  ;;  %v1695_v42 = vadd.f32 %v1694_v60, %v1633_v0  ;;  %4578 = vtanh.f32 %v1706_v12  ;;  %v4032_v28 = vmul.f32 -1.442695, %v1706_v12 }
 0x9a4   :  { %v4298_v63 = vpop.f32.mrf.mxu1 }
 0x9a5   :  { %4580 = vtanh.f32 %v1709_v61  ;;  %v1707_v46 = vadd.f32 %v5156_v13, %v1695_v42  ;;  %v1893_v7 = vadd.f32 %v4298_v63, %v1848_v47  ;;  %v4035_v36 = vmul.f32 -1.442695, %v1709_v61 }
 0x9a6   :  { %v1884_v2 = vpop.f32.mrf.mxu1 }
 0x9a7   :  { %v1885_v48 = vadd.f32 %v1884_v2, %v1846_v3  ;;  %4582 = vtanh.f32 %v1707_v46  ;;  %v4033_v39 = vmul.f32 -1.442695, %v1707_v46  ;;  %v4040_v44 = vmul.f32 -1.442695, %v1893_v7 }
 0x9a8   :  { %v4299_v4 = vpop.f32.mrf.mxu1 }
 0x9a9   :  { %4584 = vtanh.f32 %v1885_v48  ;;  %v1896_v35 = vadd.f32 %v4299_v4, %v1849_v53  ;;  %v4038_v23 = vmul.f32 -1.442695, %v1885_v48 }
 0x9aa   :  { %v1887_v31 = vpop.f32.mrf.mxu1  ;;  %4586 = vtanh.f32 %v1893_v7 }
 0x9ab   :  { %v1888_v43 = vadd.f32 %v1887_v31, %v1847_v51  ;;  %v4041_v0 = vmul.f32 -1.442695, %v1896_v35 }
 0x9ad   :  { %4588 = vtanh.f32 %v1888_v43  ;;  %v4039_v22 = vmul.f32 -1.442695, %v1888_v43 }
 0x9ae   :  { %v4577_v52 = vpop.eup %4576  ;;  %4590 = vtanh.f32 %v1896_v35 }
 0x9af   :  { %1750 = vrot.lane.b32.xlu0 %v4577_v52, %s4943_s28  ;;  %4592 = vpow2.f32 %v4034_v20 }
 0x9b0   :  { %v4579_v57 = vpop.eup %4578  ;;  %4594 = vpow2.f32 %v4032_v28 }
 0x9b1   :  { %4596 = vpow2.f32 %v4035_v36 }
 0x9b2   :  { %v4581_v13 = vpop.eup %4580  ;;  %4598 = vpow2.f32 %v4033_v39 }
 0x9b3   :  { %1746 = vrot.lane.b32.xlu0 %v4579_v57, %s4943_s28  ;;  %1752 = vrot.lane.b32.xlu1 %v4581_v13, %s4943_s28  ;;  %4600 = vpow2.f32 %v4038_v23 }
 0x9b4   :  { %v4583_v15 = vpop.eup %4582  ;;  %4602 = vpow2.f32 %v4040_v44 }
 0x9b5   :  { %4604 = vpow2.f32 %v4039_v22 }
 0x9b6   :  { %v4585_v17 = vpop.eup %4584  ;;  %4606 = vpow2.f32 %v4041_v0 }
 0x9b7   :  { %1748 = vrot.lane.b32.xlu1 %v4583_v15, %s4943_s28  ;;  %1935 = vrot.lane.b32.xlu0 %v4585_v17, %s4943_s28  ;;  %v4587_v14 = vpop.eup %4586 }
 0x9ba   :  { %v4589_v26 = vpop.eup %4588 }
 0x9bb   :  { %1937 = vrot.lane.b32.xlu1 %v4589_v26, %s4943_s28  ;;  %1939 = vrot.lane.b32.xlu0 %v4587_v14, %s4943_s28  ;;  %v4591_v27 = vpop.eup %4590 }
 0x9bc   :  { %v4593_v45 = vpop.eup %4592 }
 0x9bd   :  { %v1724_v49 = vadd.f32 1.0, %v4593_v45  ;;  %v4595_v50 = vpop.eup %4594 }
 0x9be   :  { %v4597_v38 = vpop.eup %4596  ;;  %v1722_v37 = vadd.f32 1.0, %v4595_v50 }
 0x9bf   :  { %1941 = vrot.lane.b32.xlu1 %v4591_v27, %s4943_s28  ;;  %4608 = vrcp.f32 %v1724_v49  ;;  %v1725_v33 = vadd.f32 1.0, %v4597_v38  ;;  %v4599_v56 = vpop.eup %4598 }
 0x9c0   :  { %4610 = vrcp.f32 %v1722_v37  ;;  %v4601_v12 = vpop.eup %4600  ;;  %v1723_v58 = vadd.f32 1.0, %v4599_v56 }
 0x9c1   :  { %4612 = vrcp.f32 %v1725_v33  ;;  %v4603_v60 = vpop.eup %4602  ;;  %v1911_v61 = vadd.f32 1.0, %v4601_v12 }
 0x9c2   :  { %v4605_v42 = vpop.eup %4604  ;;  %4614 = vrcp.f32 %v1723_v58  ;;  %v1913_v63 = vadd.f32 1.0, %v4603_v60 }
 0x9c3   :  { %v4607_v46 = vpop.eup %4606  ;;  %4616 = vrcp.f32 %v1911_v61  ;;  %v1912_v2 = vadd.f32 1.0, %v4605_v42 }
 0x9c4   :  { %4618 = vrcp.f32 %v1913_v63  ;;  %v1914_v31 = vadd.f32 1.0, %v4607_v46 }
 0x9c5   :  { %4620 = vrcp.f32 %v1912_v2 }
 0x9c6   :  { %4622 = vrcp.f32 %v1914_v31 }
 0x9cc   :  { %v5502_v3 = vpop.eup %4608 }
 0x9cd   :  { %v5506_v47 = vpop.eup %4610  ;;  %v1740_v45 = vmul.f32 %v5502_v3, %v5367_v5 }
 0x9ce   :  { %v5508_v51 = vpop.eup %4612  ;;  %v1738_v50 = vmul.f32 %v5506_v47, %v5358_v62 }
 0x9cf   :  { %v5514_v35 = vpop.eup %4614  ;;  %v1741_v38 = vmul.f32 %v5508_v51, %v5375_v6 }
 0x9d0   :  { %v5517_v15 = vpop.eup %4616  ;;  %v1739_v5 = vmul.f32 %v5514_v35, %v5365_v21 }
 0x9d1   :  { %v5521_v26 = vpop.eup %4618  ;;  %v1927_v62 = vmul.f32 %v5517_v15, %v5377_v34 }
 0x9d2   :  { %v5524_v27 = vpop.eup %4620  ;;  %v1929_v63 = vmul.f32 %v5521_v26, %v5387_v59 }
 0x9d3   :  { %v5530_v23 = vpop.eup %4622  ;;  %v1928_v42 = vmul.f32 %v5524_v27, %v5385_v9 }
 0x9d4   :  { %v1930_v34 = vmul.f32 %v5530_v23, %v5394_v1 }
 0xa21   :  { %v1751_v4 = vpop.permute.xlu0 %1750 }
 0xa22   :  { %v1760_v48 = vmul.f32 %v5502_v3, %v1751_v4 }
 0xa24   :  { %1770 = vrot.lane.b32.xlu0 %v1760_v48, %s4944_s29 }
 0xa25   :  { %v1747_v7 = vpop.permute.xlu0 %1746  ;;  %v1753_v43 = vpop.permute.xlu1 %1752 }
 0xa26   :  { %v1758_v52 = vmul.f32 %v5506_v47, %v1747_v7  ;;  %v1761_v53 = vmul.f32 %v5508_v51, %v1753_v43 }
 0xa28   :  { %1766 = vrot.lane.b32.xlu0 %v1758_v52, %s4944_s29  ;;  %1772 = vrot.lane.b32.xlu1 %v1761_v53, %s4944_s29 }
 0xa29   :  { %v1749_v57 = vpop.permute.xlu1 %1748  ;;  %v1936_v17 = vpop.permute.xlu0 %1935 }
 0xa2a   :  { %v1759_v13 = vmul.f32 %v5514_v35, %v1749_v57  ;;  %v1947_v14 = vmul.f32 %v5517_v15, %v1936_v17  ;;  %v51_v57 = vld [vmem:[%s6444_s0 + $0x80] sm:$0xff]  ;;  %v52_v17 = vld [vmem:[%s6444_s0 + $0x88] sm:$0xff] }
 0xa2c   :  { %1768 = vrot.lane.b32.xlu1 %v1759_v13, %s4944_s29  ;;  %1955 = vrot.lane.b32.xlu0 %v1947_v14, %s4944_s29  ;;  %v53_v14 = vld [vmem:[%s6444_s0 + $0x90] sm:$0xff] }
 0xa2d   :  { %v1938_v20 = vpop.permute.xlu1 %1937  ;;  %v1940_v28 = vpop.permute.xlu0 %1939 }
 0xa2e   :  { %v1948_v36 = vmul.f32 %v5524_v27, %v1938_v20  ;;  %v1949_v39 = vmul.f32 %v5521_v26, %v1940_v28  ;;  %v54_v20 = vld [vmem:[%s6444_s0 + $0x98] sm:$0xff]  ;;  %v55_v28 = vld [vmem:[%s6444_s0 + $0xa0] sm:$0xff] }
 0xa30   :  { %1957 = vrot.lane.b32.xlu1 %v1948_v36, %s4944_s29  ;;  %1959 = vrot.lane.b32.xlu0 %v1949_v39, %s4944_s29  ;;  %v56_v36 = vld [vmem:[%s6444_s0 + $0xa8] sm:$0xff]  ;;  %v57_v39 = vld [vmem:[%s6444_s0 + $0xb0] sm:$0xff] }
 0xa31   :  { %v1942_v44 = vpop.permute.xlu1 %1941 }
 0xa32   :  { %v1950_v22 = vmul.f32 %v5530_v23, %v1942_v44  ;;  %v58_v44 = vld [vmem:[%s6444_s0 + $0xb8] sm:$0xff] }
 0xa34   :  { %1961 = vrot.lane.b32.xlu1 %v1950_v22, %s4944_s29  ;;  %v59_v22 = vld [vmem:[%s6444_s0 + $0xc0] sm:$0xff] }
 0xa96   :  { %v1771_v0 = vpop.permute.xlu0 %1770 }
 0xa97   :  { %v5536_v49 = vadd.f32 %v1771_v0, %v1740_v45  ;;  %v60_v45 = vld [vmem:[%s6444_s0 + $0xc8] sm:$0xff]  ;;  %v61_v0 = vld [vmem:[%s6444_s0 + $0xd0] sm:$0xff] }
 0xa99   :  { %4624 = vtanh.f32 %v5536_v49 }
 0xa9a   :  { %v1767_v37 = vpop.permute.xlu0 %1766  ;;  %v1773_v33 = vpop.permute.xlu1 %1772 }
 0xa9b   :  { %v5543_v56 = vadd.f32 %v1767_v37, %v1738_v50  ;;  %v5545_v12 = vadd.f32 %v1773_v33, %v1741_v38  ;;  %v62_v50 = vld [vmem:[%s6444_s0 + $0xd8] sm:$0xff]  ;;  %v63_v38 = vld [vmem:[%s6444_s0 + $0xe0] sm:$0xff]  ;;  %v64_v37 = vld [vmem:[%s6444_s0 + $0xe8] sm:$0xff] }
 0xa9c   :  { %v65_v33 = vld [vmem:[%s6444_s0 + $0xf0] sm:$0xff] }
 0xa9d   :  { %4626 = vtanh.f32 %v5543_v56 }
 0xa9e   :  { %4628 = vtanh.f32 %v5545_v12  ;;  %v1769_v58 = vpop.permute.xlu1 %1768  ;;  %v1956_v6 = vpop.permute.xlu0 %1955 }
 0xa9f   :  { %v5551_v60 = vadd.f32 %v1769_v58, %v1739_v5  ;;  %v5556_v61 = vadd.f32 %v1956_v6, %v1927_v62  ;;  %v66_v5 = vld [vmem:[%s6444_s0 + $0xf8] sm:$0xff] }
 0xaa1   :  { %4630 = vtanh.f32 %v5551_v60 }
 0xaa2   :  { %4632 = vtanh.f32 %v5556_v61  ;;  %v1958_v46 = vpop.permute.xlu1 %1957  ;;  %v1960_v2 = vpop.permute.xlu0 %1959 }
 0xaa3   :  { %v5563_v4 = vadd.f32 %v1958_v46, %v1928_v42  ;;  %v5565_v48 = vadd.f32 %v1960_v2, %v1929_v63 }
 0xaa5   :  { %4634 = vtanh.f32 %v5563_v4 }
 0xaa6   :  { %v4625_v21 = vpop.eup %4624  ;;  %4636 = vtanh.f32 %v5565_v48  ;;  %v1962_v9 = vpop.permute.xlu1 %1961 }
 0xaa7   :  { %1794 = vrot.lane.b32.xlu0 %v4625_v21, %s4945_s30  ;;  %v5572_v59 = vadd.f32 %v1962_v9, %v1930_v34 }
 0xaa9   :  { %4638 = vtanh.f32 %v5572_v59 }
 0xaaa   :  { %v4627_v31 = vpop.eup %4626 }
 0xaab   :  { %v4629_v7 = vpop.eup %4628  ;;  %1790 = vrot.lane.b32.xlu0 %v4627_v31, %s4945_s30 }
 0xaac   :  { %1796 = vrot.lane.b32.xlu1 %v4629_v7, %s4945_s30 }
 0xaae   :  { %v4631_v43 = vpop.eup %4630 }
 0xaaf   :  { %v4633_v52 = vpop.eup %4632 }
 0xab0   :  { %1792 = vrot.lane.b32.xlu1 %v4631_v43, %s4945_s30  ;;  %1979 = vrot.lane.b32.xlu0 %v4633_v52, %s4945_s30 }
 0xab2   :  { %v4635_v1 = vpop.eup %4634 }
 0xab3   :  { %v4637_v53 = vpop.eup %4636 }
 0xab4   :  { %1981 = vrot.lane.b32.xlu1 %v4635_v1, %s4945_s30  ;;  %1983 = vrot.lane.b32.xlu0 %v4637_v53, %s4945_s30 }
 0xab6   :  { %v4639_v13 = vpop.eup %4638 }
 0xab8   :  { %1985 = vrot.lane.b32.xlu1 %v4639_v13, %s4945_s30  ;;  %118 = vperm.xlu0 %4407, %v51_v57  }
 0xabc   :  { %121 = vperm.xlu1 %4408, %v52_v17   ;;  %124 = vperm.xlu0 %4407, %v53_v14  }
 0xac0   :  { %127 = vperm.xlu1 %4408, %v54_v20   ;;  %130 = vperm.xlu0 %4407, %v55_v28  }
 0xac4   :  { %133 = vperm.xlu1 %4408, %v56_v36   ;;  %136 = vperm.xlu0 %4407, %v57_v39  }
 0xac8   :  { %139 = vperm.xlu1 %4408, %v58_v44   ;;  %142 = vperm.xlu0 %4407, %v59_v22  }
 0xacc   :  { %145 = vperm.xlu1 %4408, %v60_v45   ;;  %148 = vperm.xlu0 %4407, %v61_v0  }
 0xad0   :  { %151 = vperm.xlu1 %4408, %v62_v50   ;;  %154 = vperm.xlu0 %4407, %v63_v38  }
 0xad4   :  { %157 = vperm.xlu1 %4408, %v64_v37   ;;  %160 = vperm.xlu0 %4407, %v65_v33  }
 0xad8   :  { %163 = vperm.xlu1 %4408, %v66_v5  }
 0xb19   :  { %v1795_v58 = vpop.permute.xlu0 %1794 }
 0xb1a   :  { %v5642_v31 = vmul.f32 %v5502_v3, %v1795_v58 }
 0xb1d   :  { %v1791_v6 = vpop.permute.xlu0 %1790 }
 0xb1e   :  { %v1797_v62 = vpop.permute.xlu1 %1796  ;;  %v5631_v63 = vmul.f32 %v5506_v47, %v1791_v6 }
 0xb1f   :  { %v5637_v46 = vmul.f32 %v5508_v51, %v1797_v62 }
 0xb21   :  { %v1998_v9 = vpack.c.bf16 %v5637_v46, %v5642_v31 }
 0xb22   :  { %v1793_v42 = vpop.permute.xlu1 %1792  ;;  %v1980_v34 = vpop.permute.xlu0 %1979 }
 0xb23   :  { %v5634_v21 = vmul.f32 %v5514_v35, %v1793_v42  ;;  %v1991_v7 = vmul.f32 %v5517_v15, %v1980_v34 }
 0xb25   :  { %v1997_v2 = vpack.c.bf16 %v5634_v21, %v5631_v63 }
 0xb26   :  { %v1982_v47 = vpop.permute.xlu1 %1981  ;;  %v1984_v43 = vpop.permute.xlu0 %1983 }
 0xb27   :  { %2001 = vrot.lane.b32.xlu0 %v1997_v2, %s4946_s22  ;;  %v1992_v35 = vmul.f32 %v5524_v27, %v1982_v47  ;;  %v1993_v1 = vmul.f32 %v5521_v26, %v1984_v43 }
 0xb29   :  { %v1995_v51 = vpack.c.bf16 %v1992_v35, %v1991_v7 }
 0xb2a   :  { %v1986_v52 = vpop.permute.xlu1 %1985 }
 0xb2b   :  { %2003 = vrot.lane.b32.xlu0 %v1998_v9, %s4946_s22  ;;  %v1994_v3 = vmul.f32 %v5530_v23, %v1986_v52  ;;  %2062 = vrot.lane.b32.xlu1 %v1995_v51, %s4946_s22 }
 0xb2d   :  { %v1996_v53 = vpack.c.bf16 %v1994_v3, %v1993_v1 }
 0xb2f   :  { %2064 = vrot.lane.b32.xlu1 %v1996_v53, %s4946_s22 }
 0xb33   :  { %v119_v57 = vpop.permute.xlu0 %118 }
 0xb34   :  { %vm181_vm2 = vcmp.eq.s32.totalorder %v119_v57, %v5035_v11 }
 0xb35   :  { %v3957_v13 = vsel %vm181_vm2, 1.0, %v4942_v16 }
 0xb37   :  { %v122_v15 = vpop.permute.xlu1 %121  ;;  %v125_v27 = vpop.permute.xlu0 %124 }
 0xb38   :  { %vm182_vm3 = vcmp.eq.s32.totalorder %v122_v15, %v5035_v11  ;;  %vm183_vm5 = vcmp.eq.s32.totalorder %v125_v27, %v5035_v11 }
 0xb39   :  { %v3958_v17 = vsel %vm182_vm3, 1.0, %v4942_v16  ;;  %v3959_v20 = vsel %vm183_vm5, 1.0, %v4942_v16 }
 0xb3a   :  { %v269_v14 = vpack.c.bf16 %v3958_v17, %v3957_v13 }
 0xb3b   :  { %v128_v26 = vpop.permute.xlu1 %127  ;;  %v131_v23 = vpop.permute.xlu0 %130 }
 0xb3c   :  { %vm184_vm6 = vcmp.eq.s32.totalorder %v128_v26, %v5035_v11  ;;  %4224 = vmatprep.mubr.msk.bf16.mxu0 %vm316_vm4, %v269_v14  ;;  %vm185_vm7 = vcmp.eq.s32.totalorder %v131_v23, %v5035_v11 }
 0xb3d   :  { %v3960_v28 = vsel %vm184_vm6, 1.0, %v4942_v16  ;;  %v3961_v22 = vsel %vm185_vm7, 1.0, %v4942_v16 }
 0xb3e   :  { %v270_v36 = vpack.c.bf16 %v3960_v28, %v3959_v20 }
 0xb3f   :  { %v134_v39 = vpop.permute.xlu1 %133  ;;  %v137_v44 = vpop.permute.xlu0 %136 }
 0xb40   :  { %vm186_vm8 = vcmp.eq.s32.totalorder %v134_v39, %v5035_v11  ;;  %4225 = vmatmul.mubr.msk.bf16.gmra.mxu0 %vm316_vm4, %v270_v36  ;;  %vm187_vm10 = vcmp.eq.s32.totalorder %v137_v44, %v5035_v11 }
 0xb41   :  { %v3962_v45 = vsel %vm186_vm8, 1.0, %v4942_v16  ;;  %v3963_v37 = vsel %vm187_vm10, 1.0, %v4942_v16 }
 0xb42   :  { %v271_v0 = vpack.c.bf16 %v3962_v45, %v3961_v22 }
 0xb43   :  { %v140_v50 = vpop.permute.xlu1 %139  ;;  %v143_v38 = vpop.permute.xlu0 %142 }
 0xb44   :  { %vm188_vm11 = vcmp.eq.s32.totalorder %v140_v50, %v5035_v11  ;;  %4228 = vmatprep.mubr.msk.bf16.mxu0 %vm316_vm4, %v271_v0  ;;  %vm189_vm12 = vcmp.eq.s32.totalorder %v143_v38, %v5035_v11 }
 0xb45   :  { %v3964_v33 = vsel %vm188_vm11, 1.0, %v4942_v16  ;;  %v3965_v6 = vsel %vm189_vm12, 1.0, %v4942_v16  ;;  %vm3935_vm12 = vcmask 7168  }
 0xb46   :  { %v272_v5 = vpack.c.bf16 %v3964_v33, %v3963_v37 }
 0xb47   :  { %v146_v58 = vpop.permute.xlu1 %145  ;;  %v149_v62 = vpop.permute.xlu0 %148 }
 0xb48   :  { %vm190_vm13 = vcmp.eq.s32.totalorder %v146_v58, %v5035_v11  ;;  %4229 = vmatmul.mubr.msk.bf16.gmra.mxu0 %vm316_vm4, %v272_v5  ;;  %vm191_vm14 = vcmp.eq.s32.totalorder %v149_v62, %v5035_v11 }
 0xb49   :  { %v3966_v42 = vsel %vm190_vm13, 1.0, %v4942_v16  ;;  %v3967_v47 = vsel %vm191_vm14, 1.0, %v4942_v16 }
 0xb4a   :  { %v273_v2 = vpack.c.bf16 %v3966_v42, %v3965_v6 }
 0xb4b   :  { %v152_v34 = vpop.permute.xlu1 %151  ;;  %v155_v9 = vpop.permute.xlu0 %154 }
 0xb4c   :  { %vm192_vm15 = vcmp.eq.s32.totalorder %v152_v34, %v5035_v11  ;;  %4232 = vmatprep.mubr.msk.bf16.mxu0 %vm316_vm4, %v273_v2  ;;  %vm193_vm0 = vcmp.eq.s32.totalorder %v155_v9, %v5035_v11 }
 0xb4d   :  { %v3968_v7 = vsel %vm192_vm15, 1.0, %v4942_v16  ;;  %v3969_v52 = vsel %vm193_vm0, 1.0, %v4942_v16 }
 0xb4e   :  { %v274_v35 = vpack.c.bf16 %v3968_v7, %v3967_v47 }
 0xb4f   :  { %v158_v43 = vpop.permute.xlu1 %157  ;;  %v161_v51 = vpop.permute.xlu0 %160 }
 0xb50   :  { %vm194_vm1 = vcmp.eq.s32.totalorder %v158_v43, %v5035_v11  ;;  %4233 = vmatmul.mubr.msk.bf16.gmra.mxu0 %vm316_vm4, %v274_v35  ;;  %vm195_vm2 = vcmp.eq.s32.totalorder %v161_v51, %v5035_v11 }
 0xb51   :  { %v3970_v1 = vsel %vm194_vm1, 1.0, %v4942_v16  ;;  %v3971_v57 = vsel %vm195_vm2, 1.0, %v4942_v16 }
 0xb52   :  { %v275_v3 = vpack.c.bf16 %v3970_v1, %v3969_v52 }
 0xb53   :  { %v164_v53 = vpop.permute.xlu1 %163 }
 0xb54   :  { %vm196_vm3 = vcmp.eq.s32.totalorder %v164_v53, %v5035_v11  ;;  %4236 = vmatprep.mubr.msk.bf16.mxu0 %vm316_vm4, %v275_v3 }
 0xb55   :  { %v3972_v15 = vsel %vm196_vm3, 1.0, %v4942_v16 }
 0xb56   :  { %v276_v27 = vpack.c.bf16 %v3972_v15, %v3971_v57 }
 0xb58   :  { %4237 = vmatmul.mubr.msk.bf16.gmra.mxu0 %vm316_vm4, %v276_v27 }
 0xb99   :  { %v2002_v13 = vpop.permute.xlu0 %2001 }
 0xb9a   :  { %4302 = vmatprep.mubr.msk.bf16.mxu0 %vm581_vm9, %v2002_v13 }
 0xb9d   :  { %v2004_v17 = vpop.permute.xlu0 %2003  ;;  %v2063_v14 = vpop.permute.xlu1 %2062 }
 0xb9e   :  { %4303 = vmatmul.mubr.msk.bf16.vlgmr.msra.gmra.mxu0 %vm581_vm9, %v2004_v17  ;;  %4308 = vmatprep.mubr.msk.bf16.mxu1 %vm581_vm9, %v2063_v14 }
 0xb9f   :  { %4313 = vmatpush3.bf16.msra.mxu0 %v5461_v25  ;;  %4314 = vmatprep.mubr.msk.bf16.mxu0 %vm581_vm9, %v2063_v14  ;;  %v5741_v14 = vld [vmem:[%s6450_s6] ss:$0 sm:$0xff] }
 0xba0   :  { %4324 = vmatprep.subr.bf16.mxu0 %v5455_v8 }
 0xba1   :  { %v2065_v11 = vpop.permute.xlu1 %2064 }
 0xba2   :  { %4309 = vmatmul.mubr.msk.bf16.vlgmr.msra.gmra.mxu1 %vm581_vm9, %v2065_v11 }
 0xba3   :  { %4319 = vmatpush3.bf16.msra.mxu1 %v5474_v18 }
 0xba4   :  { %4330 = vmatprep.subr.bf16.mxu1 %v5461_v25 }
 0xba6   :  { %4315 = vmatmul.mubr.msk.bf16.vlgmr.msra.gmra.mxu0 %vm581_vm9, %v2065_v11 }
 0xba7   :  { %4325 = vmatpush3.bf16.msra.mxu0 %v5455_v8 }
 0xba8   :  { %4336 = vmatprep.subr.bf16.mxu0 %v5474_v18 }
 0xc00   :  { %v4226_v16 = vpop.f32.mrf.mxu0 }
 0xc01   :  { %v472_v26 = vadd.f32 %v5480_v24, %v4226_v16 }
 0xc02   :  { %v463_v23 = vpop.f32.mrf.mxu0 }
 0xc03   :  { %544 = vst.msk [vmem:[#allocation2 + $0x90] sm:$0xff] %vm316_vm4, %v472_v26  ;;  %v464_v20 = vadd.f32 %v5480_v24, %v463_v23 }
 0xc04   :  { %v4227_v28 = vpop.f32.mrf.mxu0 }
 0xc05   :  { %542 = vst.msk [vmem:[#allocation2 + $0x80] sm:$0xff] %vm316_vm4, %v464_v20  ;;  %v475_v36 = vadd.f32 %v5480_v24, %v4227_v28 }
 0xc06   :  { %v466_v39 = vpop.f32.mrf.mxu0 }
 0xc07   :  { %545 = vst.msk [vmem:[#allocation2 + $0x98] sm:$0xff] %vm316_vm4, %v475_v36  ;;  %v467_v8 = vadd.f32 %v5480_v24, %v466_v39 }
 0xc08   :  { %v4230_v25 = vpop.f32.mrf.mxu0 }
 0xc09   :  { %543 = vst.msk [vmem:[#allocation2 + $0x88] sm:$0xff] %vm316_vm4, %v467_v8  ;;  %v488_v18 = vadd.f32 %v5480_v24, %v4230_v25 }
 0xc0a   :  { %v479_v44 = vpop.f32.mrf.mxu0 }
 0xc0b   :  { %548 = vst.msk [vmem:[#allocation2 + $0xb0] sm:$0xff] %vm316_vm4, %v488_v18  ;;  %v480_v22 = vadd.f32 %v5480_v24, %v479_v44 }
 0xc0c   :  { %v4231_v45 = vpop.f32.mrf.mxu0  ;;  %v2261_v18 = vld [vmem:[#allocation2 + $0x80] sm:$0xff] }
 0xc0d   :  { %546 = vst.msk [vmem:[#allocation2 + $0xa0] sm:$0xff] %vm316_vm4, %v480_v22  ;;  %v491_v0 = vadd.f32 %v5480_v24, %v4231_v45  ;;  %v2263_v45 = vld [vmem:[#allocation2 + $0x90] sm:$0xff] }
 0xc0e   :  { %v482_v50 = vpop.f32.mrf.mxu0 }
 0xc0f   :  { %549 = vst.msk [vmem:[#allocation2 + $0xb8] sm:$0xff] %vm316_vm4, %v491_v0  ;;  %v483_v38 = vadd.f32 %v5480_v24, %v482_v50 }
 0xc10   :  { %v4234_v37 = vpop.f32.mrf.mxu0  ;;  %v2262_v50 = vld [vmem:[#allocation2 + $0x88] sm:$0xff] }
 0xc11   :  { %547 = vst.msk [vmem:[#allocation2 + $0xa8] sm:$0xff] %vm316_vm4, %v483_v38  ;;  %v504_v33 = vadd.f32 %v5480_v24, %v4234_v37 }
 0xc12   :  { %v495_v5 = vpop.f32.mrf.mxu0 }
 0xc13   :  { %552 = vst.msk [vmem:[#allocation2 + $0xd0] sm:$0xff] %vm316_vm4, %v504_v33  ;;  %v496_v58 = vadd.f32 %v5480_v24, %v495_v5  ;;  %v2264_v33 = vld [vmem:[#allocation2 + $0x98] sm:$0xff] }
 0xc14   :  { %v4235_v62 = vpop.f32.mrf.mxu0 }
 0xc15   :  { %550 = vst.msk [vmem:[#allocation2 + $0xc0] sm:$0xff] %vm316_vm4, %v496_v58  ;;  %v507_v6 = vadd.f32 %v5480_v24, %v4235_v62 }
 0xc16   :  { %v498_v42 = vpop.f32.mrf.mxu0 }
 0xc17   :  { %553 = vst.msk [vmem:[#allocation2 + $0xd8] sm:$0xff] %vm316_vm4, %v507_v6  ;;  %v499_v2 = vadd.f32 %v5480_v24, %v498_v42 }
 0xc18   :  { %v4238_v34 = vpop.f32.mrf.mxu0 }
 0xc19   :  { %551 = vst.msk [vmem:[#allocation2 + $0xc8] sm:$0xff] %vm316_vm4, %v499_v2  ;;  %v520_v9 = vadd.f32 %v5480_v24, %v4238_v34 }
 0xc1a   :  { %v511_v47 = vpop.f32.mrf.mxu0 }
 0xc1b   :  { %556 = vst.msk [vmem:[#allocation2 + $0xf0] sm:$0xff] %vm316_vm4, %v520_v9  ;;  %v512_v7 = vadd.f32 %v5480_v24, %v511_v47 }
 0xc1c   :  { %v4239_v35 = vpop.f32.mrf.mxu0 }
 0xc1d   :  { %554 = vst.msk [vmem:[#allocation2 + $0xe0] sm:$0xff] %vm316_vm4, %v512_v7  ;;  %v523_v43 = vadd.f32 %v5480_v24, %v4239_v35 }
 0xc1e   :  { %v514_v51 = vpop.f32.mrf.mxu0 }
 0xc1f   :  { %557 = vst.msk [vmem:[#allocation2 + $0xf8] sm:$0xff] %vm316_vm4, %v523_v43  ;;  %v515_v52 = vadd.f32 %v5480_v24, %v514_v51 }
 0xc21   :  { %555 = vst.msk [vmem:[#allocation2 + $0xe8] sm:$0xff] %vm316_vm4, %v515_v52 }
 0xc5e   :  { %v4304_v1 = vpop.f32.mrf.mxu0 }
 0xc60   :  { %v2045_v3 = vpop.f32.mrf.mxu0 }
 0xc62   :  { %v4305_v53 = vpop.f32.mrf.mxu0  ;;  %v4310_v15 = vpop.f32.mrf.mxu1 }
 0xc63   :  { %v2115_v27 = vadd.f32 %v4310_v15, %v4304_v1 }
 0xc64   :  { %v2048_v57 = vpop.f32.mrf.mxu0  ;;  %v2106_v17 = vpop.f32.mrf.mxu1 }
 0xc65   :  { %v2123_v11 = vadd.f32 %v5741_v14, %v2115_v27  ;;  %v2107_v16 = vadd.f32 %v2106_v17, %v2045_v3 }
 0xc66   :  { %v4316_v13 = vpop.f32.mrf.mxu0  ;;  %v4311_v26 = vpop.f32.mrf.mxu1 }
 0xc67   :  { %4640 = vtanh.f32 %v2123_v11  ;;  %v2121_v23 = vadd.f32 %v5741_v14, %v2107_v16  ;;  %v2118_v20 = vadd.f32 %v4311_v26, %v4305_v53  ;;  %v2308_v0 = vadd.f32 %v4316_v13, %v2263_v45 }
 0xc68   :  { %v2299_v24 = vpop.f32.mrf.mxu0  ;;  %v2109_v28 = vpop.f32.mrf.mxu1  ;;  %v4048_v47 = vmul.f32 -1.442695, %v2123_v11 }
 0xc69   :  { %v2124_v36 = vadd.f32 %v5741_v14, %v2118_v20  ;;  %v2110_v39 = vadd.f32 %v2109_v28, %v2048_v57  ;;  %4642 = vtanh.f32 %v2121_v23  ;;  %v2300_v44 = vadd.f32 %v2299_v24, %v2261_v18 }
 0xc6a   :  { %v4317_v8 = vpop.f32.mrf.mxu0  ;;  %v4046_v7 = vmul.f32 -1.442695, %v2121_v23  ;;  %v4054_v52 = vmul.f32 -1.442695, %v2308_v0 }
 0xc6b   :  { %4644 = vtanh.f32 %v2124_v36  ;;  %v2122_v25 = vadd.f32 %v5741_v14, %v2110_v39  ;;  %v2311_v5 = vadd.f32 %v4317_v8, %v2264_v33  ;;  %v4049_v35 = vmul.f32 -1.442695, %v2124_v36 }
 0xc6c   :  { %v2302_v22 = vpop.f32.mrf.mxu0  ;;  %v4052_v51 = vmul.f32 -1.442695, %v2300_v44 }
 0xc6d   :  { %4646 = vtanh.f32 %v2122_v25  ;;  %v2303_v38 = vadd.f32 %v2302_v22, %v2262_v50  ;;  %v4047_v43 = vmul.f32 -1.442695, %v2122_v25  ;;  %v4055_v53 = vmul.f32 -1.442695, %v2311_v5 }
 0xc6e   :  { %4648 = vtanh.f32 %v2300_v44 }
 0xc6f   :  { %4650 = vtanh.f32 %v2308_v0  ;;  %v4053_v1 = vmul.f32 -1.442695, %v2303_v38 }
 0xc70   :  { %4652 = vtanh.f32 %v2303_v38 }
 0xc71   :  { %4654 = vtanh.f32 %v2311_v5 }
 0xc72   :  { %4656 = vpow2.f32 %v4048_v47 }
 0xc73   :  { %4658 = vpow2.f32 %v4046_v7 }
 0xc74   :  { %v4641_v37 = vpop.eup %4640  ;;  %4660 = vpow2.f32 %v4049_v35 }
 0xc75   :  { %2165 = vrot.lane.b32.xlu0 %v4641_v37, %s4943_s28  ;;  %4662 = vpow2.f32 %v4047_v43 }
 0xc76   :  { %v4643_v58 = vpop.eup %4642  ;;  %4664 = vpow2.f32 %v4052_v51 }
 0xc77   :  { %4666 = vpow2.f32 %v4054_v52 }
 0xc78   :  { %v4645_v62 = vpop.eup %4644  ;;  %4668 = vpow2.f32 %v4053_v1 }
 0xc79   :  { %2161 = vrot.lane.b32.xlu0 %v4643_v58, %s4943_s28  ;;  %2167 = vrot.lane.b32.xlu1 %v4645_v62, %s4943_s28  ;;  %4670 = vpow2.f32 %v4055_v53 }
 0xc7a   :  { %v4647_v6 = vpop.eup %4646 }
 0xc7b   :  { %v4649_v42 = vpop.eup %4648 }
 0xc7c   :  { %v4651_v2 = vpop.eup %4650 }
 0xc7d   :  { %2163 = vrot.lane.b32.xlu1 %v4647_v6, %s4943_s28  ;;  %2350 = vrot.lane.b32.xlu0 %v4649_v42, %s4943_s28  ;;  %v4653_v34 = vpop.eup %4652 }
 0xc7e   :  { %v4655_v9 = vpop.eup %4654 }
 0xc7f   :  { %v4657_v3 = vpop.eup %4656 }
 0xc80   :  { %v2139_v57 = vadd.f32 1.0, %v4657_v3  ;;  %v4659_v15 = vpop.eup %4658 }
 0xc81   :  { %2354 = vrot.lane.b32.xlu0 %v4651_v2, %s4943_s28  ;;  %2352 = vrot.lane.b32.xlu1 %v4653_v34, %s4943_s28  ;;  %v4661_v27 = vpop.eup %4660  ;;  %v2137_v13 = vadd.f32 1.0, %v4659_v15 }
 0xc82   :  { %4672 = vrcp.f32 %v2139_v57  ;;  %v2140_v17 = vadd.f32 1.0, %v4661_v27  ;;  %v4663_v11 = vpop.eup %4662 }
 0xc83   :  { %v4665_v16 = vpop.eup %4664  ;;  %4674 = vrcp.f32 %v2137_v13  ;;  %v2138_v26 = vadd.f32 1.0, %v4663_v11 }
 0xc84   :  { %4676 = vrcp.f32 %v2140_v17  ;;  %v4667_v24 = vpop.eup %4666  ;;  %v2326_v23 = vadd.f32 1.0, %v4665_v16 }
 0xc85   :  { %2356 = vrot.lane.b32.xlu1 %v4655_v9, %s4943_s28  ;;  %v4669_v20 = vpop.eup %4668  ;;  %v2328_v28 = vadd.f32 1.0, %v4667_v24  ;;  %4678 = vrcp.f32 %v2138_v26 }
 0xc86   :  { %4680 = vrcp.f32 %v2326_v23  ;;  %v2327_v36 = vadd.f32 1.0, %v4669_v20  ;;  %v4671_v39 = vpop.eup %4670 }
 0xc87   :  { %4682 = vrcp.f32 %v2328_v28  ;;  %v2329_v18 = vadd.f32 1.0, %v4671_v39 }
 0xc88   :  { %4684 = vrcp.f32 %v2327_v36 }
 0xc89   :  { %4686 = vrcp.f32 %v2329_v18 }
 0xc8f   :  { %v5755_v8 = vpop.eup %4672 }
 0xc90   :  { %v5759_v22 = vpop.eup %4674  ;;  %v2155_v1 = vmul.f32 %v5755_v8, %v5536_v49 }
 0xc91   :  { %v5761_v0 = vpop.eup %4676  ;;  %v2153_v57 = vmul.f32 %v5759_v22, %v5543_v56 }
 0xc92   :  { %v5767_v33 = vpop.eup %4678  ;;  %v2156_v27 = vmul.f32 %v5761_v0, %v5545_v12 }
 0xc93   :  { %v5769_v58 = vpop.eup %4680  ;;  %v2154_v49 = vmul.f32 %v5767_v33, %v5551_v60 }
 0xc94   :  { %v5774_v2 = vpop.eup %4682  ;;  %v2342_v16 = vmul.f32 %v5769_v58, %v5556_v61 }
 0xc95   :  { %v5777_v34 = vpop.eup %4684  ;;  %v2344_v23 = vmul.f32 %v5774_v2, %v5565_v48 }
 0xc96   :  { %v5783_v43 = vpop.eup %4686  ;;  %v2343_v20 = vmul.f32 %v5777_v34, %v5563_v4 }
 0xce7   :  { %v2166_v25 = vpop.permute.xlu0 %2165 }
 0xce8   :  { %v2175_v44 = vmul.f32 %v5755_v8, %v2166_v25  ;;  %v2345_v25 = vmul.f32 %v5783_v43, %v5572_v59 }
 0xcea   :  { %2185 = vrot.lane.b32.xlu0 %v2175_v44, %s4944_s29 }
 0xceb   :  { %v2162_v45 = vpop.permute.xlu0 %2161  ;;  %v2168_v38 = vpop.permute.xlu1 %2167 }
 0xcec   :  { %v2173_v50 = vmul.f32 %v5759_v22, %v2162_v45  ;;  %v2176_v37 = vmul.f32 %v5761_v0, %v2168_v38 }
 0xcee   :  { %2181 = vrot.lane.b32.xlu0 %v2173_v50, %s4944_s29  ;;  %2187 = vrot.lane.b32.xlu1 %v2176_v37, %s4944_s29 }
 0xcef   :  { %v2164_v5 = vpop.permute.xlu1 %2163  ;;  %v2351_v62 = vpop.permute.xlu0 %2350 }
 0xcf0   :  { %v2174_v6 = vmul.f32 %v5767_v33, %v2164_v5  ;;  %v2362_v42 = vmul.f32 %v5769_v58, %v2351_v62 }
 0xcf2   :  { %2183 = vrot.lane.b32.xlu1 %v2174_v6, %s4944_s29  ;;  %2370 = vrot.lane.b32.xlu0 %v2362_v42, %s4944_s29 }
 0xcf3   :  { %v2355_v9 = vpop.permute.xlu0 %2354  ;;  %v2353_v47 = vpop.permute.xlu1 %2352 }
 0xcf4   :  { %v2364_v7 = vmul.f32 %v5774_v2, %v2355_v9  ;;  %v2363_v35 = vmul.f32 %v5777_v34, %v2353_v47 }
 0xcf6   :  { %2374 = vrot.lane.b32.xlu0 %v2364_v7, %s4944_s29  ;;  %2372 = vrot.lane.b32.xlu1 %v2363_v35, %s4944_s29 }
 0xcf7   :  { %v2357_v51 = vpop.permute.xlu1 %2356 }
 0xcf8   :  { %v2365_v52 = vmul.f32 %v5783_v43, %v2357_v51 }
 0xcfa   :  { %2376 = vrot.lane.b32.xlu1 %v2365_v52, %s4944_s29 }
 0xd5c   :  { %v2186_v3 = vpop.permute.xlu0 %2185 }
 0xd5d   :  { %v5789_v53 = vadd.f32 %v2186_v3, %v2155_v1 }
 0xd5f   :  { %4688 = vtanh.f32 %v5789_v53 }
 0xd60   :  { %v2182_v15 = vpop.permute.xlu0 %2181  ;;  %v2188_v17 = vpop.permute.xlu1 %2187 }
 0xd61   :  { %v5796_v13 = vadd.f32 %v2182_v15, %v2153_v57  ;;  %v5798_v11 = vadd.f32 %v2188_v17, %v2156_v27 }
 0xd63   :  { %4690 = vtanh.f32 %v5796_v13 }
 0xd64   :  { %4692 = vtanh.f32 %v5798_v11  ;;  %v2184_v56 = vpop.permute.xlu1 %2183  ;;  %v2371_v26 = vpop.permute.xlu0 %2370 }
 0xd65   :  { %v5806_v24 = vadd.f32 %v2184_v56, %v2154_v49  ;;  %v5808_v12 = vadd.f32 %v2371_v26, %v2342_v16  ;;  %v5880_v56 = vld [vmem:[%s6448_s5] sm:$0xff]  }
 0xd67   :  { %4694 = vtanh.f32 %v5806_v24 }
 0xd68   :  { %4696 = vtanh.f32 %v5808_v12  ;;  %v2375_v60 = vpop.permute.xlu0 %2374  ;;  %v2373_v28 = vpop.permute.xlu1 %2372 }
 0xd69   :  { %v5816_v36 = vadd.f32 %v2375_v60, %v2344_v23  ;;  %v5818_v61 = vadd.f32 %v2373_v28, %v2343_v20 }
 0xd6b   :  { %4698 = vtanh.f32 %v5816_v36 }
 0xd6c   :  { %v4689_v39 = vpop.eup %4688  ;;  %4700 = vtanh.f32 %v5818_v61  ;;  %v2377_v48 = vpop.permute.xlu1 %2376 }
 0xd6d   :  { %2209 = vrot.lane.b32.xlu0 %v4689_v39, %s4945_s30  ;;  %v5825_v18 = vadd.f32 %v2377_v48, %v2345_v25 }
 0xd6f   :  { %4702 = vtanh.f32 %v5825_v18 }
 0xd70   :  { %v4691_v4 = vpop.eup %4690 }
 0xd71   :  { %v4693_v44 = vpop.eup %4692  ;;  %2205 = vrot.lane.b32.xlu0 %v4691_v4, %s4945_s30 }
 0xd72   :  { %2211 = vrot.lane.b32.xlu1 %v4693_v44, %s4945_s30 }
 0xd74   :  { %v4695_v45 = vpop.eup %4694 }
 0xd75   :  { %v4697_v50 = vpop.eup %4696 }
 0xd76   :  { %2207 = vrot.lane.b32.xlu1 %v4695_v45, %s4945_s30  ;;  %2394 = vrot.lane.b32.xlu0 %v4697_v50, %s4945_s30 }
 0xd78   :  { %v4699_v59 = vpop.eup %4698 }
 0xd79   :  { %v4701_v38 = vpop.eup %4700 }
 0xd7a   :  { %2398 = vrot.lane.b32.xlu0 %v4699_v59, %s4945_s30  ;;  %2396 = vrot.lane.b32.xlu1 %v4701_v38, %s4945_s30 }
 0xd7c   :  { %v4703_v37 = vpop.eup %4702 }
 0xd7e   :  { %2400 = vrot.lane.b32.xlu1 %v4703_v37, %s4945_s30 }
 0xddf   :  { %v2210_v5 = vpop.permute.xlu0 %2209 }
 0xde0   :  { %v5836_v42 = vmul.f32 %v5755_v8, %v2210_v5  ;;  %v2676_v5 = vld [vmem:[#allocation2 + $0xa0] sm:$0xff] }
 0xde3   :  { %v2206_v62 = vpop.permute.xlu0 %2205 }
 0xde4   :  { %v2212_v6 = vpop.permute.xlu1 %2211  ;;  %v5844_v35 = vmul.f32 %v5759_v22, %v2206_v62 }
 0xde5   :  { %v5839_v9 = vmul.f32 %v5761_v0, %v2212_v6 }
 0xde7   :  { %v2413_v47 = vpack.c.bf16 %v5839_v9, %v5836_v42 }
 0xde8   :  { %v2208_v7 = vpop.permute.xlu1 %2207  ;;  %v2395_v52 = vpop.permute.xlu0 %2394 }
 0xde9   :  { %v5847_v51 = vmul.f32 %v5767_v33, %v2208_v7  ;;  %2418 = vrot.lane.b32.xlu1 %v2413_v47, %s4946_s22  ;;  %v2406_v1 = vmul.f32 %v5769_v58, %v2395_v52  ;;  %v5864_v58 = vld [vmem:[%s6446_s2] sm:$0xff]   ;;  %v2678_v52 = vld [vmem:[#allocation2 + $0xb0] sm:$0xff] }
 0xdeb   :  { %v2412_v8 = vpack.c.bf16 %v5847_v51, %v5844_v35 }
 0xdec   :  { %v2397_v0 = vpop.permute.xlu1 %2396  ;;  %v2399_v57 = vpop.permute.xlu0 %2398 }
 0xded   :  { %2416 = vrot.lane.b32.xlu0 %v2412_v8, %s4946_s22  ;;  %v2407_v3 = vmul.f32 %v5777_v34, %v2397_v0  ;;  %v2408_v27 = vmul.f32 %v5774_v2, %v2399_v57  ;;  %v5870_v2 = vld [vmem:[%s6449_s4] sm:$0xff]  }
 0xdef   :  { %v2410_v15 = vpack.c.bf16 %v2407_v3, %v2406_v1  ;;  %v2677_v3 = vld [vmem:[#allocation2 + $0xa8] sm:$0xff] }
 0xdf0   :  { %v2401_v22 = vpop.permute.xlu1 %2400 }
 0xdf1   :  { %v2409_v33 = vmul.f32 %v5783_v43, %v2401_v22  ;;  %2477 = vrot.lane.b32.xlu0 %v2410_v15, %s4946_s22  ;;  %v2679_v22 = vld [vmem:[#allocation2 + $0xb8] sm:$0xff] }
 0xdf3   :  { %v2411_v17 = vpack.c.bf16 %v2409_v33, %v2408_v27 }
 0xdf5   :  { %2479 = vrot.lane.b32.xlu1 %v2411_v17, %s4946_s22 }
 0xe5b   :  { %v2419_v16 = vpop.permute.xlu1 %2418 }
 0xe5f   :  { %v2417_v49 = vpop.permute.xlu0 %2416 }
 0xe60   :  { %4320 = vmatprep.mubr.msk.bf16.mxu1 %vm581_vm9, %v2417_v49 }
 0xe61   :  { %4321 = vmatmul.mubr.msk.bf16.vlgmr.msra.gmra.mxu1 %vm581_vm9, %v2419_v16 }
 0xe62   :  { %4331 = vmatpush3.bf16.msra.mxu1 %v5864_v58 }
 0xe63   :  { %4342 = vmatprep.subr.bf16.mxu1 %v5870_v2  ;;  %v2478_v34 = vpop.permute.xlu0 %2477 }
 0xe64   :  { %4326 = vmatprep.mubr.msk.bf16.mxu0 %vm581_vm9, %v2478_v34  ;;  %4332 = vmatprep.mubr.msk.bf16.mxu1 %vm581_vm9, %v2478_v34 }
 0xe67   :  { %v2480_v43 = vpop.permute.xlu1 %2479 }
 0xe68   :  { %4327 = vmatmul.mubr.msk.bf16.vlgmr.msra.gmra.mxu0 %vm581_vm9, %v2480_v43 }
 0xe69   :  { %4333 = vmatmul.mubr.msk.bf16.vlgmr.msra.gmra.mxu1 %vm581_vm9, %v2480_v43  ;;  %4337 = vmatpush3.bf16.msra.mxu0 %v5880_v56 }
 0xe6a   :  { %4343 = vmatpush3.bf16.msra.mxu1 %v5870_v2  ;;  %4348 = vmatprep.subr.bf16.mxu0 %v5864_v58 }
 0xe6b   :  { %4354 = vmatprep.subr.bf16.mxu1 %v5880_v56 }
 0xf21   :  { %v4322_v26 = vpop.f32.mrf.mxu1 }
 0xf23   :  { %v2460_v23 = vpop.f32.mrf.mxu1 }
 0xf25   :  { %v4323_v20 = vpop.f32.mrf.mxu1 }
 0xf27   :  { %v2463_v60 = vpop.f32.mrf.mxu1 }
 0xf28   :  { %v4328_v28 = vpop.f32.mrf.mxu0 }
 0xf29   :  { %v2530_v39 = vadd.f32 %v4328_v28, %v4322_v26  ;;  %v4334_v25 = vpop.f32.mrf.mxu1 }
 0xf2a   :  { %v2521_v48 = vpop.f32.mrf.mxu0  ;;  %v2723_v8 = vadd.f32 %v4334_v25, %v2678_v52 }
 0xf2b   :  { %v2538_v4 = vadd.f32 %v5741_v14, %v2530_v39  ;;  %v2522_v44 = vadd.f32 %v2521_v48, %v2460_v23  ;;  %v2714_v59 = vpop.f32.mrf.mxu1 }
 0xf2c   :  { %v4329_v45 = vpop.f32.mrf.mxu0  ;;  %v2715_v62 = vadd.f32 %v2714_v59, %v2676_v5  ;;  %v4068_v39 = vmul.f32 -1.442695, %v2723_v8 }
 0xf2d   :  { %4704 = vtanh.f32 %v2538_v4  ;;  %v2536_v50 = vadd.f32 %v5741_v14, %v2522_v44  ;;  %v2533_v38 = vadd.f32 %v4329_v45, %v4323_v20  ;;  %v4335_v7 = vpop.f32.mrf.mxu1  ;;  %v4062_v23 = vmul.f32 -1.442695, %v2538_v4 }
 0xf2e   :  { %v2524_v37 = vpop.f32.mrf.mxu0  ;;  %v2726_v27 = vadd.f32 %v4335_v7, %v2679_v22 }
 0xf2f   :  { %4706 = vtanh.f32 %v2536_v50  ;;  %v2539_v6 = vadd.f32 %v5741_v14, %v2533_v38  ;;  %v2525_v47 = vadd.f32 %v2524_v37, %v2463_v60  ;;  %v2717_v1 = vpop.f32.mrf.mxu1  ;;  %v4060_v20 = vmul.f32 -1.442695, %v2536_v50 }
 0xf30   :  { %4708 = vtanh.f32 %v2715_v62  ;;  %v2718_v57 = vadd.f32 %v2717_v1, %v2677_v3  ;;  %v4066_v60 = vmul.f32 -1.442695, %v2715_v62  ;;  %v4069_v45 = vmul.f32 -1.442695, %v2726_v27 }
 0xf31   :  { %4710 = vtanh.f32 %v2539_v6  ;;  %v2537_v0 = vadd.f32 %v5741_v14, %v2525_v47  ;;  %v4063_v28 = vmul.f32 -1.442695, %v2539_v6 }
 0xf32   :  { %4712 = vtanh.f32 %v2723_v8  ;;  %v4067_v48 = vmul.f32 -1.442695, %v2718_v57 }
 0xf33   :  { %4714 = vtanh.f32 %v2537_v0  ;;  %v4061_v25 = vmul.f32 -1.442695, %v2537_v0 }
 0xf34   :  { %4716 = vtanh.f32 %v2718_v57 }
 0xf35   :  { %4718 = vtanh.f32 %v2726_v27 }
 0xf36   :  { %4720 = vpow2.f32 %v4062_v23 }
 0xf37   :  { %4722 = vpow2.f32 %v4060_v20 }
 0xf38   :  { %4724 = vpow2.f32 %v4066_v60 }
 0xf39   :  { %4726 = vpow2.f32 %v4063_v28 }
 0xf3a   :  { %v4705_v15 = vpop.eup %4704  ;;  %4728 = vpow2.f32 %v4068_v39 }
 0xf3b   :  { %2580 = vrot.lane.b32.xlu0 %v4705_v15, %s4943_s28  ;;  %4730 = vpow2.f32 %v4061_v25 }
 0xf3c   :  { %v4707_v33 = vpop.eup %4706  ;;  %4732 = vpow2.f32 %v4067_v48 }
 0xf3d   :  { %v4709_v17 = vpop.eup %4708  ;;  %4734 = vpow2.f32 %v4069_v45 }
 0xf3e   :  { %v4711_v49 = vpop.eup %4710 }
 0xf3f   :  { %2576 = vrot.lane.b32.xlu0 %v4707_v33, %s4943_s28  ;;  %2582 = vrot.lane.b32.xlu1 %v4711_v49, %s4943_s28  ;;  %v4713_v16 = vpop.eup %4712 }
 0xf40   :  { %v4715_v34 = vpop.eup %4714 }
 0xf41   :  { %v4717_v43 = vpop.eup %4716 }
 0xf42   :  { %v4719_v26 = vpop.eup %4718 }
 0xf43   :  { %2765 = vrot.lane.b32.xlu0 %v4709_v17, %s4943_s28  ;;  %2578 = vrot.lane.b32.xlu1 %v4715_v34, %s4943_s28  ;;  %v4721_v44 = vpop.eup %4720 }
 0xf44   :  { %v2554_v59 = vadd.f32 1.0, %v4721_v44  ;;  %v4723_v38 = vpop.eup %4722 }
 0xf45   :  { %v4725_v37 = vpop.eup %4724  ;;  %v2552_v4 = vadd.f32 1.0, %v4723_v38 }
 0xf46   :  { %4736 = vrcp.f32 %v2554_v59  ;;  %v4727_v50 = vpop.eup %4726  ;;  %v2741_v5 = vadd.f32 1.0, %v4725_v37 }
 0xf47   :  { %2769 = vrot.lane.b32.xlu0 %v4713_v16, %s4943_s28  ;;  %2767 = vrot.lane.b32.xlu1 %v4717_v43, %s4943_s28  ;;  %v4729_v62 = vpop.eup %4728  ;;  %4738 = vrcp.f32 %v2552_v4  ;;  %v2555_v6 = vadd.f32 1.0, %v4727_v50 }
 0xf48   :  { %v4731_v47 = vpop.eup %4730  ;;  %v2743_v7 = vadd.f32 1.0, %v4729_v62  ;;  %4740 = vrcp.f32 %v2741_v5 }
 0xf49   :  { %4742 = vrcp.f32 %v2555_v6  ;;  %v2553_v52 = vadd.f32 1.0, %v4731_v47  ;;  %v4733_v8 = vpop.eup %4732 }
 0xf4a   :  { %4744 = vrcp.f32 %v2743_v7  ;;  %v4735_v0 = vpop.eup %4734  ;;  %v2742_v1 = vadd.f32 1.0, %v4733_v8 }
 0xf4b   :  { %2771 = vrot.lane.b32.xlu1 %v4719_v26, %s4943_s28  ;;  %4746 = vrcp.f32 %v2553_v52  ;;  %v2744_v22 = vadd.f32 1.0, %v4735_v0 }
 0xf4c   :  { %4748 = vrcp.f32 %v2742_v1 }
 0xf4d   :  { %4750 = vrcp.f32 %v2744_v22 }
 0xf53   :  { %v5898_v3 = vpop.eup %4736 }
 0xf54   :  { %v5902_v27 = vpop.eup %4738  ;;  %v2570_v50 = vmul.f32 %v5898_v3, %v5789_v53 }
 0xf55   :  { %v5905_v49 = vpop.eup %4740  ;;  %v2568_v6 = vmul.f32 %v5902_v27, %v5796_v13 }
 0xf56   :  { %v5908_v16 = vpop.eup %4742  ;;  %v2757_v8 = vmul.f32 %v5905_v49, %v5808_v12 }
 0xf57   :  { %v5912_v20 = vpop.eup %4744  ;;  %v2571_v52 = vmul.f32 %v5908_v16, %v5798_v11 }
 0xf58   :  { %v5916_v60 = vpop.eup %4746 }
 0xf59   :  { %v5922_v44 = vpop.eup %4748  ;;  %v2569_v13 = vmul.f32 %v5916_v60, %v5806_v24 }
 0xf5a   :  { %v5926_v38 = vpop.eup %4750 }
 0xfad   :  { %v2581_v57 = vpop.permute.xlu0 %2580 }
 0xfae   :  { %v2590_v15 = vmul.f32 %v5898_v3, %v2581_v57 }
 0xfb0   :  { %2600 = vrot.lane.b32.xlu0 %v2590_v15, %s4944_s29  ;;  %v2759_v15 = vmul.f32 %v5912_v20, %v5816_v36  ;;  %v2760_v36 = vmul.f32 %v5926_v38, %v5825_v18 }
 0xfb1   :  { %v2577_v33 = vpop.permute.xlu0 %2576  ;;  %v2583_v34 = vpop.permute.xlu1 %2582 }
 0xfb2   :  { %v2588_v17 = vmul.f32 %v5902_v27, %v2577_v33  ;;  %v2591_v26 = vmul.f32 %v5908_v16, %v2583_v34 }
 0xfb4   :  { %2596 = vrot.lane.b32.xlu0 %v2588_v17, %s4944_s29  ;;  %2602 = vrot.lane.b32.xlu1 %v2591_v26, %s4944_s29  ;;  %v2758_v17 = vmul.f32 %v5922_v44, %v5818_v61 }
 0xfb5   :  { %v2766_v43 = vpop.permute.xlu0 %2765  ;;  %v2579_v28 = vpop.permute.xlu1 %2578 }
 0xfb6   :  { %v2777_v23 = vmul.f32 %v5905_v49, %v2766_v43  ;;  %v2589_v25 = vmul.f32 %v5916_v60, %v2579_v28 }
 0xfb8   :  { %2785 = vrot.lane.b32.xlu0 %v2777_v23, %s4944_s29  ;;  %2598 = vrot.lane.b32.xlu1 %v2589_v25, %s4944_s29 }
 0xfb9   :  { %v2770_v39 = vpop.permute.xlu0 %2769  ;;  %v2768_v45 = vpop.permute.xlu1 %2767 }
 0xfba   :  { %v2779_v48 = vmul.f32 %v5912_v20, %v2770_v39  ;;  %v2778_v59 = vmul.f32 %v5922_v44, %v2768_v45 }
 0xfbc   :  { %2789 = vrot.lane.b32.xlu0 %v2779_v48, %s4944_s29  ;;  %2787 = vrot.lane.b32.xlu1 %v2778_v59, %s4944_s29 }
 0xfbd   :  { %v2772_v37 = vpop.permute.xlu1 %2771 }
 0xfbe   :  { %v2780_v4 = vmul.f32 %v5926_v38, %v2772_v37 }
 0xfc0   :  { %2791 = vrot.lane.b32.xlu1 %v2780_v4, %s4944_s29 }
0x1022   :  { %v2601_v5 = vpop.permute.xlu0 %2600 }
0x1023   :  { %v5932_v62 = vadd.f32 %v2601_v5, %v2570_v50 }
0x1025   :  { %4752 = vtanh.f32 %v5932_v62 }
0x1026   :  { %v2597_v47 = vpop.permute.xlu0 %2596  ;;  %v2603_v53 = vpop.permute.xlu1 %2602 }
0x1027   :  { %v5937_v7 = vadd.f32 %v2597_v47, %v2568_v6  ;;  %v5944_v1 = vadd.f32 %v2603_v53, %v2571_v52 }
0x1029   :  { %4754 = vtanh.f32 %v5937_v7 }
0x102a   :  { %v2786_v0 = vpop.permute.xlu0 %2785  ;;  %4756 = vtanh.f32 %v5944_v1  ;;  %v2599_v11 = vpop.permute.xlu1 %2598 }
0x102b   :  { %v5946_v57 = vadd.f32 %v2786_v0, %v2757_v8  ;;  %v5954_v33 = vadd.f32 %v2599_v11, %v2569_v13 }
0x102d   :  { %4758 = vtanh.f32 %v5946_v57 }
0x102e   :  { %v2790_v22 = vpop.permute.xlu0 %2789  ;;  %4760 = vtanh.f32 %v5954_v33  ;;  %v2788_v43 = vpop.permute.xlu1 %2787 }
0x102f   :  { %v5956_v12 = vadd.f32 %v2790_v22, %v2759_v15  ;;  %v5962_v24 = vadd.f32 %v2788_v43, %v2758_v17 }
0x1031   :  { %4762 = vtanh.f32 %v5956_v12 }
0x1032   :  { %v4753_v34 = vpop.eup %4752  ;;  %4764 = vtanh.f32 %v5962_v24  ;;  %v2792_v23 = vpop.permute.xlu1 %2791 }
0x1033   :  { %2624 = vrot.lane.b32.xlu0 %v4753_v34, %s4945_s30  ;;  %v5968_v28 = vadd.f32 %v2792_v23, %v2760_v36 }
0x1035   :  { %4766 = vtanh.f32 %v5968_v28 }
0x1036   :  { %v4755_v26 = vpop.eup %4754 }
0x1037   :  { %2620 = vrot.lane.b32.xlu0 %v4755_v26, %s4945_s30  ;;  %v4757_v61 = vpop.eup %4756 }
0x1038   :  { %2626 = vrot.lane.b32.xlu1 %v4757_v61, %s4945_s30 }
0x103a   :  { %v4759_v39 = vpop.eup %4758 }
0x103b   :  { %2809 = vrot.lane.b32.xlu0 %v4759_v39, %s4945_s30  ;;  %v4761_v25 = vpop.eup %4760 }
0x103c   :  { %2622 = vrot.lane.b32.xlu1 %v4761_v25, %s4945_s30 }
0x103e   :  { %v4763_v48 = vpop.eup %4762 }
0x103f   :  { %2813 = vrot.lane.b32.xlu0 %v4763_v48, %s4945_s30  ;;  %v4765_v18 = vpop.eup %4764 }
0x1040   :  { %2811 = vrot.lane.b32.xlu1 %v4765_v18, %s4945_s30 }
0x1042   :  { %v4767_v45 = vpop.eup %4766 }
0x1044   :  { %2815 = vrot.lane.b32.xlu1 %v4767_v45, %s4945_s30 }
0x10a5   :  { %v2625_v59 = vpop.permute.xlu0 %2624 }
0x10a6   :  { %v5990_v0 = vmul.f32 %v5898_v3, %v2625_v59 }
0x10a9   :  { %v2621_v37 = vpop.permute.xlu0 %2620 }
0x10aa   :  { %v2627_v4 = vpop.permute.xlu1 %2626  ;;  %v5979_v6 = vmul.f32 %v5902_v27, %v2621_v37 }
0x10ab   :  { %v5985_v52 = vmul.f32 %v5908_v16, %v2627_v4 }
0x10ad   :  { %v2810_v5 = vpop.permute.xlu0 %2809 }
0x10ae   :  { %v2623_v50 = vpop.permute.xlu1 %2622  ;;  %v2821_v13 = vmul.f32 %v5905_v49, %v2810_v5 }
0x10af   :  { %v5982_v47 = vmul.f32 %v5916_v60, %v2623_v50  ;;  %v2828_v60 = vpack.c.bf16 %v5985_v52, %v5990_v0 }
0x10b1   :  { %v2827_v8 = vpack.c.bf16 %v5982_v47, %v5979_v6  ;;  %v2814_v27 = vpop.permute.xlu0 %2813 }
0x10b2   :  { %v2812_v53 = vpop.permute.xlu1 %2811  ;;  %v2823_v22 = vmul.f32 %v5912_v20, %v2814_v27 }
0x10b3   :  { %v2822_v15 = vmul.f32 %v5922_v44, %v2812_v53  ;;  %2831 = vrot.lane.b32.xlu0 %v2827_v8, %s4946_s22 }
0x10b5   :  { %v2825_v11 = vpack.c.bf16 %v2822_v15, %v2821_v13  ;;  %v3091_v15 = vld [vmem:[#allocation2 + $0xc0] sm:$0xff] }
0x10b6   :  { %v2816_v16 = vpop.permute.xlu1 %2815 }
0x10b7   :  { %v2824_v17 = vmul.f32 %v5926_v38, %v2816_v16  ;;  %2833 = vrot.lane.b32.xlu0 %v2828_v60, %s4946_s22  ;;  %2892 = vrot.lane.b32.xlu1 %v2825_v11, %s4946_s22  ;;  %v3093_v11 = vld [vmem:[#allocation2 + $0xd0] sm:$0xff] }
0x10b9   :  { %v2826_v3 = vpack.c.bf16 %v2824_v17, %v2823_v22  ;;  %v3092_v22 = vld [vmem:[#allocation2 + $0xc8] sm:$0xff] }
0x10bb   :  { %2894 = vrot.lane.b32.xlu1 %v2826_v3, %s4946_s22 }
0x1125   :  { %v2832_v49 = vpop.permute.xlu0 %2831 }
0x1126   :  { %4338 = vmatprep.mubr.msk.bf16.mxu0 %vm581_vm9, %v2832_v49  ;;  %v3094_v49 = vld [vmem:[#allocation2 + $0xd8] sm:$0xff] }
0x1129   :  { %v2893_v44 = vpop.permute.xlu1 %2892  ;;  %v2834_v34 = vpop.permute.xlu0 %2833 }
0x112a   :  { %4339 = vmatmul.mubr.msk.bf16.vlgmr.msra.gmra.mxu0 %vm581_vm9, %v2834_v34  ;;  %4344 = vmatprep.mubr.msk.bf16.mxu1 %vm581_vm9, %v2893_v44 }
0x112b   :  { %4350 = vmatprep.mubr.msk.bf16.mxu0 %vm581_vm9, %v2893_v44  ;;  %4349 = vmatpush3.bf16.msra.mxu0 %v5864_v58 }
0x112c   :  { %4360 = vmatprep.subr.bf16.mxu0 %v5870_v2 }
0x112d   :  { %v2895_v20 = vpop.permute.xlu1 %2894 }
0x112e   :  { %4345 = vmatmul.mubr.msk.bf16.vlgmr.msra.gmra.mxu1 %vm581_vm9, %v2895_v20 }
0x112f   :  { %4355 = vmatpush3.bf16.msra.mxu1 %v5880_v56 }
0x1130   :  { %4366 = vmatprep.subr.bf16.mxu1 %v5864_v58 }
0x1132   :  { %4351 = vmatmul.mubr.msk.bf16.vlgmr.msra.gmra.mxu0 %vm581_vm9, %v2895_v20 }
0x1133   :  { %4361 = vmatpush3.bf16.msra.mxu0 %v5870_v2 }
0x1134   :  { %4372 = vmatprep.subr.bf16.mxu0 %v5880_v56 }
0x11ea   :  { %v4340_v38 = vpop.f32.mrf.mxu0 }
0x11ec   :  { %v2875_v43 = vpop.f32.mrf.mxu0 }
0x11ee   :  { %v4341_v36 = vpop.f32.mrf.mxu0  ;;  %v4346_v26 = vpop.f32.mrf.mxu1 }
0x11ef   :  { %v2945_v23 = vadd.f32 %v4346_v26, %v4340_v38 }
0x11f0   :  { %v2878_v61 = vpop.f32.mrf.mxu0  ;;  %v2936_v39 = vpop.f32.mrf.mxu1 }
0x11f1   :  { %v2953_v25 = vadd.f32 %v5741_v14, %v2945_v23  ;;  %v2937_v48 = vadd.f32 %v2936_v39, %v2875_v43 }
0x11f2   :  { %v4347_v18 = vpop.f32.mrf.mxu1  ;;  %v4352_v45 = vpop.f32.mrf.mxu0 }
0x11f3   :  { %4768 = vtanh.f32 %v2953_v25  ;;  %v2951_v59 = vadd.f32 %v5741_v14, %v2937_v48  ;;  %v2948_v37 = vadd.f32 %v4347_v18, %v4341_v36  ;;  %v3138_v16 = vadd.f32 %v4352_v45, %v3093_v11 }
0x11f4   :  { %v2939_v4 = vpop.f32.mrf.mxu1  ;;  %v3129_v50 = vpop.f32.mrf.mxu0  ;;  %v4076_v23 = vmul.f32 -1.442695, %v2953_v25 }
0x11f5   :  { %v2954_v5 = vadd.f32 %v5741_v14, %v2948_v37  ;;  %v2940_v8 = vadd.f32 %v2939_v4, %v2878_v61  ;;  %4770 = vtanh.f32 %v2951_v59  ;;  %v3130_v27 = vadd.f32 %v3129_v50, %v3091_v15 }
0x11f6   :  { %v4353_v53 = vpop.f32.mrf.mxu0  ;;  %v4074_v61 = vmul.f32 -1.442695, %v2951_v59  ;;  %v4082_v45 = vmul.f32 -1.442695, %v3138_v16 }
0x11f7   :  { %4772 = vtanh.f32 %v2954_v5  ;;  %v2952_v13 = vadd.f32 %v5741_v14, %v2940_v8  ;;  %v3141_v44 = vadd.f32 %v4353_v53, %v3094_v49  ;;  %v4077_v39 = vmul.f32 -1.442695, %v2954_v5 }
0x11f8   :  { %v3132_v60 = vpop.f32.mrf.mxu0  ;;  %v4080_v18 = vmul.f32 -1.442695, %v3130_v27 }
0x11f9   :  { %4774 = vtanh.f32 %v2952_v13  ;;  %v3133_v17 = vadd.f32 %v3132_v60, %v3092_v22  ;;  %v4075_v48 = vmul.f32 -1.442695, %v2952_v13  ;;  %v4083_v50 = vmul.f32 -1.442695, %v3141_v44 }
0x11fa   :  { %4776 = vtanh.f32 %v3130_v27 }
0x11fb   :  { %4778 = vtanh.f32 %v3138_v16  ;;  %v4081_v37 = vmul.f32 -1.442695, %v3133_v17 }
0x11fc   :  { %4780 = vtanh.f32 %v3133_v17 }
0x11fd   :  { %4782 = vtanh.f32 %v3141_v44 }
0x11fe   :  { %4784 = vpow2.f32 %v4076_v23 }
0x11ff   :  { %4786 = vpow2.f32 %v4074_v61 }
0x1200   :  { %v4769_v3 = vpop.eup %4768  ;;  %4788 = vpow2.f32 %v4077_v39 }
0x1201   :  { %2995 = vrot.lane.b32.xlu0 %v4769_v3, %s4943_s28  ;;  %4790 = vpow2.f32 %v4075_v48 }
0x1202   :  { %v4771_v34 = vpop.eup %4770  ;;  %4792 = vpow2.f32 %v4080_v18 }
0x1203   :  { %4794 = vpow2.f32 %v4082_v45 }
0x1204   :  { %v4773_v20 = vpop.eup %4772  ;;  %4796 = vpow2.f32 %v4081_v37 }
0x1205   :  { %2991 = vrot.lane.b32.xlu0 %v4771_v34, %s4943_s28  ;;  %2997 = vrot.lane.b32.xlu1 %v4773_v20, %s4943_s28  ;;  %4798 = vpow2.f32 %v4083_v50 }
0x1206   :  { %v4775_v14 = vpop.eup %4774 }
0x1207   :  { %v4777_v38 = vpop.eup %4776 }
0x1208   :  { %v4779_v43 = vpop.eup %4778 }
0x1209   :  { %2993 = vrot.lane.b32.xlu1 %v4775_v14, %s4943_s28  ;;  %3180 = vrot.lane.b32.xlu0 %v4777_v38, %s4943_s28  ;;  %v4781_v36 = vpop.eup %4780 }
0x120a   :  { %v4783_v26 = vpop.eup %4782 }
0x120b   :  { %v4785_v4 = vpop.eup %4784 }
0x120c   :  { %v2969_v8 = vadd.f32 1.0, %v4785_v4  ;;  %v4787_v53 = vpop.eup %4786 }
0x120d   :  { %3184 = vrot.lane.b32.xlu0 %v4779_v43, %s4943_s28  ;;  %3182 = vrot.lane.b32.xlu1 %v4781_v36, %s4943_s28  ;;  %v4789_v15 = vpop.eup %4788  ;;  %v2967_v25 = vadd.f32 1.0, %v4787_v53 }
0x120e   :  { %4800 = vrcp.f32 %v2969_v8  ;;  %v2970_v59 = vadd.f32 1.0, %v4789_v15  ;;  %v4791_v5 = vpop.eup %4790 }
0x120f   :  { %4802 = vrcp.f32 %v2967_v25  ;;  %v4793_v60 = vpop.eup %4792  ;;  %v2968_v13 = vadd.f32 1.0, %v4791_v5 }
0x1210   :  { %4804 = vrcp.f32 %v2970_v59  ;;  %v4795_v27 = vpop.eup %4794  ;;  %v3156_v11 = vadd.f32 1.0, %v4793_v60 }
0x1211   :  { %3186 = vrot.lane.b32.xlu1 %v4783_v26, %s4943_s28  ;;  %v4797_v16 = vpop.eup %4796  ;;  %4806 = vrcp.f32 %v2968_v13  ;;  %v3158_v22 = vadd.f32 1.0, %v4795_v27 }
0x1212   :  { %v4799_v17 = vpop.eup %4798  ;;  %4808 = vrcp.f32 %v3156_v11  ;;  %v3157_v3 = vadd.f32 1.0, %v4797_v16 }
0x1213   :  { %4810 = vrcp.f32 %v3158_v22  ;;  %v3159_v20 = vadd.f32 1.0, %v4799_v17 }
0x1214   :  { %4812 = vrcp.f32 %v3157_v3 }
0x1215   :  { %4814 = vrcp.f32 %v3159_v20 }
0x121b   :  { %v6026_v49 = vpop.eup %4800 }
0x121c   :  { %v6030_v14 = vpop.eup %4802  ;;  %v2985_v13 = vmul.f32 %v6026_v49, %v5932_v62 }
0x121d   :  { %v6032_v43 = vpop.eup %4804  ;;  %v2983_v16 = vmul.f32 %v6030_v14, %v5937_v7 }
0x121e   :  { %v6038_v61 = vpop.eup %4806  ;;  %v2986_v17 = vmul.f32 %v6032_v43, %v5944_v1 }
0x121f   :  { %v6041_v18 = vpop.eup %4808  ;;  %v2984_v62 = vmul.f32 %v6038_v61, %v5954_v33 }
0x1220   :  { %v6045_v4 = vpop.eup %4810  ;;  %v3172_v7 = vmul.f32 %v6041_v18, %v5946_v57 }
0x1221   :  { %v6048_v50 = vpop.eup %4812 }
0x1222   :  { %v6054_v59 = vpop.eup %4814 }
0x1273   :  { %v2996_v44 = vpop.permute.xlu0 %2995 }
0x1274   :  { %v3005_v34 = vmul.f32 %v6026_v49, %v2996_v44 }
0x1276   :  { %3015 = vrot.lane.b32.xlu0 %v3005_v34, %s4944_s29 }
0x1277   :  { %v2992_v38 = vpop.permute.xlu0 %2991  ;;  %v2998_v26 = vpop.permute.xlu1 %2997 }
0x1278   :  { %v3003_v36 = vmul.f32 %v6030_v14, %v2992_v38  ;;  %v3006_v23 = vmul.f32 %v6032_v43, %v2998_v26  ;;  %v3174_v26 = vmul.f32 %v6045_v4, %v5956_v12 }
0x127a   :  { %3011 = vrot.lane.b32.xlu0 %v3003_v36, %s4944_s29  ;;  %3017 = vrot.lane.b32.xlu1 %v3006_v23, %s4944_s29  ;;  %v3173_v23 = vmul.f32 %v6048_v50, %v5962_v24 }
0x127b   :  { %v2994_v39 = vpop.permute.xlu1 %2993  ;;  %v3181_v45 = vpop.permute.xlu0 %3180 }
0x127c   :  { %v3004_v48 = vmul.f32 %v6038_v61, %v2994_v39  ;;  %v3192_v37 = vmul.f32 %v6041_v18, %v3181_v45 }
0x127e   :  { %3013 = vrot.lane.b32.xlu1 %v3004_v48, %s4944_s29  ;;  %3200 = vrot.lane.b32.xlu0 %v3192_v37, %s4944_s29  ;;  %v3175_v37 = vmul.f32 %v6054_v59, %v5968_v28 }
0x127f   :  { %v3185_v8 = vpop.permute.xlu0 %3184  ;;  %v3183_v53 = vpop.permute.xlu1 %3182 }
0x1280   :  { %v3194_v15 = vmul.f32 %v6045_v4, %v3185_v8  ;;  %v3193_v25 = vmul.f32 %v6048_v50, %v3183_v53 }
0x1282   :  { %3204 = vrot.lane.b32.xlu0 %v3194_v15, %s4944_s29  ;;  %3202 = vrot.lane.b32.xlu1 %v3193_v25, %s4944_s29 }
0x1283   :  { %v3187_v5 = vpop.permute.xlu1 %3186 }
0x1284   :  { %v3195_v60 = vmul.f32 %v6054_v59, %v3187_v5 }
0x1286   :  { %3206 = vrot.lane.b32.xlu1 %v3195_v60, %s4944_s29 }
0x12e8   :  { %v3016_v27 = vpop.permute.xlu0 %3015 }
0x12e9   :  { %v6060_v11 = vadd.f32 %v3016_v27, %v2985_v13 }
0x12eb   :  { %4816 = vtanh.f32 %v6060_v11 }
0x12ec   :  { %v3012_v22 = vpop.permute.xlu0 %3011  ;;  %v3018_v44 = vpop.permute.xlu1 %3017 }
0x12ed   :  { %v6067_v3 = vadd.f32 %v3012_v22, %v2983_v16  ;;  %v6069_v34 = vadd.f32 %v3018_v44, %v2986_v17 }
0x12ef   :  { %4818 = vtanh.f32 %v6067_v3 }
0x12f0   :  { %4820 = vtanh.f32 %v6069_v34  ;;  %v3014_v20 = vpop.permute.xlu1 %3013  ;;  %v3201_v36 = vpop.permute.xlu0 %3200 }
0x12f1   :  { %v6077_v38 = vadd.f32 %v3014_v20, %v2984_v62  ;;  %v6079_v1 = vadd.f32 %v3201_v36, %v3172_v7 }
0x12f3   :  { %4822 = vtanh.f32 %v6077_v38 }
0x12f4   :  { %4824 = vtanh.f32 %v6079_v1  ;;  %v3205_v39 = vpop.permute.xlu0 %3204  ;;  %v3203_v48 = vpop.permute.xlu1 %3202 }
0x12f5   :  { %v6087_v45 = vadd.f32 %v3205_v39, %v3174_v26  ;;  %v6089_v57 = vadd.f32 %v3203_v48, %v3173_v23 }
0x12f7   :  { %4826 = vtanh.f32 %v6087_v45 }
0x12f8   :  { %v4817_v33 = vpop.eup %4816  ;;  %4828 = vtanh.f32 %v6089_v57  ;;  %v3207_v12 = vpop.permute.xlu1 %3206 }
0x12f9   :  { %3039 = vrot.lane.b32.xlu0 %v4817_v33, %s4945_s30  ;;  %v6096_v24 = vadd.f32 %v3207_v12, %v3175_v37 }
0x12fb   :  { %4830 = vtanh.f32 %v6096_v24 }
0x12fc   :  { %v4819_v8 = vpop.eup %4818 }
0x12fd   :  { %v4821_v53 = vpop.eup %4820  ;;  %3035 = vrot.lane.b32.xlu0 %v4819_v8, %s4945_s30 }
0x12fe   :  { %3041 = vrot.lane.b32.xlu1 %v4821_v53, %s4945_s30 }
0x1300   :  { %v4823_v15 = vpop.eup %4822 }
0x1301   :  { %v4825_v25 = vpop.eup %4824 }
0x1302   :  { %3037 = vrot.lane.b32.xlu1 %v4823_v15, %s4945_s30  ;;  %3224 = vrot.lane.b32.xlu0 %v4825_v25, %s4945_s30 }
0x1304   :  { %v4827_v28 = vpop.eup %4826 }
0x1305   :  { %v4829_v5 = vpop.eup %4828 }
0x1306   :  { %3228 = vrot.lane.b32.xlu0 %v4827_v28, %s4945_s30  ;;  %3226 = vrot.lane.b32.xlu1 %v4829_v5, %s4945_s30 }
0x1308   :  { %v4831_v60 = vpop.eup %4830 }
0x130a   :  { %3230 = vrot.lane.b32.xlu1 %v4831_v60, %s4945_s30  ;;  %v6143_v60 = vld [vmem:[%s6450_s6] ss:$0 sm:$0xff] }
0x136b   :  { %v3040_v13 = vpop.permute.xlu0 %3039 }
0x136c   :  { %v6107_v16 = vmul.f32 %v6026_v49, %v3040_v13 }
0x136f   :  { %v3036_v17 = vpop.permute.xlu0 %3035 }
0x1370   :  { %v3042_v27 = vpop.permute.xlu1 %3041  ;;  %v6116_v20 = vmul.f32 %v6030_v14, %v3036_v17 }
0x1371   :  { %v6110_v22 = vmul.f32 %v6032_v43, %v3042_v27 }
0x1373   :  { %v3243_v44 = vpack.c.bf16 %v6110_v22, %v6107_v16 }
0x1374   :  { %v3038_v62 = vpop.permute.xlu1 %3037  ;;  %v3225_v36 = vpop.permute.xlu0 %3224 }
0x1375   :  { %3248 = vrot.lane.b32.xlu1 %v3243_v44, %s4946_s22  ;;  %v6119_v7 = vmul.f32 %v6038_v61, %v3038_v62  ;;  %v3236_v26 = vmul.f32 %v6041_v18, %v3225_v36  ;;  %v3506_v36 = vld [vmem:[#allocation2 + $0xe0] sm:$0xff] }
0x1377   :  { %v3242_v49 = vpack.c.bf16 %v6119_v7, %v6116_v20 }
0x1378   :  { %v3227_v43 = vpop.permute.xlu1 %3226  ;;  %v3229_v33 = vpop.permute.xlu0 %3228 }
0x1379   :  { %3246 = vrot.lane.b32.xlu0 %v3242_v49, %s4946_s22  ;;  %v3237_v23 = vmul.f32 %v6048_v50, %v3227_v43  ;;  %v3238_v14 = vmul.f32 %v6045_v4, %v3229_v33  ;;  %v3508_v33 = vld [vmem:[#allocation2 + $0xf0] sm:$0xff] }
0x137b   :  { %v3240_v39 = vpack.c.bf16 %v3237_v23, %v3236_v26 }
0x137c   :  { %v3231_v48 = vpop.permute.xlu1 %3230 }
0x137d   :  { %v3239_v37 = vmul.f32 %v6054_v59, %v3231_v48  ;;  %3307 = vrot.lane.b32.xlu0 %v3240_v39, %s4946_s22 }
0x137f   :  { %v3241_v61 = vpack.c.bf16 %v3239_v37, %v3238_v14  ;;  %v3507_v37 = vld [vmem:[#allocation2 + $0xe8] sm:$0xff] }
0x1381   :  { %3309 = vrot.lane.b32.xlu1 %v3241_v61, %s4946_s22 }
0x13e7   :  { %v3249_v12 = vpop.permute.xlu1 %3248 }
0x13eb   :  { %v3247_v8 = vpop.permute.xlu0 %3246 }
0x13ec   :  { %4356 = vmatprep.mubr.msk.bf16.mxu1 %vm581_vm9, %v3247_v8 }
0x13ed   :  { %4357 = vmatmul.mubr.msk.bf16.vlgmr.msra.gmra.mxu1 %vm581_vm9, %v3249_v12  ;;  %v3509_v12 = vld [vmem:[#allocation2 + $0xf8] sm:$0xff] }
0x13ee   :  { %4367 = vmatpush3.bf16.msra.mxu1 %v5864_v58 }
0x13ef   :  { %4378 = vmatprep.subr.bf16.mxu1 %v5870_v2  ;;  %v3308_v18 = vpop.permute.xlu0 %3307 }
0x13f0   :  { %4362 = vmatprep.mubr.msk.bf16.mxu0 %vm581_vm9, %v3308_v18  ;;  %4368 = vmatprep.mubr.msk.bf16.mxu1 %vm581_vm9, %v3308_v18 }
0x13f3   :  { %v3310_v4 = vpop.permute.xlu1 %3309 }
0x13f4   :  { %4363 = vmatmul.mubr.msk.bf16.vlgmr.msra.gmra.mxu0 %vm581_vm9, %v3310_v4 }
0x13f5   :  { %4369 = vmatmul.mubr.msk.bf16.vlgmr.msra.gmra.mxu1 %vm581_vm9, %v3310_v4  ;;  %4373 = vmatpush3.bf16.msra.mxu0 %v5880_v56 }
0x13f6   :  { %4379 = vmatpush3.bf16.msra.mxu1 %v5870_v2 }
0x14ad   :  { %v4358_v50 = vpop.f32.mrf.mxu1 }
0x14af   :  { %v3290_v59 = vpop.f32.mrf.mxu1 }
0x14b1   :  { %v4359_v53 = vpop.f32.mrf.mxu1 }
0x14b3   :  { %v3293_v58 = vpop.f32.mrf.mxu1 }
0x14b4   :  { %v4364_v15 = vpop.f32.mrf.mxu0 }
0x14b5   :  { %v3360_v25 = vadd.f32 %v4364_v15, %v4358_v50  ;;  %v4370_v28 = vpop.f32.mrf.mxu1 }
0x14b6   :  { %v3351_v5 = vpop.f32.mrf.mxu0  ;;  %v3553_v39 = vadd.f32 %v4370_v28, %v3508_v33 }
0x14b7   :  { %v3368_v13 = vadd.f32 %v6143_v60, %v3360_v25  ;;  %v3352_v27 = vadd.f32 %v3351_v5, %v3290_v59  ;;  %v3544_v56 = vpop.f32.mrf.mxu1 }
0x14b8   :  { %v4365_v17 = vpop.f32.mrf.mxu0  ;;  %v3545_v49 = vadd.f32 %v3544_v56, %v3506_v36  ;;  %v4096_v56 = vmul.f32 -1.442695, %v3553_v39 }
0x14b9   :  { %4832 = vtanh.f32 %v3368_v13  ;;  %v3366_v2 = vadd.f32 %v6143_v60, %v3352_v27  ;;  %v3363_v44 = vadd.f32 %v4365_v17, %v4359_v53  ;;  %v4371_v23 = vpop.f32.mrf.mxu1  ;;  %v4090_v28 = vmul.f32 -1.442695, %v3368_v13 }
0x14ba   :  { %v3354_v62 = vpop.f32.mrf.mxu0  ;;  %v3556_v18 = vadd.f32 %v4371_v23, %v3509_v12  ;;  %v4094_v27 = vmul.f32 -1.442695, %v3545_v49 }
0x14bb   :  { %4834 = vtanh.f32 %v3366_v2  ;;  %v3369_v43 = vadd.f32 %v6143_v60, %v3363_v44  ;;  %v3355_v26 = vadd.f32 %v3354_v62, %v3293_v58  ;;  %v3547_v14 = vpop.f32.mrf.mxu1  ;;  %v4088_v5 = vmul.f32 -1.442695, %v3366_v2 }
0x14bc   :  { %4836 = vtanh.f32 %v3545_v49  ;;  %v3548_v61 = vadd.f32 %v3547_v14, %v3507_v37 }
0x14bd   :  { %4838 = vtanh.f32 %v3369_v43  ;;  %v3367_v48 = vadd.f32 %v6143_v60, %v3355_v26  ;;  %v4091_v17 = vmul.f32 -1.442695, %v3369_v43  ;;  %v4097_v26 = vmul.f32 -1.442695, %v3556_v18 }
0x14be   :  { %4840 = vtanh.f32 %v3553_v39  ;;  %v4095_v62 = vmul.f32 -1.442695, %v3548_v61 }
0x14bf   :  { %4842 = vtanh.f32 %v3367_v48  ;;  %v4089_v44 = vmul.f32 -1.442695, %v3367_v48 }
0x14c0   :  { %4844 = vtanh.f32 %v3548_v61 }
0x14c1   :  { %4846 = vtanh.f32 %v3556_v18 }
0x14c2   :  { %4848 = vpow2.f32 %v4090_v28 }
0x14c3   :  { %4850 = vpow2.f32 %v4088_v5 }
0x14c4   :  { %4852 = vpow2.f32 %v4094_v27 }
0x14c5   :  { %4854 = vpow2.f32 %v4091_v17 }
0x14c6   :  { %v4833_v8 = vpop.eup %4832  ;;  %4856 = vpow2.f32 %v4096_v56 }
0x14c7   :  { %3410 = vrot.lane.b32.xlu0 %v4833_v8, %s4943_s28  ;;  %4858 = vpow2.f32 %v4089_v44 }
0x14c8   :  { %v4835_v4 = vpop.eup %4834  ;;  %4860 = vpow2.f32 %v4095_v62 }
0x14c9   :  { %v4837_v50 = vpop.eup %4836  ;;  %4862 = vpow2.f32 %v4097_v26 }
0x14ca   :  { %v4839_v59 = vpop.eup %4838 }
0x14cb   :  { %3406 = vrot.lane.b32.xlu0 %v4835_v4, %s4943_s28  ;;  %3412 = vrot.lane.b32.xlu1 %v4839_v59, %s4943_s28  ;;  %v4841_v53 = vpop.eup %4840 }
0x14cc   :  { %v4843_v58 = vpop.eup %4842 }
0x14cd   :  { %v4845_v15 = vpop.eup %4844 }
0x14ce   :  { %v4847_v25 = vpop.eup %4846 }
0x14cf   :  { %3595 = vrot.lane.b32.xlu0 %v4837_v50, %s4943_s28  ;;  %3408 = vrot.lane.b32.xlu1 %v4843_v58, %s4943_s28  ;;  %v4849_v36 = vpop.eup %4848 }
0x14d0   :  { %v3384_v23 = vadd.f32 1.0, %v4849_v36  ;;  %v4851_v33 = vpop.eup %4850 }
0x14d1   :  { %v4853_v14 = vpop.eup %4852  ;;  %v3382_v13 = vadd.f32 1.0, %v4851_v33 }
0x14d2   :  { %4864 = vrcp.f32 %v3384_v23  ;;  %v4855_v2 = vpop.eup %4854  ;;  %v3571_v49 = vadd.f32 1.0, %v4853_v14 }
0x14d3   :  { %3599 = vrot.lane.b32.xlu0 %v4841_v53, %s4943_s28  ;;  %3597 = vrot.lane.b32.xlu1 %v4845_v15, %s4943_s28  ;;  %v4857_v37 = vpop.eup %4856  ;;  %4866 = vrcp.f32 %v3382_v13  ;;  %v3385_v43 = vadd.f32 1.0, %v4855_v2 }
0x14d4   :  { %v4859_v39 = vpop.eup %4858  ;;  %v3573_v8 = vadd.f32 1.0, %v4857_v37  ;;  %4868 = vrcp.f32 %v3571_v49 }
0x14d5   :  { %4870 = vrcp.f32 %v3385_v43  ;;  %v3383_v48 = vadd.f32 1.0, %v4859_v39  ;;  %v4861_v61 = vpop.eup %4860 }
0x14d6   :  { %4872 = vrcp.f32 %v3573_v8  ;;  %v4863_v12 = vpop.eup %4862  ;;  %v3572_v18 = vadd.f32 1.0, %v4861_v61 }
0x14d7   :  { %3601 = vrot.lane.b32.xlu1 %v4847_v25, %s4943_s28  ;;  %4874 = vrcp.f32 %v3383_v48  ;;  %v3574_v53 = vadd.f32 1.0, %v4863_v12 }
0x14d8   :  { %4876 = vrcp.f32 %v3572_v18 }
0x14d9   :  { %4878 = vrcp.f32 %v3574_v53 }
0x14df   :  { %v6157_v4 = vpop.eup %4864 }
0x14e0   :  { %v6161_v58 = vpop.eup %4866  ;;  %v3400_v8 = vmul.f32 %v6157_v4, %v6060_v11 }
0x14e1   :  { %v6164_v28 = vpop.eup %4868  ;;  %v3398_v12 = vmul.f32 %v6161_v58, %v6067_v3 }
0x14e2   :  { %v6167_v5 = vpop.eup %4870  ;;  %v3587_v53 = vmul.f32 %v6164_v28, %v6079_v1 }
0x14e3   :  { %v6171_v62 = vpop.eup %4872 }
0x14e4   :  { %v6175_v36 = vpop.eup %4874 }
0x14e5   :  { %v6181_v13 = vpop.eup %4876  ;;  %v3399_v3 = vmul.f32 %v6175_v36, %v6077_v38 }
0x14e6   :  { %v6185_v37 = vpop.eup %4878  ;;  %v3588_v1 = vmul.f32 %v6181_v13, %v6089_v57 }
0x14e7   :  { %v3590_v38 = vmul.f32 %v6185_v37, %v6096_v24 }
0x1539   :  { %v3411_v50 = vpop.permute.xlu0 %3410 }
0x153a   :  { %v3420_v59 = vmul.f32 %v6157_v4, %v3411_v50 }
0x153c   :  { %3430 = vrot.lane.b32.xlu0 %v3420_v59, %s4944_s29  ;;  %v3401_v59 = vmul.f32 %v6167_v5, %v6069_v34 }
0x153d   :  { %v3407_v15 = vpop.permute.xlu0 %3406  ;;  %v3413_v27 = vpop.permute.xlu1 %3412 }
0x153e   :  { %v3418_v25 = vmul.f32 %v6161_v58, %v3407_v15  ;;  %v3421_v56 = vmul.f32 %v6167_v5, %v3413_v27 }
0x1540   :  { %3426 = vrot.lane.b32.xlu0 %v3418_v25, %s4944_s29  ;;  %3432 = vrot.lane.b32.xlu1 %v3421_v56, %s4944_s29 }
0x1541   :  { %v3596_v17 = vpop.permute.xlu0 %3595  ;;  %v3409_v26 = vpop.permute.xlu1 %3408 }
0x1542   :  { %v3607_v44 = vmul.f32 %v6164_v28, %v3596_v17  ;;  %v3419_v33 = vmul.f32 %v6175_v36, %v3409_v26  ;;  %v3589_v17 = vmul.f32 %v6171_v62, %v6087_v45 }
0x1544   :  { %3615 = vrot.lane.b32.xlu0 %v3607_v44, %s4944_s29  ;;  %3428 = vrot.lane.b32.xlu1 %v3419_v33, %s4944_s29 }
0x1545   :  { %v3600_v23 = vpop.permute.xlu0 %3599  ;;  %v3598_v2 = vpop.permute.xlu1 %3597 }
0x1546   :  { %v3609_v14 = vmul.f32 %v6171_v62, %v3600_v23  ;;  %v3608_v49 = vmul.f32 %v6181_v13, %v3598_v2 }
0x1548   :  { %3619 = vrot.lane.b32.xlu0 %v3609_v14, %s4944_s29  ;;  %3617 = vrot.lane.b32.xlu1 %v3608_v49, %s4944_s29 }
0x1549   :  { %v3602_v43 = vpop.permute.xlu1 %3601 }
0x154a   :  { %v3610_v39 = vmul.f32 %v6185_v37, %v3602_v43 }
0x154c   :  { %3621 = vrot.lane.b32.xlu1 %v3610_v39, %s4944_s29 }
0x15ae   :  { %v3431_v48 = vpop.permute.xlu0 %3430 }
0x15af   :  { %v6191_v61 = vadd.f32 %v3431_v48, %v3400_v8 }
0x15b1   :  { %4880 = vtanh.f32 %v6191_v61 }
0x15b2   :  { %v3427_v18 = vpop.permute.xlu0 %3426  ;;  %v3433_v11 = vpop.permute.xlu1 %3432 }
0x15b3   :  { %v6196_v50 = vadd.f32 %v3427_v18, %v3398_v12  ;;  %v6203_v25 = vadd.f32 %v3433_v11, %v3401_v59 }
0x15b5   :  { %4882 = vtanh.f32 %v6196_v50 }
0x15b6   :  { %v3616_v15 = vpop.permute.xlu0 %3615  ;;  %4884 = vtanh.f32 %v6203_v25  ;;  %v3429_v56 = vpop.permute.xlu1 %3428 }
0x15b7   :  { %v3627_v27 = vadd.f32 %v3616_v15, %v3587_v53  ;;  %v6210_v44 = vadd.f32 %v3429_v56, %v3399_v3 }
0x15b9   :  { %4886 = vtanh.f32 %v3627_v27 }
0x15ba   :  { %v3620_v34 = vpop.permute.xlu0 %3619  ;;  %4888 = vtanh.f32 %v6210_v44  ;;  %v3618_v33 = vpop.permute.xlu1 %3617 }
0x15bb   :  { %v3629_v26 = vadd.f32 %v3620_v34, %v3589_v17  ;;  %v3628_v14 = vadd.f32 %v3618_v33, %v3588_v1 }
0x15bd   :  { %4890 = vtanh.f32 %v3629_v26 }
0x15be   :  { %v4881_v23 = vpop.eup %4880  ;;  %4892 = vtanh.f32 %v3628_v14  ;;  %v3622_v2 = vpop.permute.xlu1 %3621 }
0x15bf   :  { %3454 = vrot.lane.b32.xlu0 %v4881_v23, %s4945_s30  ;;  %v3630_v49 = vadd.f32 %v3622_v2, %v3590_v38 }
0x15c1   :  { %4894 = vtanh.f32 %v3630_v49 }
0x15c2   :  { %v4883_v45 = vpop.eup %4882 }
0x15c3   :  { %3450 = vrot.lane.b32.xlu0 %v4883_v45, %s4945_s30  ;;  %v4885_v43 = vpop.eup %4884 }
0x15c4   :  { %3456 = vrot.lane.b32.xlu1 %v4885_v43, %s4945_s30 }
0x15c6   :  { %v4887_v39 = vpop.eup %4886 }
0x15c7   :  { %3639 = vrot.lane.b32.xlu0 %v4887_v39, %s4945_s30  ;;  %v4889_v57 = vpop.eup %4888 }
0x15c8   :  { %3452 = vrot.lane.b32.xlu1 %v4889_v57, %s4945_s30 }
0x15ca   :  { %v4891_v8 = vpop.eup %4890 }
0x15cb   :  { %3643 = vrot.lane.b32.xlu0 %v4891_v8, %s4945_s30  ;;  %v4893_v48 = vpop.eup %4892 }
0x15cc   :  { %3641 = vrot.lane.b32.xlu1 %v4893_v48, %s4945_s30 }
0x15ce   :  { %v4895_v24 = vpop.eup %4894 }
0x15d0   :  { %3645 = vrot.lane.b32.xlu1 %v4895_v24, %s4945_s30 }
0x1631   :  { %v3455_v12 = vpop.permute.xlu0 %3454 }
0x1632   :  { %v6237_v34 = vmul.f32 %v6157_v4, %v3455_v12 }
0x1635   :  { %v3451_v18 = vpop.permute.xlu0 %3450 }
0x1636   :  { %v3457_v59 = vpop.permute.xlu1 %3456  ;;  %v6226_v15 = vmul.f32 %v6161_v58, %v3451_v18 }
0x1637   :  { %v6232_v3 = vmul.f32 %v6167_v5, %v3457_v59 }
0x1639   :  { %v3640_v11 = vpop.permute.xlu0 %3639 }
0x163a   :  { %v3453_v53 = vpop.permute.xlu1 %3452  ;;  %v3651_v26 = vmul.f32 %v6164_v28, %v3640_v11 }
0x163b   :  { %v6229_v27 = vmul.f32 %v6175_v36, %v3453_v53  ;;  %v3658_v36 = vpack.c.bf16 %v6232_v3, %v6237_v34 }
0x163d   :  { %v3657_v17 = vpack.c.bf16 %v6229_v27, %v6226_v15  ;;  %v3644_v58 = vpop.permute.xlu0 %3643 }
0x163e   :  { %v3642_v56 = vpop.permute.xlu1 %3641  ;;  %v3653_v33 = vmul.f32 %v6171_v62, %v3644_v58 }
0x163f   :  { %v3652_v1 = vmul.f32 %v6181_v13, %v3642_v56  ;;  %3661 = vrot.lane.b32.xlu0 %v3657_v17, %s4946_s22 }
0x1641   :  { %v3655_v23 = vpack.c.bf16 %v3652_v1, %v3651_v26 }
0x1642   :  { %v3646_v5 = vpop.permute.xlu1 %3645 }
0x1643   :  { %v3654_v14 = vmul.f32 %v6185_v37, %v3646_v5  ;;  %3663 = vrot.lane.b32.xlu0 %v3658_v36, %s4946_s22  ;;  %3722 = vrot.lane.b32.xlu1 %v3655_v23, %s4946_s22 }
0x1645   :  { %v3656_v4 = vpack.c.bf16 %v3654_v14, %v3653_v33 }
0x1647   :  { %3724 = vrot.lane.b32.xlu1 %v3656_v4, %s4946_s22 }
0x16b1   :  { %v3662_v28 = vpop.permute.xlu0 %3661 }
0x16b2   :  { %4374 = vmatprep.mubr.msk.bf16.mxu0 %vm581_vm9, %v3662_v28 }
0x16b5   :  { %v3723_v13 = vpop.permute.xlu1 %3722  ;;  %v3664_v38 = vpop.permute.xlu0 %3663 }
0x16b6   :  { %4375 = vmatmul.mubr.msk.bf16.vlgmr.msra.gmra.mxu0 %vm581_vm9, %v3664_v38  ;;  %4380 = vmatprep.mubr.msk.bf16.mxu1 %vm581_vm9, %v3723_v13 }
0x16b9   :  { %v3725_v45 = vpop.permute.xlu1 %3724 }
0x16ba   :  { %4381 = vmatmul.mubr.msk.bf16.vlgmr.msra.gmra.mxu1 %vm581_vm9, %v3725_v45 }
0x1776   :  { %v4376_v62 = vpop.f32.mrf.mxu0 }
0x1778   :  { %v3705_v37 = vpop.f32.mrf.mxu0 }
0x177a   :  { %v4382_v2 = vpop.f32.mrf.mxu1  ;;  %v4377_v49 = vpop.f32.mrf.mxu0 }
0x177b   :  { %v3775_v39 = vadd.f32 %v4382_v2, %v4376_v62 }
0x177c   :  { %v3766_v43 = vpop.f32.mrf.mxu1  ;;  %v3708_v24 = vpop.f32.mrf.mxu0 }
0x177d   :  { %v3767_v57 = vadd.f32 %v3766_v43, %v3705_v37  ;;  %v3783_v18 = vadd.f32 %v6143_v60, %v3775_v39 }
0x177e   :  { %v4383_v8 = vpop.f32.mrf.mxu1 }
0x177f   :  { %v3781_v48 = vadd.f32 %v6143_v60, %v3767_v57  ;;  %v3778_v53 = vadd.f32 %v4383_v8, %v4377_v49  ;;  %v4104_v23 = vmul.f32 -1.442695, %v3783_v18 }
0x1780   :  { %v3769_v12 = vpop.f32.mrf.mxu1 }
0x1781   :  { %v3770_v59 = vadd.f32 %v3769_v12, %v3708_v24  ;;  %4896 = vtanh.f32 %v3781_v48  ;;  %v3784_v17 = vadd.f32 %v6143_v60, %v3778_v53  ;;  %v4102_v36 = vmul.f32 -1.442695, %v3781_v48 }
0x1782   :  { %4898 = vtanh.f32 %v3783_v18 }
0x1783   :  { %v3782_v11 = vadd.f32 %v6143_v60, %v3770_v59  ;;  %v4105_v60 = vmul.f32 -1.442695, %v3784_v17  ;;  %v565_v59 = vld [vmem:[%s6451_s7] sm:$0xff] }
0x1785   :  { %4900 = vtanh.f32 %v3782_v11  ;;  %v4103_v5 = vmul.f32 -1.442695, %v3782_v11  ;;  %v567_v11 = vld [vmem:[%s6451_s7 + $0x10] sm:$0xff] }
0x1786   :  { %4902 = vtanh.f32 %v3784_v17  ;;  %v566_v17 = vld [vmem:[%s6451_s7 + $0x8] sm:$0xff] }
0x1787   :  { %4904 = vpow2.f32 %v4102_v36 }
0x1788   :  { %4906 = vpow2.f32 %v4104_v23 }
0x1789   :  { %4908 = vpow2.f32 %v4103_v5 }
0x178a   :  { %4910 = vpow2.f32 %v4105_v60 }
0x178e   :  { %v4897_v56 = vpop.eup %4896 }
0x178f   :  { %3821 = vrot.lane.b32.xlu0 %v4897_v56, %s4943_s28  ;;  %v4899_v26 = vpop.eup %4898  ;;  %v568_v56 = vld [vmem:[%s6451_s7 + $0x18] sm:$0xff] }
0x1792   :  { %v4901_v1 = vpop.eup %4900 }
0x1793   :  { %3825 = vrot.lane.b32.xlu0 %v4899_v26, %s4943_s28  ;;  %3823 = vrot.lane.b32.xlu1 %v4901_v1, %s4943_s28  ;;  %v4903_v58 = vpop.eup %4902 }
0x1794   :  { %v4905_v33 = vpop.eup %4904 }
0x1795   :  { %v4907_v14 = vpop.eup %4906  ;;  %v3797_v4 = vadd.f32 1.0, %v4905_v33 }
0x1796   :  { %v4909_v28 = vpop.eup %4908  ;;  %v3799_v13 = vadd.f32 1.0, %v4907_v14 }
0x1797   :  { %3827 = vrot.lane.b32.xlu1 %v4903_v58, %s4943_s28  ;;  %4912 = vrcp.f32 %v3797_v4  ;;  %v3798_v38 = vadd.f32 1.0, %v4909_v28  ;;  %v4911_v45 = vpop.eup %4910 }
0x1798   :  { %4914 = vrcp.f32 %v3799_v13  ;;  %v3800_v62 = vadd.f32 1.0, %v4911_v45 }
0x1799   :  { %4916 = vrcp.f32 %v3798_v38 }
0x179a   :  { %4918 = vrcp.f32 %v3800_v62 }
0x17a4   :  { %v6261_v37 = vpop.eup %4912 }
0x17a5   :  { %v6264_v43 = vpop.eup %4914  ;;  %v3813_v36 = vmul.f32 %v6261_v37, %v6196_v50 }
0x17a6   :  { %v6267_v39 = vpop.eup %4916  ;;  %v3815_v1 = vmul.f32 %v6264_v43, %v6191_v61 }
0x17a7   :  { %v6273_v12 = vpop.eup %4918  ;;  %v3814_v58 = vmul.f32 %v6267_v39, %v6210_v44 }
0x17a8   :  { %v3816_v4 = vmul.f32 %v6273_v12, %v6203_v25 }
0x1801   :  { %v3822_v2 = vpop.permute.xlu0 %3821 }
0x1802   :  { %v3833_v49 = vmul.f32 %v6261_v37, %v3822_v2 }
0x1804   :  { %3841 = vrot.lane.b32.xlu0 %v3833_v49, %s4944_s29 }
0x1805   :  { %v3826_v57 = vpop.permute.xlu0 %3825  ;;  %v3824_v8 = vpop.permute.xlu1 %3823 }
0x1806   :  { %v3835_v48 = vmul.f32 %v6264_v43, %v3826_v57  ;;  %v3834_v24 = vmul.f32 %v6267_v39, %v3824_v8 }
0x1808   :  { %3845 = vrot.lane.b32.xlu0 %v3835_v48, %s4944_s29  ;;  %3843 = vrot.lane.b32.xlu1 %v3834_v24, %s4944_s29 }
0x1809   :  { %v3828_v18 = vpop.permute.xlu1 %3827 }
0x180a   :  { %v3836_v53 = vmul.f32 %v6273_v12, %v3828_v18 }
0x180c   :  { %964 = vrot.lane.b32.xlu0 %v565_v59, %s4947_s3  ;;  %3847 = vrot.lane.b32.xlu1 %v3836_v53, %s4944_s29 }
0x1810   :  { %968 = vrot.lane.b32.xlu0 %v567_v11, %s4947_s3  ;;  %966 = vrot.lane.b32.xlu1 %v566_v17, %s4947_s3 }
0x1814   :  { %970 = vrot.lane.b32.xlu1 %v568_v56, %s4947_s3 }
0x1876   :  { %v3842_v26 = vpop.permute.xlu0 %3841 }
0x1877   :  { %v3853_v14 = vadd.f32 %v3842_v26, %v3813_v36 }
0x187a   :  { %v3846_v23 = vpop.permute.xlu0 %3845  ;;  %v3844_v5 = vpop.permute.xlu1 %3843 }
0x187b   :  { %v3855_v60 = vadd.f32 %v3846_v23, %v3815_v1  ;;  %v3854_v33 = vadd.f32 %v3844_v5, %v3814_v58 }
0x187d   :  { %4920 = vtanh.f32 %v3855_v60 }
0x187e   :  { %4922 = vtanh.f32 %v3854_v33  ;;  %v3848_v28 = vpop.permute.xlu1 %3847  ;;  %v6298_v44 = vpop.permute.xlu0 %964 }
0x187f   :  { %v3856_v13 = vadd.f32 %v3848_v28, %v3816_v4  ;;  %4924 = vtanh.f32 %v3853_v14  ;;  %v976_v25 = vmul.f32 %v6298_v44, %v5259_v30  ;;  %v1391_v30 = vmul.f32 %v5417_v19, %v6298_v44 }
0x1881   :  { %4926 = vtanh.f32 %v3856_v13 }
0x1882   :  { %v6301_v45 = vpop.permute.xlu1 %966  ;;  %v6307_v2 = vpop.permute.xlu0 %968 }
0x1883   :  { %v977_v49 = vmul.f32 %v6301_v45, %v5262_v32  ;;  %v978_v8 = vmul.f32 %v6307_v2, %v5267_v40  ;;  %v1392_v32 = vmul.f32 %v5420_v29, %v6301_v45  ;;  %v1393_v40 = vmul.f32 %v5425_v54, %v6307_v2 }
0x1884   :  { %v1807_v19 = vmul.f32 %v5634_v21, %v6301_v45  ;;  %v1808_v54 = vmul.f32 %v5642_v31, %v6307_v2  ;;  %v2222_v21 = vmul.f32 %v5847_v51, %v6301_v45  ;;  %v2223_v31 = vmul.f32 %v5836_v42, %v6307_v2 }
0x1885   :  { %v2637_v51 = vmul.f32 %v5982_v47, %v6301_v45  ;;  %v2638_v42 = vmul.f32 %v5990_v0, %v6307_v2  ;;  %v3052_v47 = vmul.f32 %v6119_v7, %v6301_v45  ;;  %v3053_v0 = vmul.f32 %v6107_v16, %v6307_v2 }
0x1886   :  { %v6311_v57 = vpop.permute.xlu1 %970  ;;  %v3467_v7 = vmul.f32 %v6229_v27, %v6301_v45  ;;  %v3468_v16 = vmul.f32 %v6237_v34, %v6307_v2 }
0x1887   :  { %v979_v48 = vmul.f32 %v6311_v57, %v5270_v41  ;;  %v1806_v41 = vmul.f32 %v5631_v63, %v6298_v44  ;;  %v1394_v29 = vmul.f32 %v5428_v55, %v6311_v57  ;;  %v2221_v63 = vmul.f32 %v5844_v35, %v6298_v44 }
0x1888   :  { %v1809_v55 = vmul.f32 %v5637_v46, %v6311_v57  ;;  %v2636_v35 = vmul.f32 %v5979_v6, %v6298_v44  ;;  %v2224_v46 = vmul.f32 %v5839_v9, %v6311_v57  ;;  %v3051_v6 = vmul.f32 %v6116_v20, %v6298_v44 }
0x1889   :  { %v2639_v9 = vmul.f32 %v5985_v52, %v6311_v57  ;;  %v3466_v20 = vmul.f32 %v6226_v15, %v6298_v44  ;;  %v3054_v52 = vmul.f32 %v6110_v22, %v6311_v57  ;;  %v3469_v15 = vmul.f32 %v6232_v3, %v6311_v57 }
0x188a   :  { %v4921_v61 = vpop.eup %4920 }
0x188b   :  { %v4923_v38 = vpop.eup %4922  ;;  %3869 = vrot.lane.b32.xlu0 %v4921_v61, %s4945_s30 }
0x188c   :  { %3867 = vrot.lane.b32.xlu1 %v4923_v38, %s4945_s30  ;;  %v4925_v50 = vpop.eup %4924 }
0x188e   :  { %v4927_v62 = vpop.eup %4926 }
0x188f   :  { %3865 = vrot.lane.b32.xlu0 %v4925_v50, %s4945_s30 }
0x1890   :  { %3871 = vrot.lane.b32.xlu1 %v4927_v62, %s4945_s30 }
0x1893   :  { %984 = vrot.lane.b32.xlu0 %v976_v25, %s4946_s22 }
0x1894   :  { %986 = vrot.lane.b32.xlu1 %v977_v49, %s4946_s22 }
0x1897   :  { %988 = vrot.lane.b32.xlu0 %v978_v8, %s4946_s22 }
0x1898   :  { %990 = vrot.lane.b32.xlu1 %v979_v48, %s4946_s22 }
0x189b   :  { %1399 = vrot.lane.b32.xlu0 %v1391_v30, %s4946_s22 }
0x189c   :  { %1401 = vrot.lane.b32.xlu1 %v1392_v32, %s4946_s22 }
0x189f   :  { %1403 = vrot.lane.b32.xlu0 %v1393_v40, %s4946_s22 }
0x18a0   :  { %1814 = vrot.lane.b32.xlu1 %v1806_v41, %s4946_s22 }
0x18a3   :  { %1816 = vrot.lane.b32.xlu0 %v1807_v19, %s4946_s22 }
0x18a4   :  { %1405 = vrot.lane.b32.xlu1 %v1394_v29, %s4946_s22 }
0x18a7   :  { %1818 = vrot.lane.b32.xlu0 %v1808_v54, %s4946_s22 }
0x18a8   :  { %2229 = vrot.lane.b32.xlu1 %v2221_v63, %s4946_s22 }
0x18ab   :  { %2231 = vrot.lane.b32.xlu0 %v2222_v21, %s4946_s22 }
0x18ac   :  { %1820 = vrot.lane.b32.xlu1 %v1809_v55, %s4946_s22 }
0x18af   :  { %2233 = vrot.lane.b32.xlu0 %v2223_v31, %s4946_s22 }
0x18b0   :  { %2644 = vrot.lane.b32.xlu1 %v2636_v35, %s4946_s22 }
0x18b3   :  { %2646 = vrot.lane.b32.xlu0 %v2637_v51, %s4946_s22 }
0x18b4   :  { %2235 = vrot.lane.b32.xlu1 %v2224_v46, %s4946_s22 }
0x18b7   :  { %2648 = vrot.lane.b32.xlu0 %v2638_v42, %s4946_s22 }
0x18b8   :  { %3059 = vrot.lane.b32.xlu1 %v3051_v6, %s4946_s22 }
0x18bb   :  { %3061 = vrot.lane.b32.xlu0 %v3052_v47, %s4946_s22 }
0x18bc   :  { %2650 = vrot.lane.b32.xlu1 %v2639_v9, %s4946_s22 }
0x18bf   :  { %3063 = vrot.lane.b32.xlu0 %v3053_v0, %s4946_s22 }
0x18c0   :  { %3474 = vrot.lane.b32.xlu1 %v3466_v20, %s4946_s22 }
0x18c3   :  { %3476 = vrot.lane.b32.xlu0 %v3467_v7, %s4946_s22 }
0x18c4   :  { %3065 = vrot.lane.b32.xlu1 %v3054_v52, %s4946_s22 }
0x18c7   :  { %3478 = vrot.lane.b32.xlu0 %v3468_v16, %s4946_s22 }
0x18c8   :  { %3480 = vrot.lane.b32.xlu1 %v3469_v15, %s4946_s22 }
0x18fd   :  { %v3870_v24 = vpop.permute.xlu0 %3869 }
0x18fe   :  { %v3868_v18 = vpop.permute.xlu1 %3867  ;;  %v3879_v22 = vmul.f32 %v6264_v43, %v3870_v24 }
0x18ff   :  { %v3878_v27 = vmul.f32 %v6267_v39, %v3868_v18 }
0x1900   :  { %v3883_v56 = vmul.f32 %v3879_v22, %v6307_v2 }
0x1901   :  { %v3882_v59 = vmul.f32 %v3878_v27, %v6301_v45  ;;  %v3866_v53 = vpop.permute.xlu0 %3865 }
0x1902   :  { %v3877_v11 = vmul.f32 %v6261_v37, %v3866_v53  ;;  %v3872_v17 = vpop.permute.xlu1 %3871 }
0x1903   :  { %3891 = vrot.lane.b32.xlu0 %v3882_v59, %s4946_s22  ;;  %v3880_v34 = vmul.f32 %v6273_v12, %v3872_v17 }
0x1904   :  { %v3881_v3 = vmul.f32 %v3877_v11, %v6298_v44 }
0x1905   :  { %v985_v26 = vpop.permute.xlu0 %984  ;;  %v3884_v43 = vmul.f32 %v3880_v34, %v6311_v57 }
0x1906   :  { %v987_v1 = vpop.permute.xlu1 %986  ;;  %3889 = vrot.lane.b32.xlu1 %v3881_v3, %s4946_s22  ;;  %v996_v4 = vsel %vm581_vm9, %v985_v26, 0.0 }
0x1907   :  { %3893 = vrot.lane.b32.xlu0 %v3883_v56, %s4946_s22  ;;  %v997_v28 = vsel %vm581_vm9, %v987_v1, 0.0 }
0x1908   :  { %v998_v38 = vadd.f32 %v997_v28, %v996_v4 }
0x1909   :  { %v989_v39 = vpop.permute.xlu0 %988 }
0x190a   :  { %v991_v58 = vpop.permute.xlu1 %990  ;;  %3895 = vrot.lane.b32.xlu1 %v3884_v43, %s4946_s22  ;;  %v999_v13 = vsel %vm581_vm9, %v989_v39, 0.0 }
0x190b   :  { %v1000_v50 = vadd.f32 %v999_v13, %v998_v38  ;;  %v1001_v2 = vsel %vm581_vm9, %v991_v58, 0.0 }
0x190d   :  { %v1400_v37 = vpop.permute.xlu0 %1399  ;;  %v1002_v8 = vadd.f32 %v1001_v2, %v1000_v50 }
0x190e   :  { %v1402_v36 = vpop.permute.xlu1 %1401  ;;  %v1411_v30 = vsel %vm581_vm9, %v1400_v37, 0.0 }
0x190f   :  { %v1412_v32 = vsel %vm581_vm9, %v1402_v36, 0.0 }
0x1910   :  { %v1413_v31 = vadd.f32 %v1412_v32, %v1411_v30 }
0x1911   :  { %v1404_v23 = vpop.permute.xlu0 %1403 }
0x1912   :  { %v1815_v5 = vpop.permute.xlu1 %1814  ;;  %v1414_v63 = vsel %vm581_vm9, %v1404_v23, 0.0 }
0x1913   :  { %v1826_v49 = vsel %vm581_vm9, %v1815_v5, 0.0  ;;  %v1415_v9 = vadd.f32 %v1414_v63, %v1413_v31 }
0x1915   :  { %v1817_v60 = vpop.permute.xlu0 %1816 }
0x1916   :  { %v1406_v12 = vpop.permute.xlu1 %1405  ;;  %v1827_v45 = vsel %vm581_vm9, %v1817_v60, 0.0 }
0x1917   :  { %v1828_v48 = vadd.f32 %v1827_v45, %v1826_v49  ;;  %v1416_v46 = vsel %vm581_vm9, %v1406_v12, 0.0 }
0x1918   :  { %v1417_v16 = vadd.f32 %v1416_v46, %v1415_v9 }
0x1919   :  { %v1819_v33 = vpop.permute.xlu0 %1818 }
0x191a   :  { %v2230_v14 = vpop.permute.xlu1 %2229  ;;  %v1829_v57 = vsel %vm581_vm9, %v1819_v33, 0.0 }
0x191b   :  { %v1830_v29 = vadd.f32 %v1829_v57, %v1828_v48  ;;  %v2241_v21 = vsel %vm581_vm9, %v2230_v14, 0.0 }
0x191d   :  { %v2232_v61 = vpop.permute.xlu0 %2231 }
0x191e   :  { %v1821_v44 = vpop.permute.xlu1 %1820  ;;  %v2242_v40 = vsel %vm581_vm9, %v2232_v61, 0.0 }
0x191f   :  { %v1831_v41 = vsel %vm581_vm9, %v1821_v44, 0.0  ;;  %v2243_v35 = vadd.f32 %v2242_v40, %v2241_v21 }
0x1920   :  { %v1832_v51 = vadd.f32 %v1831_v41, %v1830_v29 }
0x1921   :  { %v2234_v62 = vpop.permute.xlu0 %2233 }
0x1922   :  { %v2645_v25 = vpop.permute.xlu1 %2644  ;;  %v2244_v55 = vsel %vm581_vm9, %v2234_v62, 0.0 }
0x1923   :  { %v2245_v0 = vadd.f32 %v2244_v55, %v2243_v35  ;;  %v2656_v7 = vsel %vm581_vm9, %v2645_v25, 0.0 }
0x1925   :  { %v2647_v19 = vpop.permute.xlu0 %2646 }
0x1926   :  { %1003 = vadd.xlane.f32.xlu0 %v1002_v8  ;;  %v2236_v54 = vpop.permute.xlu1 %2235  ;;  %v2657_v42 = vsel %vm581_vm9, %v2647_v19, 0.0  ;;  %v14_v8 = vstv %s6452_s8 }
0x1927   :  { %v2246_v6 = vsel %vm581_vm9, %v2236_v54, 0.0  ;;  %v2658_v15 = vadd.f32 %v2657_v42, %v2656_v7  ;;  %15 = vst [vmem:[#allocation3] sm:$0x1] %v14_v8 }
0x1928   :  { %v2247_v24 = vadd.f32 %v2246_v6, %v2245_v0 }
0x1929   :  { %v2649_v47 = vpop.permute.xlu0 %2648 }
0x192a   :  { %1833 = vadd.xlane.f32.xlu0 %v1832_v51  ;;  %v3060_v20 = vpop.permute.xlu1 %3059  ;;  %v2659_v52 = vsel %vm581_vm9, %v2649_v47, 0.0 }
0x192b   :  { %v2660_v27 = vadd.f32 %v2659_v52, %v2658_v15  ;;  %v3071_v34 = vsel %vm581_vm9, %v3060_v20, 0.0 }
0x192d   :  { %v3062_v18 = vpop.permute.xlu0 %3061 }
0x192e   :  { %2248 = vadd.xlane.f32.xlu0 %v2247_v24  ;;  %v2651_v22 = vpop.permute.xlu1 %2650  ;;  %1418 = vadd.xlane.f32.xlu1 %v1417_v16  ;;  %v3072_v11 = vsel %vm581_vm9, %v3062_v18, 0.0 }
0x192f   :  { %v2661_v59 = vsel %vm581_vm9, %v2651_v22, 0.0  ;;  %v3073_v26 = vadd.f32 %v3072_v11, %v3071_v34 }
0x1930   :  { %v2662_v53 = vadd.f32 %v2661_v59, %v2660_v27 }
0x1931   :  { %v3064_v17 = vpop.permute.xlu0 %3063 }
0x1932   :  { %v3475_v3 = vpop.permute.xlu1 %3474  ;;  %2663 = vadd.xlane.f32.xlu1 %v2662_v53  ;;  %v3074_v56 = vsel %vm581_vm9, %v3064_v17, 0.0 }
0x1933   :  { %v3075_v43 = vadd.f32 %v3074_v56, %v3073_v26  ;;  %v3486_v36 = vsel %vm581_vm9, %v3475_v3, 0.0 }
0x1935   :  { %v3477_v1 = vpop.permute.xlu0 %3476 }
0x1936   :  { %v3487_v39 = vsel %vm581_vm9, %v3477_v1, 0.0  ;;  %v3066_v58 = vpop.permute.xlu1 %3065 }
0x1937   :  { %v3076_v37 = vsel %vm581_vm9, %v3066_v58, 0.0  ;;  %v3488_v5 = vadd.f32 %v3487_v39, %v3486_v36 }
0x1938   :  { %v3077_v23 = vadd.f32 %v3076_v37, %v3075_v43 }
0x1939   :  { %v3479_v60 = vpop.permute.xlu0 %3478 }
0x193a   :  { %v3489_v12 = vsel %vm581_vm9, %v3479_v60, 0.0  ;;  %3078 = vadd.xlane.f32.xlu0 %v3077_v23  ;;  %v3481_v33 = vpop.permute.xlu1 %3480 }
0x193b   :  { %v3490_v14 = vadd.f32 %v3489_v12, %v3488_v5  ;;  %v3491_v4 = vsel %vm581_vm9, %v3481_v33, 0.0 }
0x193d   :  { %v3492_v28 = vadd.f32 %v3491_v4, %v3490_v14 }
0x193f   :  { %3493 = vadd.xlane.f32.xlu1 %v3492_v28 }
0x1975   :  { %v3892_v13 = vpop.permute.xlu0 %3891 }
0x1976   :  { %v3902_v38 = vsel %vm581_vm9, %v3892_v13, 0.0 }
0x1978   :  { %v3890_v61 = vpop.permute.xlu1 %3889 }
0x1979   :  { %v3894_v44 = vpop.permute.xlu0 %3893  ;;  %v3901_v50 = vsel %vm581_vm9, %v3890_v61, 0.0 }
0x197a   :  { %v3903_v45 = vadd.f32 %v3902_v38, %v3901_v50  ;;  %v3904_v62 = vsel %vm581_vm9, %v3894_v44, 0.0 }
0x197c   :  { %v3905_v25 = vadd.f32 %v3904_v62, %v3903_v45  ;;  %v3896_v2 = vpop.permute.xlu1 %3895  ;;  %v570_v45 = vshrl.u32 %v67_v10, 7 }
0x197d   :  { %v3906_v49 = vsel %vm581_vm9, %v3896_v2, 0.0 }
0x197e   :  { %v3907_v57 = vadd.f32 %v3906_v49, %v3905_v25  ;;  %vm1427_vm4 = vcmp.eq.s32.totalorder %v570_v45, 1  ;;  %vm1012_vm9 = vcmp.eq.s32.totalorder %v570_v45, 0  ;;  %vm1842_vm5 = vcmp.eq.s32.totalorder %v570_v45, 2 }
0x197f   :  { %vm2257_vm6 = vcmp.eq.s32.totalorder %v570_v45, 3  ;;  %vm2672_vm7 = vcmp.eq.s32.totalorder %v570_v45, 4  ;;  %vm3087_vm8 = vcmp.eq.s32.totalorder %v570_v45, 5  ;;  %vm3502_vm10 = vcmp.eq.s32.totalorder %v570_v45, 6 }
0x1980   :  { %3908 = vadd.xlane.f32.xlu0 %v3907_v57  ;;  %vm3917_vm11 = vcmp.eq.s32.totalorder %v570_v45, 7 }
0x19af   :  { %v1004_v48 = vpop.xlane.xlu0 %1003 }
0x19b0   :  { %v1005_v30 = vrot.slane %v1004_v48, 4 }
0x19b2   :  { %v1006_v32 = vadd.f32 %v1005_v30, %v1004_v48 }
0x19b3   :  { %v1834_v40 = vpop.xlane.xlu0 %1833 }
0x19b4   :  { %v1007_v41 = vrot.slane %v1006_v32, 2  ;;  %v1835_v19 = vrot.slane %v1834_v40, 4 }
0x19b6   :  { %v1836_v29 = vadd.f32 %v1835_v19, %v1834_v40  ;;  %v1008_v54 = vadd.f32 %v1007_v41, %v1006_v32 }
0x19b7   :  { %v2249_v63 = vpop.xlane.xlu0 %2248  ;;  %v1419_v21 = vpop.xlane.xlu1 %1418 }
0x19b8   :  { %v1837_v55 = vrot.slane %v1836_v29, 2  ;;  %v2250_v31 = vrot.slane %v2249_v63, 4  ;;  %v1420_v35 = vrot.slane %v1419_v21, 4  ;;  %v1009_v51 = vrot.slane %v1008_v54, 1 }
0x19ba   :  { %v2251_v46 = vadd.f32 %v2250_v31, %v2249_v63  ;;  %v1421_v42 = vadd.f32 %v1420_v35, %v1419_v21  ;;  %v1010_v6 = vadd.f32 %v1009_v51, %v1008_v54  ;;  %v1838_v9 = vadd.f32 %v1837_v55, %v1836_v29 }
0x19bb   :  { %v2664_v47 = vpop.xlane.xlu1 %2663 }
0x19bc   :  { %v2252_v0 = vrot.slane %v2251_v46, 2  ;;  %v1422_v20 = vrot.slane %v1421_v42, 2  ;;  %4384 = vpush %v1010_v6  ;;  %v2665_v7 = vrot.slane %v2664_v47, 4  ;;  %v1839_v24 = vrot.slane %v1838_v9, 1 }
0x19be   :  { %v2666_v52 = vadd.f32 %v2665_v7, %v2664_v47  ;;  %v1423_v16 = vadd.f32 %v1422_v20, %v1421_v42  ;;  %v2253_v15 = vadd.f32 %v2252_v0, %v2251_v46  ;;  %v1840_v3 = vadd.f32 %v1839_v24, %v1838_v9  ;;  %v4106_v42 = vld [vmem:[#allocation3] ss:$0 sm:$0xff] }
0x19c0   :  { %v2667_v18 = vrot.slane %v2666_v52, 2  ;;  %v1424_v27 = vrot.slane %v1423_v16, 1  ;;  %v2254_v22 = vrot.slane %v2253_v15, 1 }
0x19c2   :  { %v1425_v59 = vadd.f32 %v1424_v27, %v1423_v16  ;;  %v2255_v53 = vadd.f32 %v2254_v22, %v2253_v15  ;;  %v2668_v11 = vadd.f32 %v2667_v18, %v2666_v52 }
0x19c3   :  { %v3079_v17 = vpop.xlane.xlu0 %3078 }
0x19c4   :  { %v3080_v34 = vrot.slane %v3079_v17, 4  ;;  %4386 = vpush %v1425_v59  ;;  %v2669_v56 = vrot.slane %v2668_v11, 1 }
0x19c5   :  { %4388 = vpush %v1840_v3 }
0x19c6   :  { %v3081_v26 = vadd.f32 %v3080_v34, %v3079_v17  ;;  %4390 = vpush %v2255_v53  ;;  %v2670_v1 = vadd.f32 %v2669_v56, %v2668_v11 }
0x19c8   :  { %v3082_v43 = vrot.slane %v3081_v26, 2  ;;  %4392 = vpush %v2670_v1  ;;  %v3494_v39 = vpop.xlane.xlu1 %3493 }
0x19c9   :  { %v3495_v58 = vrot.slane %v3494_v39, 4 }
0x19ca   :  { %v3083_v37 = vadd.f32 %v3082_v43, %v3081_v26 }
0x19cb   :  { %v3496_v36 = vadd.f32 %v3495_v58, %v3494_v39 }
0x19cc   :  { %v3084_v23 = vrot.slane %v3083_v37, 1 }
0x19cd   :  { %v3497_v5 = vrot.slane %v3496_v36, 2 }
0x19ce   :  { %v3085_v60 = vadd.f32 %v3084_v23, %v3083_v37 }
0x19cf   :  { %v3498_v12 = vadd.f32 %v3497_v5, %v3496_v36 }
0x19d0   :  { %4394 = vpush %v3085_v60 }
0x19d1   :  { %v3499_v33 = vrot.slane %v3498_v12, 1 }
0x19d3   :  { %v3500_v14 = vadd.f32 %v3499_v33, %v3498_v12 }
0x19d5   :  { %4396 = vpush %v3500_v14 }
0x19ed   :  { %s4385_s8 = spop %4384 }
0x19ee   :  { %v1013_v25 = vstv %s4385_s8 }
0x19ef   :  { %v1014_v49 = vsel %vm1012_vm9, %v1013_v25, 0.0 }
0x19f5   :  { %s4387_s30 = spop %4386 }
0x19f6   :  { %v1428_v62 = vstv %s4387_s30  ;;  %s4389_s22 = spop %4388 }
0x19f7   :  { %v1429_v2 = vsel %vm1427_vm4, %v1428_v62, 0.0  ;;  %v1843_v8 = vstv %s4389_s22  ;;  %s4391_s18 = spop %4390 }
0x19f8   :  { %v1430_v57 = vadd.f32 %v1429_v2, %v1014_v49  ;;  %v1844_v48 = vsel %vm1842_vm5, %v1843_v8, 0.0  ;;  %v2258_v32 = vstv %s4391_s18 }
0x19f9   :  { %s4393_s19 = spop %4392  ;;  %v2259_v40 = vsel %vm2257_vm6, %v2258_v32, 0.0 }
0x19fa   :  { %v1845_v30 = vadd.f32 %v1844_v48, %v1430_v57  ;;  %v2673_v41 = vstv %s4393_s19 }
0x19fb   :  { %v2674_v54 = vsel %vm2672_vm7, %v2673_v41, 0.0 }
0x19fc   :  { %v2260_v10 = vadd.f32 %v2259_v40, %v1845_v30 }
0x19fe   :  { %v2675_v21 = vadd.f32 %v2674_v54, %v2260_v10 }
0x1a01   :  { %s4395_s20 = spop %4394 }
0x1a02   :  { %v3088_v19 = vstv %s4395_s20 }
0x1a03   :  { %v3089_v63 = vsel %vm3087_vm8, %v3088_v19, 0.0 }
0x1a04   :  { %v3090_v31 = vadd.f32 %v3089_v63, %v2675_v21 }
0x1a06   :  { %s4397_s21 = spop %4396 }
0x1a07   :  { %v3503_v29 = vstv %s4397_s21 }
0x1a08   :  { %v3504_v55 = vsel %vm3502_vm10, %v3503_v29, 0.0 }
0x1a09   :  { %v3909_v4 = vpop.xlane.xlu0 %3908  ;;  %v3505_v35 = vadd.f32 %v3504_v55, %v3090_v31 }
0x1a0a   :  { %v3910_v28 = vrot.slane %v3909_v4, 4 }
0x1a0c   :  { %v3911_v13 = vadd.f32 %v3910_v28, %v3909_v4 }
0x1a0e   :  { %v3912_v61 = vrot.slane %v3911_v13, 2 }
0x1a10   :  { %v3913_v38 = vadd.f32 %v3912_v61, %v3911_v13 }
0x1a12   :  { %v3914_v44 = vrot.slane %v3913_v38, 1 }
0x1a14   :  { %v3915_v50 = vadd.f32 %v3914_v44, %v3913_v38 }
0x1a16   :  { %4398 = vpush %v3915_v50 }
0x1a47   :  { %s4399_s23 = spop %4398 }
0x1a48   :  { %v3918_v51 = vstv %s4399_s23 }
0x1a49   :  { %v3919_v46 = vsel %vm3917_vm11, %v3918_v51, 0.0 }
0x1a4a   :  { %v3920_v6 = vadd.f32 %v3919_v46, %v3505_v35 }
0x1a4c   :  { %v3928_v47 = vadd.f32 %v4106_v42, %v3920_v6 }
0x1a4e   :  { %v4107_v9 = vmul.f32 -1.442695, %v3928_v47 }
0x1a50   :  { %4928 = vpow2.f32 %v4107_v9 }
0x1a5d   :  { %v4929_v0 = vpop.eup %4928 }
0x1a5e   :  { %v3932_v20 = vadd.f32 1.0, %v4929_v0 }
0x1a60   :  { %4930 = vrcp.f32 %v3932_v20 }
0x1a6d   :  { %v4931_v7 = vpop.eup %4930 }
0x1a6e   :  { %3936 = vst.msk [vmem:[%s6453_s9] sm:$0xff] %vm3935_vm12, %v4931_v7 }

</bundles_post_ra>
